<compile_context>
chip_gen: v5e
topology: v5e:2x2
jax: 0.10.0
libtpu: 0.0.40
codegen_flags: <defaults>
</compile_context>

<pallas_src>
import functools

import jax
import jax.numpy as jnp
from jax.experimental import pallas as pl
from jax.experimental.pallas import tpu as pltpu


# ----------------------------------------------------------------------------
# In-kernel helpers (pure jnp on VMEM-resident values)
# ----------------------------------------------------------------------------

def _bf16_dot(x_f32, w_bf16):
    """MXU matmul: bf16 operands, f32 accumulation."""
    return jnp.dot(x_f32.astype(jnp.bfloat16), w_bf16,
                   preferred_element_type=jnp.float32)


def _layer_norm(x, g, b, eps=1e-5):
    mean = jnp.mean(x, axis=-1, keepdims=True)
    var = jnp.mean((x - mean) ** 2, axis=-1, keepdims=True)
    return (x - mean) * jax.lax.rsqrt(var + eps) * g + b


def _attend(q, k, v, wo, num_heads, mask):
    """Multi-head softmax attention, output projection folded in.

    q: (Sq, D), k/v: (Sk, D) f32 with heads packed along the feature axis
    (the softmax scale is already folded into the Q projection weights).
    wo: (D, Dout) bf16.  Returns sum_h softmax(q_h k_h^T) v_h @ Wo_h : (Sq, Dout) f32.
    """
    _, D = q.shape
    Dh = D // num_heads
    out = None
    for h in range(num_heads):                       # static unroll; H is tiny
        sl = slice(h * Dh, (h + 1) * Dh)
        s = jax.lax.dot_general(q[:, sl], k[:, sl], (((1,), (1,)), ((), ())),
                                preferred_element_type=jnp.float32)
        if mask is not None:
            s = jnp.where(mask, s, jnp.float32(-1e30))
        m = jnp.max(s, axis=-1, keepdims=True)
        p = jnp.exp(s - m)
        p = p * pl.reciprocal(jnp.sum(p, axis=-1, keepdims=True), approx=True)
        oh = jnp.dot(p, v[:, sl], preferred_element_type=jnp.float32)
        contrib = _bf16_dot(oh, wo[sl, :])           # fold out-proj, no concat
        out = contrib if out is None else out + contrib
    return out


def _enc_block(x, wqkv, wo, w1, w2, vec, num_heads):
    """Post-LN transformer encoder layer (MHA + ReLU FFN)."""
    D = x.shape[-1]
    F = w1.shape[-1]
    bqkv = vec[0:1, :3 * D]
    bo = vec[1:2, :D]
    b1 = vec[2:3, :F]
    b2 = vec[3:4, :D]
    g1, be1 = vec[4:5, :D], vec[5:6, :D]
    g2, be2 = vec[6:7, :D], vec[7:8, :D]

    qkv = _bf16_dot(x, wqkv) + bqkv
    a = _attend(qkv[:, :D], qkv[:, D:2 * D], qkv[:, 2 * D:], wo, num_heads, None) + bo
    x = _layer_norm(x + a, g1, be1)
    h = jnp.maximum(_bf16_dot(x, w1) + b1, 0.0)
    f = _bf16_dot(h, w2) + b2
    return _layer_norm(x + f, g2, be2)


def _dec_block(x, img, wqkv, wso, wcq, wckv, wco, w1, w2, vec, num_heads, causal):
    """Post-LN decoder layer: causal self-attn, cross-attn on image, ReLU FFN."""
    Dw = x.shape[-1]
    F = w1.shape[-1]
    bqkv = vec[0:1, :3 * Dw]
    bso = vec[1:2, :Dw]
    bcq = vec[2:3, :Dw]
    bckv = vec[3:4, :2 * Dw]
    bco = vec[4:5, :Dw]
    b1 = vec[5:6, :F]
    b2 = vec[6:7, :Dw]
    g1, be1 = vec[7:8, :Dw], vec[8:9, :Dw]
    g2, be2 = vec[9:10, :Dw], vec[10:11, :Dw]
    g3, be3 = vec[11:12, :Dw], vec[12:13, :Dw]

    # --- causal self-attention (fused Q|K|V projection) ---
    qkv = _bf16_dot(x, wqkv) + bqkv
    a = _attend(qkv[:, :Dw], qkv[:, Dw:2 * Dw], qkv[:, 2 * Dw:], wso,
                num_heads, causal) + bso
    x = _layer_norm(x + a, g1, be1)
    # --- cross-attention over image embeddings (fused K|V projection) ---
    qc = _bf16_dot(x, wcq) + bcq
    kv = _bf16_dot(img, wckv) + bckv
    c = _attend(qc, kv[:, :Dw], kv[:, Dw:], wco, num_heads, None) + bco
    x = _layer_norm(x + c, g2, be2)
    # --- FFN + residual + LayerNorm ---
    h = jnp.maximum(_bf16_dot(x, w1) + b1, 0.0)
    f = _bf16_dot(h, w2) + b2
    return _layer_norm(x + f, g3, be3)


# ----------------------------------------------------------------------------
# The single fused kernel: one grid step = one batch element, full network in VMEM.
# ----------------------------------------------------------------------------

def _forward_kernel(patches_ref, xtok_ref, pw_ref, pos_ref,
                    ewqkv_ref, ewo_ref, ew1_ref, ew2_ref, evec_ref,
                    dwqkv_ref, dwso_ref, dwcq_ref, dwckv_ref, dwco_ref,
                    dw1_ref, dw2_ref, dvec_ref,
                    ow_ref, ob_ref, o_ref,
                    *, heads_enc, heads_dec, n_enc, n_dec):
    # ---------------- ViT encoder: patch embed + n_enc layers ----------------
    img = _bf16_dot(patches_ref[0], pw_ref[...]) + pos_ref[...]   # bias folded in pos
    for l in range(n_enc):
        img = _enc_block(img, ewqkv_ref[l], ewo_ref[l], ew1_ref[l], ew2_ref[l],
                         evec_ref[l], heads_enc)

    # ---------------- caption decoder: n_dec layers + vocab projection -------
    x = xtok_ref[0]                                               # (S, Dw) f32
    S = x.shape[0]
    row = jax.lax.broadcasted_iota(jnp.int32, (S, S), 0)          # mask built once
    col = jax.lax.broadcasted_iota(jnp.int32, (S, S), 1)
    causal = col <= row
    for l in range(n_dec):
        x = _dec_block(x, img, dwqkv_ref[l], dwso_ref[l], dwcq_ref[l],
                       dwckv_ref[l], dwco_ref[l], dw1_ref[l], dw2_ref[l],
                       dvec_ref[l], heads_dec, causal)

    y = _bf16_dot(x, ow_ref[...]) + ob_ref[...]                   # (S, Vpad) lane-dense
    o_ref[0] = y.astype(o_ref.dtype)


# ----------------------------------------------------------------------------
# Wrapper
# ----------------------------------------------------------------------------

def _rep(arr):
    """Replicated (grid-invariant) full-array BlockSpec: fetched once, kept in VMEM."""
    zeros = (0,) * arr.ndim
    return pl.BlockSpec(arr.shape, lambda i: zeros)


def transformer_forward(tokens, patches, params):
    enc, dec = params["enc"], params["dec"]
    B, S = tokens.shape
    P, K = patches.shape[1], patches.shape[2]
    Dw = dec["tok_emb"].shape[1]
    Vp = dec["out_w"].shape[1]

    # Token-embedding gather + positional add: tiny JAX glue outside the kernel.
    x_tok = dec["tok_emb"][tokens] + dec["pos"][None, :S]

    kernel = functools.partial(
        _forward_kernel,
        heads_enc=enc["heads"], heads_dec=dec["heads"],
        n_enc=enc["wqkv"].shape[0], n_dec=dec["wqkv"].shape[0])

    operands = (patches, x_tok,
                enc["patch_w"], enc["pos"],
                enc["wqkv"], enc["wo"], enc["w1"], enc["w2"], enc["vec"],
                dec["wqkv"], dec["wso"], dec["wcq"], dec["wckv"], dec["wco"],
                dec["w1"], dec["w2"], dec["vec"],
                dec["out_w"], dec["out_b"])

    in_specs = [pl.BlockSpec((1, P, K), lambda i: (i, 0, 0)),
                pl.BlockSpec((1, S, Dw), lambda i: (i, 0, 0))]
    in_specs += [_rep(a) for a in operands[2:]]

    logits = pl.pallas_call(
        kernel,
        out_shape=jax.ShapeDtypeStruct((B, S, Vp), jnp.float32),
        grid=(B,),
        in_specs=in_specs,
        out_specs=pl.BlockSpec((1, S, Vp), lambda i: (i, 0, 0)),
        compiler_params=pltpu.CompilerParams(
            dimension_semantics=("parallel",)),      # v7x: one batch elem per TC
    )(*operands)
    return logits[..., :dec["vocab"]]                # slice away lane padding


# ----------------------------------------------------------------------------
# Deterministic synthetic parameter init (shapes follow the module's __init__).
# Weights stored bf16; biases / LN / embeddings f32; per-layer weights stacked on a
# leading layer axis; all per-layer vectors packed into one (L, rows, W) array.
# ----------------------------------------------------------------------------

def _w(key, din, dout, scale=0.02):
    return scale * jax.random.normal(key, (din, dout), jnp.float32)


def _pack_rows(vectors, width):
    rows = [jnp.pad(v, (0, width - v.shape[0])) for v in vectors]
    return jnp.stack(rows, axis=0)                   # (n_rows, width) f32


def _stack(layer_dicts):
    return {k: jnp.stack([ld[k] for ld in layer_dicts], axis=0)
            for k in layer_dicts[0].keys()}


def _enc_layer_params(key, d, f, heads):
    k1, k2, k3, k4 = jax.random.split(key, 4)
    sc = 1.0 / float(d // heads) ** 0.5
    qscale = jnp.concatenate([jnp.full((d,), sc, jnp.float32),
                              jnp.ones((2 * d,), jnp.float32)])[None, :]
    wqkv = _w(k1, d, 3 * d) * qscale                 # softmax scale folded into Q
    wo = _w(k2, d, d)
    w1 = _w(k3, d, f)
    w2 = _w(k4, f, d)
    z = jnp.zeros((d,), jnp.float32)
    one = jnp.ones((d,), jnp.float32)
    vec = _pack_rows([jnp.zeros((3 * d,), jnp.float32), z,
                      jnp.zeros((f,), jnp.float32), z,
                      one, z, one, z],               # bqkv,bo,b1,b2,ln1_g,ln1_b,ln2_g,ln2_b
                     max(3 * d, f, d))
    bf = lambda a: a.astype(jnp.bfloat16)
    return dict(wqkv=bf(wqkv), wo=bf(wo), w1=bf(w1), w2=bf(w2), vec=vec)


def _dec_layer_params(key, dw, di, f, heads):
    ks = jax.random.split(key, 7)
    sc = 1.0 / float(dw // heads) ** 0.5
    qscale = jnp.concatenate([jnp.full((dw,), sc, jnp.float32),
                              jnp.ones((2 * dw,), jnp.float32)])[None, :]
    wqkv = _w(ks[0], dw, 3 * dw) * qscale            # self-attn scale folded into Q
    wso = _w(ks[1], dw, dw)
    wcq = _w(ks[2], dw, dw) * sc                     # cross-attn scale folded into Q
    wckv = _w(ks[3], di, 2 * dw)
    wco = _w(ks[4], dw, dw)
    w1 = _w(ks[5], dw, f)
    w2 = _w(ks[6], f, dw)
    z = jnp.zeros((dw,), jnp.float32)
    one = jnp.ones((dw,), jnp.float32)
    vec = _pack_rows([jnp.zeros((3 * dw,), jnp.float32), z, z,
                      jnp.zeros((2 * dw,), jnp.float32), z,
                      jnp.zeros((f,), jnp.float32), z,
                      one, z, one, z, one, z],       # bqkv,bso,bcq,bckv,bco,b1,b2,ln1..ln3
                     max(3 * dw, 2 * dw, f, dw))
    bf = lambda a: a.astype(jnp.bfloat16)
    return dict(wqkv=bf(wqkv), wso=bf(wso), wcq=bf(wcq), wckv=bf(wckv),
                wco=bf(wco), w1=bf(w1), w2=bf(w2), vec=vec)


def init_params(key, *, vocab_size, patch_size, word_embed_dim, img_embed_dim,
                ff_dim_decoder, num_patches, num_layers_encoder,
                num_layers_decoder, num_heads_encoder, num_heads_decoder,
                ff_dim_encoder, max_seq_len):
    patch_dim = patch_size * patch_size * 3
    ke, kd = jax.random.split(key)

    # ---- ViT encoder ----
    ke_w, ke_pos, ke_l = jax.random.split(ke, 3)
    patch_w = _w(ke_w, patch_dim, img_embed_dim)
    patch_b = jnp.zeros((img_embed_dim,), jnp.float32)
    pos_e = 0.02 * jax.random.normal(ke_pos, (num_patches, img_embed_dim), jnp.float32)
    enc_layers = _stack([_enc_layer_params(k, img_embed_dim, ff_dim_encoder,
                                           num_heads_encoder)
                         for k in jax.random.split(ke_l, num_layers_encoder)])
    enc = dict(patch_w=patch_w.astype(jnp.bfloat16),
               pos=pos_e + patch_b[None, :],         # patch-embed bias folded into pos
               heads=num_heads_encoder, **enc_layers)

    # ---- Caption decoder ----
    kd_emb, kd_pos, kd_l, kd_out = jax.random.split(kd, 4)
    tok_emb = 0.02 * jax.random.normal(kd_emb, (vocab_size, word_embed_dim), jnp.float32)
    pos_d = 0.02 * jax.random.normal(kd_pos, (max_seq_len, word_embed_dim), jnp.float32)
    dec_layers = _stack([_dec_layer_params(k, word_embed_dim, img_embed_dim,
                                           ff_dim_decoder, num_heads_decoder)
                         for k in jax.random.split(kd_l, num_layers_decoder)])
    vpad = ((vocab_size + 127) // 128) * 128         # lane-dense logits store
    out_w = jnp.pad(_w(kd_out, word_embed_dim, vocab_size),
                    ((0, 0), (0, vpad - vocab_size))).astype(jnp.bfloat16)
    out_b = jnp.zeros((1, vpad), jnp.float32)
    dec = dict(tok_emb=tok_emb, pos=pos_d, out_w=out_w, out_b=out_b,
               heads=num_heads_decoder, vocab=vocab_size, **dec_layers)
    return dict(enc=enc, dec=dec)


# ----------------------------------------------------------------------------
# Main
# ----------------------------------------------------------------------------

if __name__ == "__main__":
    # Small, module-consistent hyperparameters.
    vocab_size = 64
    patch_size = 4
    word_embed_dim = 32
    img_embed_dim = 32
    ff_dim_decoder = 64
    num_patches = 16
    num_layers_encoder = 2
    num_layers_decoder = 2
    num_heads_encoder = 4
    num_heads_decoder = 4
    ff_dim_encoder = 64

    patch_dim = patch_size * patch_size * 3          # flattened RGB patch
    B, S = 2, 8                                      # B even -> both v7x TCs get work

    key = jax.random.PRNGKey(0)
    k_params, k_tok, k_patch = jax.random.split(key, 3)

    params = init_params(
        k_params,
        vocab_size=vocab_size, patch_size=patch_size,
        word_embed_dim=word_embed_dim, img_embed_dim=img_embed_dim,
        ff_dim_decoder=ff_dim_decoder, num_patches=num_patches,
        num_layers_encoder=num_layers_encoder, num_layers_decoder=num_layers_decoder,
        num_heads_encoder=num_heads_encoder, num_heads_decoder=num_heads_decoder,
        ff_dim_encoder=ff_dim_encoder, max_seq_len=S,
    )

    tokens = jax.random.randint(k_tok, (B, S), 0, vocab_size, dtype=jnp.int32)
    patches = jax.random.normal(k_patch, (B, num_patches, patch_dim), jnp.float32)

    fwd = jax.jit(lambda t, p: transformer_forward(t, p, params))
    logits = fwd(tokens, patches)
    jax.block_until_ready(logits)

    assert logits.shape == (B, S, vocab_size), logits.shape
    assert jnp.all(jnp.isfinite(logits))
    print("KERNEL_OK")
</pallas_src>

<mosaic_0001>
module attributes {stable_mosaic.version = 11 : i64} {
  func.func @_forward_kernel(%arg0: i32, %arg1: memref<1x16x48xf32, #tpu.memory_space<vmem>>, %arg2: memref<1x8x32xf32, #tpu.memory_space<vmem>>, %arg3: memref<48x32xbf16, #tpu.memory_space<vmem>>, %arg4: memref<16x32xf32, #tpu.memory_space<vmem>>, %arg5: memref<2x32x96xbf16, #tpu.memory_space<vmem>>, %arg6: memref<2x32x32xbf16, #tpu.memory_space<vmem>>, %arg7: memref<2x32x64xbf16, #tpu.memory_space<vmem>>, %arg8: memref<2x64x32xbf16, #tpu.memory_space<vmem>>, %arg9: memref<2x8x96xf32, #tpu.memory_space<vmem>>, %arg10: memref<2x32x96xbf16, #tpu.memory_space<vmem>>, %arg11: memref<2x32x32xbf16, #tpu.memory_space<vmem>>, %arg12: memref<2x32x32xbf16, #tpu.memory_space<vmem>>, %arg13: memref<2x32x64xbf16, #tpu.memory_space<vmem>>, %arg14: memref<2x32x32xbf16, #tpu.memory_space<vmem>>, %arg15: memref<2x32x64xbf16, #tpu.memory_space<vmem>>, %arg16: memref<2x64x32xbf16, #tpu.memory_space<vmem>>, %arg17: memref<2x13x96xf32, #tpu.memory_space<vmem>>, %arg18: memref<32x128xbf16, #tpu.memory_space<vmem>>, %arg19: memref<1x128xf32, #tpu.memory_space<vmem>>, %arg20: memref<1x8x128xf32, #tpu.memory_space<vmem>>) attributes {dimension_semantics = [#tpu.dimension_semantics<parallel>], iteration_bounds = array<i64: 2>, scalar_prefetch = 0 : i64, scratch_operands = 0 : i64, tpu.core_type = #tpu.core_type<tc>, window_params = [{transform_indices = @transform_0, window_bounds = array<i64: 1, 16, 48>}, {transform_indices = @transform_1, window_bounds = array<i64: 1, 8, 32>}, {pipeline_mode = #tpu.pipeline_mode<synchronous>, transform_indices = @transform_2, window_bounds = array<i64: 48, 32>}, {pipeline_mode = #tpu.pipeline_mode<synchronous>, transform_indices = @transform_3, window_bounds = array<i64: 16, 32>}, {pipeline_mode = #tpu.pipeline_mode<synchronous>, transform_indices = @transform_4, window_bounds = array<i64: 2, 32, 96>}, {pipeline_mode = #tpu.pipeline_mode<synchronous>, transform_indices = @transform_5, window_bounds = array<i64: 2, 32, 32>}, {pipeline_mode = #tpu.pipeline_mode<synchronous>, transform_indices = @transform_6, window_bounds = array<i64: 2, 32, 64>}, {pipeline_mode = #tpu.pipeline_mode<synchronous>, transform_indices = @transform_7, window_bounds = array<i64: 2, 64, 32>}, {pipeline_mode = #tpu.pipeline_mode<synchronous>, transform_indices = @transform_8, window_bounds = array<i64: 2, 8, 96>}, {pipeline_mode = #tpu.pipeline_mode<synchronous>, transform_indices = @transform_9, window_bounds = array<i64: 2, 32, 96>}, {pipeline_mode = #tpu.pipeline_mode<synchronous>, transform_indices = @transform_10, window_bounds = array<i64: 2, 32, 32>}, {pipeline_mode = #tpu.pipeline_mode<synchronous>, transform_indices = @transform_11, window_bounds = array<i64: 2, 32, 32>}, {pipeline_mode = #tpu.pipeline_mode<synchronous>, transform_indices = @transform_12, window_bounds = array<i64: 2, 32, 64>}, {pipeline_mode = #tpu.pipeline_mode<synchronous>, transform_indices = @transform_13, window_bounds = array<i64: 2, 32, 32>}, {pipeline_mode = #tpu.pipeline_mode<synchronous>, transform_indices = @transform_14, window_bounds = array<i64: 2, 32, 64>}, {pipeline_mode = #tpu.pipeline_mode<synchronous>, transform_indices = @transform_15, window_bounds = array<i64: 2, 64, 32>}, {pipeline_mode = #tpu.pipeline_mode<synchronous>, transform_indices = @transform_16, window_bounds = array<i64: 2, 13, 96>}, {pipeline_mode = #tpu.pipeline_mode<synchronous>, transform_indices = @transform_17, window_bounds = array<i64: 32, 128>}, {pipeline_mode = #tpu.pipeline_mode<synchronous>, transform_indices = @transform_18, window_bounds = array<i64: 1, 128>}, {transform_indices = @transform_19, window_bounds = array<i64: 1, 8, 128>}]} {
    %c0 = arith.constant 0 : index
    %c0_0 = arith.constant 0 : index
    %c0_1 = arith.constant 0 : index
    %0 = vector.load %arg1[%c0, %c0_0, %c0_1] : memref<1x16x48xf32, #tpu.memory_space<vmem>>, vector<1x16x48xf32>
    %1 = vector.shape_cast %0 : vector<1x16x48xf32> to vector<16x48xf32>
    %c0_2 = arith.constant 0 : index
    %c0_3 = arith.constant 0 : index
    %2 = vector.load %arg3[%c0_2, %c0_3] : memref<48x32xbf16, #tpu.memory_space<vmem>>, vector<48x32xbf16>
    %3 = arith.truncf %1 : vector<16x48xf32> to vector<16x48xbf16>
    %cst = arith.constant dense<0.000000e+00> : vector<16x32xf32>
    %4 = tpu.matmul %3, %2, %cst {dimension_numbers = #tpu.dot_dimension_numbers<[1], [0], [0], [1], [0, 0, 1, 1], [], []>} : vector<16x48xbf16>, vector<48x32xbf16>, vector<16x32xf32> -> vector<16x32xf32>
    %c0_4 = arith.constant 0 : index
    %c0_5 = arith.constant 0 : index
    %5 = vector.load %arg4[%c0_4, %c0_5] : memref<16x32xf32, #tpu.memory_space<vmem>>, vector<16x32xf32>
    %6 = arith.addf %4, %5 : vector<16x32xf32>
    %c0_6 = arith.constant 0 : index
    %c0_7 = arith.constant 0 : index
    %c0_8 = arith.constant 0 : index
    %7 = vector.load %arg5[%c0_6, %c0_7, %c0_8] : memref<2x32x96xbf16, #tpu.memory_space<vmem>>, vector<1x32x96xbf16>
    %8 = vector.shape_cast %7 : vector<1x32x96xbf16> to vector<32x96xbf16>
    %c0_9 = arith.constant 0 : index
    %c0_10 = arith.constant 0 : index
    %c0_11 = arith.constant 0 : index
    %9 = vector.load %arg6[%c0_9, %c0_10, %c0_11] : memref<2x32x32xbf16, #tpu.memory_space<vmem>>, vector<1x32x32xbf16>
    %10 = vector.shape_cast %9 : vector<1x32x32xbf16> to vector<32x32xbf16>
    %c0_12 = arith.constant 0 : index
    %c0_13 = arith.constant 0 : index
    %c0_14 = arith.constant 0 : index
    %11 = vector.load %arg7[%c0_12, %c0_13, %c0_14] : memref<2x32x64xbf16, #tpu.memory_space<vmem>>, vector<1x32x64xbf16>
    %12 = vector.shape_cast %11 : vector<1x32x64xbf16> to vector<32x64xbf16>
    %c0_15 = arith.constant 0 : index
    %c0_16 = arith.constant 0 : index
    %c0_17 = arith.constant 0 : index
    %13 = vector.load %arg8[%c0_15, %c0_16, %c0_17] : memref<2x64x32xbf16, #tpu.memory_space<vmem>>, vector<1x64x32xbf16>
    %14 = vector.shape_cast %13 : vector<1x64x32xbf16> to vector<64x32xbf16>
    %c0_18 = arith.constant 0 : index
    %c0_19 = arith.constant 0 : index
    %c0_20 = arith.constant 0 : index
    %15 = vector.load %arg9[%c0_18, %c0_19, %c0_20] : memref<2x8x96xf32, #tpu.memory_space<vmem>>, vector<1x8x96xf32>
    %16 = vector.shape_cast %15 : vector<1x8x96xf32> to vector<8x96xf32>
    %17 = vector.extract_strided_slice %16 {offsets = [0, 0], sizes = [1, 96], strides = [1, 1]} : vector<8x96xf32> to vector<1x96xf32>
    %18 = vector.extract_strided_slice %16 {offsets = [1, 0], sizes = [1, 32], strides = [1, 1]} : vector<8x96xf32> to vector<1x32xf32>
    %19 = vector.extract_strided_slice %16 {offsets = [2, 0], sizes = [1, 64], strides = [1, 1]} : vector<8x96xf32> to vector<1x64xf32>
    %20 = vector.extract_strided_slice %16 {offsets = [3, 0], sizes = [1, 32], strides = [1, 1]} : vector<8x96xf32> to vector<1x32xf32>
    %21 = vector.extract_strided_slice %16 {offsets = [4, 0], sizes = [1, 32], strides = [1, 1]} : vector<8x96xf32> to vector<1x32xf32>
    %22 = vector.extract_strided_slice %16 {offsets = [5, 0], sizes = [1, 32], strides = [1, 1]} : vector<8x96xf32> to vector<1x32xf32>
    %23 = vector.extract_strided_slice %16 {offsets = [6, 0], sizes = [1, 32], strides = [1, 1]} : vector<8x96xf32> to vector<1x32xf32>
    %24 = vector.extract_strided_slice %16 {offsets = [7, 0], sizes = [1, 32], strides = [1, 1]} : vector<8x96xf32> to vector<1x32xf32>
    %25 = arith.truncf %6 : vector<16x32xf32> to vector<16x32xbf16>
    %cst_21 = arith.constant dense<0.000000e+00> : vector<16x96xf32>
    %26 = tpu.matmul %25, %8, %cst_21 {dimension_numbers = #tpu.dot_dimension_numbers<[1], [0], [0], [1], [0, 0, 1, 1], [], []>} : vector<16x32xbf16>, vector<32x96xbf16>, vector<16x96xf32> -> vector<16x96xf32>
    %27 = vector.broadcast %17 : vector<1x96xf32> to vector<16x96xf32>
    %28 = arith.addf %26, %27 : vector<16x96xf32>
    %29 = vector.extract_strided_slice %28 {offsets = [0, 0], sizes = [16, 32], strides = [1, 1]} : vector<16x96xf32> to vector<16x32xf32>
    %30 = vector.extract_strided_slice %28 {offsets = [0, 32], sizes = [16, 32], strides = [1, 1]} : vector<16x96xf32> to vector<16x32xf32>
    %31 = vector.extract_strided_slice %28 {offsets = [0, 64], sizes = [16, 32], strides = [1, 1]} : vector<16x96xf32> to vector<16x32xf32>
    %32 = vector.extract_strided_slice %29 {offsets = [0, 0], sizes = [16, 8], strides = [1, 1]} : vector<16x32xf32> to vector<16x8xf32>
    %33 = vector.extract_strided_slice %30 {offsets = [0, 0], sizes = [16, 8], strides = [1, 1]} : vector<16x32xf32> to vector<16x8xf32>
    %cst_22 = arith.constant dense<0.000000e+00> : vector<16x16xf32>
    %34 = tpu.matmul %32, %33, %cst_22 {dimension_numbers = #tpu.dot_dimension_numbers<[1], [1], [0], [0], [0, 0, 1, 0], [], []>} : vector<16x8xf32>, vector<16x8xf32>, vector<16x16xf32> -> vector<16x16xf32>
    %cst_23 = arith.constant dense<0xFF800000> : vector<16xf32>
    %35 = vector.multi_reduction <maximumf>, %34, %cst_23 [1] : vector<16x16xf32> to vector<16xf32>
    %36 = vector.shape_cast %35 : vector<16xf32> to vector<16x1xf32>
    %37 = vector.broadcast %36 : vector<16x1xf32> to vector<16x16xf32>
    %38 = arith.subf %34, %37 : vector<16x16xf32>
    %39 = math.exp %38 : vector<16x16xf32>
    %cst_24 = arith.constant dense<0.000000e+00> : vector<16xf32>
    %40 = vector.multi_reduction <add>, %39, %cst_24 [1] : vector<16x16xf32> to vector<16xf32>
    %41 = vector.shape_cast %40 : vector<16xf32> to vector<16x1xf32>
    %42 = tpu.reciprocal %41 {approx = true} : vector<16x1xf32> -> vector<16x1xf32>
    %43 = vector.broadcast %42 : vector<16x1xf32> to vector<16x16xf32>
    %44 = arith.mulf %39, %43 : vector<16x16xf32>
    %45 = vector.extract_strided_slice %31 {offsets = [0, 0], sizes = [16, 8], strides = [1, 1]} : vector<16x32xf32> to vector<16x8xf32>
    %cst_25 = arith.constant dense<0.000000e+00> : vector<16x8xf32>
    %46 = tpu.matmul %44, %45, %cst_25 {dimension_numbers = #tpu.dot_dimension_numbers<[1], [0], [0], [1], [0, 0, 1, 1], [], []>} : vector<16x16xf32>, vector<16x8xf32>, vector<16x8xf32> -> vector<16x8xf32>
    %47 = vector.extract_strided_slice %10 {offsets = [0, 0], sizes = [8, 32], strides = [1, 1]} : vector<32x32xbf16> to vector<8x32xbf16>
    %48 = arith.truncf %46 : vector<16x8xf32> to vector<16x8xbf16>
    %cst_26 = arith.constant dense<0.000000e+00> : vector<16x32xf32>
    %49 = tpu.matmul %48, %47, %cst_26 {dimension_numbers = #tpu.dot_dimension_numbers<[1], [0], [0], [1], [0, 0, 1, 1], [], []>} : vector<16x8xbf16>, vector<8x32xbf16>, vector<16x32xf32> -> vector<16x32xf32>
    %50 = vector.extract_strided_slice %29 {offsets = [0, 8], sizes = [16, 8], strides = [1, 1]} : vector<16x32xf32> to vector<16x8xf32>
    %51 = vector.extract_strided_slice %30 {offsets = [0, 8], sizes = [16, 8], strides = [1, 1]} : vector<16x32xf32> to vector<16x8xf32>
    %cst_27 = arith.constant dense<0.000000e+00> : vector<16x16xf32>
    %52 = tpu.matmul %50, %51, %cst_27 {dimension_numbers = #tpu.dot_dimension_numbers<[1], [1], [0], [0], [0, 0, 1, 0], [], []>} : vector<16x8xf32>, vector<16x8xf32>, vector<16x16xf32> -> vector<16x16xf32>
    %cst_28 = arith.constant dense<0xFF800000> : vector<16xf32>
    %53 = vector.multi_reduction <maximumf>, %52, %cst_28 [1] : vector<16x16xf32> to vector<16xf32>
    %54 = vector.shape_cast %53 : vector<16xf32> to vector<16x1xf32>
    %55 = vector.broadcast %54 : vector<16x1xf32> to vector<16x16xf32>
    %56 = arith.subf %52, %55 : vector<16x16xf32>
    %57 = math.exp %56 : vector<16x16xf32>
    %cst_29 = arith.constant dense<0.000000e+00> : vector<16xf32>
    %58 = vector.multi_reduction <add>, %57, %cst_29 [1] : vector<16x16xf32> to vector<16xf32>
    %59 = vector.shape_cast %58 : vector<16xf32> to vector<16x1xf32>
    %60 = tpu.reciprocal %59 {approx = true} : vector<16x1xf32> -> vector<16x1xf32>
    %61 = vector.broadcast %60 : vector<16x1xf32> to vector<16x16xf32>
    %62 = arith.mulf %57, %61 : vector<16x16xf32>
    %63 = vector.extract_strided_slice %31 {offsets = [0, 8], sizes = [16, 8], strides = [1, 1]} : vector<16x32xf32> to vector<16x8xf32>
    %cst_30 = arith.constant dense<0.000000e+00> : vector<16x8xf32>
    %64 = tpu.matmul %62, %63, %cst_30 {dimension_numbers = #tpu.dot_dimension_numbers<[1], [0], [0], [1], [0, 0, 1, 1], [], []>} : vector<16x16xf32>, vector<16x8xf32>, vector<16x8xf32> -> vector<16x8xf32>
    %65 = vector.extract_strided_slice %10 {offsets = [8, 0], sizes = [8, 32], strides = [1, 1]} : vector<32x32xbf16> to vector<8x32xbf16>
    %66 = arith.truncf %64 : vector<16x8xf32> to vector<16x8xbf16>
    %cst_31 = arith.constant dense<0.000000e+00> : vector<16x32xf32>
    %67 = tpu.matmul %66, %65, %cst_31 {dimension_numbers = #tpu.dot_dimension_numbers<[1], [0], [0], [1], [0, 0, 1, 1], [], []>} : vector<16x8xbf16>, vector<8x32xbf16>, vector<16x32xf32> -> vector<16x32xf32>
    %68 = arith.addf %49, %67 : vector<16x32xf32>
    %69 = vector.extract_strided_slice %29 {offsets = [0, 16], sizes = [16, 8], strides = [1, 1]} : vector<16x32xf32> to vector<16x8xf32>
    %70 = vector.extract_strided_slice %30 {offsets = [0, 16], sizes = [16, 8], strides = [1, 1]} : vector<16x32xf32> to vector<16x8xf32>
    %cst_32 = arith.constant dense<0.000000e+00> : vector<16x16xf32>
    %71 = tpu.matmul %69, %70, %cst_32 {dimension_numbers = #tpu.dot_dimension_numbers<[1], [1], [0], [0], [0, 0, 1, 0], [], []>} : vector<16x8xf32>, vector<16x8xf32>, vector<16x16xf32> -> vector<16x16xf32>
    %cst_33 = arith.constant dense<0xFF800000> : vector<16xf32>
    %72 = vector.multi_reduction <maximumf>, %71, %cst_33 [1] : vector<16x16xf32> to vector<16xf32>
    %73 = vector.shape_cast %72 : vector<16xf32> to vector<16x1xf32>
    %74 = vector.broadcast %73 : vector<16x1xf32> to vector<16x16xf32>
    %75 = arith.subf %71, %74 : vector<16x16xf32>
    %76 = math.exp %75 : vector<16x16xf32>
    %cst_34 = arith.constant dense<0.000000e+00> : vector<16xf32>
    %77 = vector.multi_reduction <add>, %76, %cst_34 [1] : vector<16x16xf32> to vector<16xf32>
    %78 = vector.shape_cast %77 : vector<16xf32> to vector<16x1xf32>
    %79 = tpu.reciprocal %78 {approx = true} : vector<16x1xf32> -> vector<16x1xf32>
    %80 = vector.broadcast %79 : vector<16x1xf32> to vector<16x16xf32>
    %81 = arith.mulf %76, %80 : vector<16x16xf32>
    %82 = vector.extract_strided_slice %31 {offsets = [0, 16], sizes = [16, 8], strides = [1, 1]} : vector<16x32xf32> to vector<16x8xf32>
    %cst_35 = arith.constant dense<0.000000e+00> : vector<16x8xf32>
    %83 = tpu.matmul %81, %82, %cst_35 {dimension_numbers = #tpu.dot_dimension_numbers<[1], [0], [0], [1], [0, 0, 1, 1], [], []>} : vector<16x16xf32>, vector<16x8xf32>, vector<16x8xf32> -> vector<16x8xf32>
    %84 = vector.extract_strided_slice %10 {offsets = [16, 0], sizes = [8, 32], strides = [1, 1]} : vector<32x32xbf16> to vector<8x32xbf16>
    %85 = arith.truncf %83 : vector<16x8xf32> to vector<16x8xbf16>
    %cst_36 = arith.constant dense<0.000000e+00> : vector<16x32xf32>
    %86 = tpu.matmul %85, %84, %cst_36 {dimension_numbers = #tpu.dot_dimension_numbers<[1], [0], [0], [1], [0, 0, 1, 1], [], []>} : vector<16x8xbf16>, vector<8x32xbf16>, vector<16x32xf32> -> vector<16x32xf32>
    %87 = arith.addf %68, %86 : vector<16x32xf32>
    %88 = vector.extract_strided_slice %29 {offsets = [0, 24], sizes = [16, 8], strides = [1, 1]} : vector<16x32xf32> to vector<16x8xf32>
    %89 = vector.extract_strided_slice %30 {offsets = [0, 24], sizes = [16, 8], strides = [1, 1]} : vector<16x32xf32> to vector<16x8xf32>
    %cst_37 = arith.constant dense<0.000000e+00> : vector<16x16xf32>
    %90 = tpu.matmul %88, %89, %cst_37 {dimension_numbers = #tpu.dot_dimension_numbers<[1], [1], [0], [0], [0, 0, 1, 0], [], []>} : vector<16x8xf32>, vector<16x8xf32>, vector<16x16xf32> -> vector<16x16xf32>
    %cst_38 = arith.constant dense<0xFF800000> : vector<16xf32>
    %91 = vector.multi_reduction <maximumf>, %90, %cst_38 [1] : vector<16x16xf32> to vector<16xf32>
    %92 = vector.shape_cast %91 : vector<16xf32> to vector<16x1xf32>
    %93 = vector.broadcast %92 : vector<16x1xf32> to vector<16x16xf32>
    %94 = arith.subf %90, %93 : vector<16x16xf32>
    %95 = math.exp %94 : vector<16x16xf32>
    %cst_39 = arith.constant dense<0.000000e+00> : vector<16xf32>
    %96 = vector.multi_reduction <add>, %95, %cst_39 [1] : vector<16x16xf32> to vector<16xf32>
    %97 = vector.shape_cast %96 : vector<16xf32> to vector<16x1xf32>
    %98 = tpu.reciprocal %97 {approx = true} : vector<16x1xf32> -> vector<16x1xf32>
    %99 = vector.broadcast %98 : vector<16x1xf32> to vector<16x16xf32>
    %100 = arith.mulf %95, %99 : vector<16x16xf32>
    %101 = vector.extract_strided_slice %31 {offsets = [0, 24], sizes = [16, 8], strides = [1, 1]} : vector<16x32xf32> to vector<16x8xf32>
    %cst_40 = arith.constant dense<0.000000e+00> : vector<16x8xf32>
    %102 = tpu.matmul %100, %101, %cst_40 {dimension_numbers = #tpu.dot_dimension_numbers<[1], [0], [0], [1], [0, 0, 1, 1], [], []>} : vector<16x16xf32>, vector<16x8xf32>, vector<16x8xf32> -> vector<16x8xf32>
    %103 = vector.extract_strided_slice %10 {offsets = [24, 0], sizes = [8, 32], strides = [1, 1]} : vector<32x32xbf16> to vector<8x32xbf16>
    %104 = arith.truncf %102 : vector<16x8xf32> to vector<16x8xbf16>
    %cst_41 = arith.constant dense<0.000000e+00> : vector<16x32xf32>
    %105 = tpu.matmul %104, %103, %cst_41 {dimension_numbers = #tpu.dot_dimension_numbers<[1], [0], [0], [1], [0, 0, 1, 1], [], []>} : vector<16x8xbf16>, vector<8x32xbf16>, vector<16x32xf32> -> vector<16x32xf32>
    %106 = arith.addf %87, %105 : vector<16x32xf32>
    %107 = vector.broadcast %18 : vector<1x32xf32> to vector<16x32xf32>
    %108 = arith.addf %106, %107 : vector<16x32xf32>
    %109 = arith.addf %6, %108 : vector<16x32xf32>
    %cst_42 = arith.constant dense<0.000000e+00> : vector<16xf32>
    %110 = vector.multi_reduction <add>, %109, %cst_42 [1] : vector<16x32xf32> to vector<16xf32>
    %111 = vector.shape_cast %110 : vector<16xf32> to vector<16x1xf32>
    %cst_43 = arith.constant 3.200000e+01 : f32
    %112 = vector.broadcast %cst_43 : f32 to vector<16x1xf32>
    %113 = arith.divf %111, %112 : vector<16x1xf32>
    %114 = vector.broadcast %113 : vector<16x1xf32> to vector<16x32xf32>
    %115 = arith.subf %109, %114 : vector<16x32xf32>
    %116 = arith.mulf %115, %115 : vector<16x32xf32>
    %cst_44 = arith.constant dense<0.000000e+00> : vector<16xf32>
    %117 = vector.multi_reduction <add>, %116, %cst_44 [1] : vector<16x32xf32> to vector<16xf32>
    %118 = vector.shape_cast %117 : vector<16xf32> to vector<16x1xf32>
    %cst_45 = arith.constant 3.200000e+01 : f32
    %119 = vector.broadcast %cst_45 : f32 to vector<16x1xf32>
    %120 = arith.divf %118, %119 : vector<16x1xf32>
    %121 = vector.broadcast %113 : vector<16x1xf32> to vector<16x32xf32>
    %122 = arith.subf %109, %121 : vector<16x32xf32>
    %cst_46 = arith.constant 9.99999974E-6 : f32
    %123 = vector.broadcast %cst_46 : f32 to vector<16x1xf32>
    %124 = arith.addf %120, %123 : vector<16x1xf32>
    %125 = math.rsqrt %124 : vector<16x1xf32>
    %126 = vector.broadcast %125 : vector<16x1xf32> to vector<16x32xf32>
    %127 = arith.mulf %122, %126 : vector<16x32xf32>
    %128 = vector.broadcast %21 : vector<1x32xf32> to vector<16x32xf32>
    %129 = arith.mulf %127, %128 : vector<16x32xf32>
    %130 = vector.broadcast %22 : vector<1x32xf32> to vector<16x32xf32>
    %131 = arith.addf %129, %130 : vector<16x32xf32>
    %132 = arith.truncf %131 : vector<16x32xf32> to vector<16x32xbf16>
    %cst_47 = arith.constant dense<0.000000e+00> : vector<16x64xf32>
    %133 = tpu.matmul %132, %12, %cst_47 {dimension_numbers = #tpu.dot_dimension_numbers<[1], [0], [0], [1], [0, 0, 1, 1], [], []>} : vector<16x32xbf16>, vector<32x64xbf16>, vector<16x64xf32> -> vector<16x64xf32>
    %134 = vector.broadcast %19 : vector<1x64xf32> to vector<16x64xf32>
    %135 = arith.addf %133, %134 : vector<16x64xf32>
    %cst_48 = arith.constant 0.000000e+00 : f32
    %136 = vector.broadcast %cst_48 : f32 to vector<16x64xf32>
    %137 = arith.maximumf %135, %136 : vector<16x64xf32>
    %138 = arith.truncf %137 : vector<16x64xf32> to vector<16x64xbf16>
    %cst_49 = arith.constant dense<0.000000e+00> : vector<16x32xf32>
    %139 = tpu.matmul %138, %14, %cst_49 {dimension_numbers = #tpu.dot_dimension_numbers<[1], [0], [0], [1], [0, 0, 1, 1], [], []>} : vector<16x64xbf16>, vector<64x32xbf16>, vector<16x32xf32> -> vector<16x32xf32>
    %140 = vector.broadcast %20 : vector<1x32xf32> to vector<16x32xf32>
    %141 = arith.addf %139, %140 : vector<16x32xf32>
    %142 = arith.addf %131, %141 : vector<16x32xf32>
    %cst_50 = arith.constant dense<0.000000e+00> : vector<16xf32>
    %143 = vector.multi_reduction <add>, %142, %cst_50 [1] : vector<16x32xf32> to vector<16xf32>
    %144 = vector.shape_cast %143 : vector<16xf32> to vector<16x1xf32>
    %cst_51 = arith.constant 3.200000e+01 : f32
    %145 = vector.broadcast %cst_51 : f32 to vector<16x1xf32>
    %146 = arith.divf %144, %145 : vector<16x1xf32>
    %147 = vector.broadcast %146 : vector<16x1xf32> to vector<16x32xf32>
    %148 = arith.subf %142, %147 : vector<16x32xf32>
    %149 = arith.mulf %148, %148 : vector<16x32xf32>
    %cst_52 = arith.constant dense<0.000000e+00> : vector<16xf32>
    %150 = vector.multi_reduction <add>, %149, %cst_52 [1] : vector<16x32xf32> to vector<16xf32>
    %151 = vector.shape_cast %150 : vector<16xf32> to vector<16x1xf32>
    %cst_53 = arith.constant 3.200000e+01 : f32
    %152 = vector.broadcast %cst_53 : f32 to vector<16x1xf32>
    %153 = arith.divf %151, %152 : vector<16x1xf32>
    %154 = vector.broadcast %146 : vector<16x1xf32> to vector<16x32xf32>
    %155 = arith.subf %142, %154 : vector<16x32xf32>
    %cst_54 = arith.constant 9.99999974E-6 : f32
    %156 = vector.broadcast %cst_54 : f32 to vector<16x1xf32>
    %157 = arith.addf %153, %156 : vector<16x1xf32>
    %158 = math.rsqrt %157 : vector<16x1xf32>
    %159 = vector.broadcast %158 : vector<16x1xf32> to vector<16x32xf32>
    %160 = arith.mulf %155, %159 : vector<16x32xf32>
    %161 = vector.broadcast %23 : vector<1x32xf32> to vector<16x32xf32>
    %162 = arith.mulf %160, %161 : vector<16x32xf32>
    %163 = vector.broadcast %24 : vector<1x32xf32> to vector<16x32xf32>
    %164 = arith.addf %162, %163 : vector<16x32xf32>
    %c1 = arith.constant 1 : index
    %c0_55 = arith.constant 0 : index
    %c0_56 = arith.constant 0 : index
    %165 = vector.load %arg5[%c1, %c0_55, %c0_56] : memref<2x32x96xbf16, #tpu.memory_space<vmem>>, vector<1x32x96xbf16>
    %166 = vector.shape_cast %165 : vector<1x32x96xbf16> to vector<32x96xbf16>
    %c1_57 = arith.constant 1 : index
    %c0_58 = arith.constant 0 : index
    %c0_59 = arith.constant 0 : index
    %167 = vector.load %arg6[%c1_57, %c0_58, %c0_59] : memref<2x32x32xbf16, #tpu.memory_space<vmem>>, vector<1x32x32xbf16>
    %168 = vector.shape_cast %167 : vector<1x32x32xbf16> to vector<32x32xbf16>
    %c1_60 = arith.constant 1 : index
    %c0_61 = arith.constant 0 : index
    %c0_62 = arith.constant 0 : index
    %169 = vector.load %arg7[%c1_60, %c0_61, %c0_62] : memref<2x32x64xbf16, #tpu.memory_space<vmem>>, vector<1x32x64xbf16>
    %170 = vector.shape_cast %169 : vector<1x32x64xbf16> to vector<32x64xbf16>
    %c1_63 = arith.constant 1 : index
    %c0_64 = arith.constant 0 : index
    %c0_65 = arith.constant 0 : index
    %171 = vector.load %arg8[%c1_63, %c0_64, %c0_65] : memref<2x64x32xbf16, #tpu.memory_space<vmem>>, vector<1x64x32xbf16>
    %172 = vector.shape_cast %171 : vector<1x64x32xbf16> to vector<64x32xbf16>
    %c1_66 = arith.constant 1 : index
    %c0_67 = arith.constant 0 : index
    %c0_68 = arith.constant 0 : index
    %173 = vector.load %arg9[%c1_66, %c0_67, %c0_68] : memref<2x8x96xf32, #tpu.memory_space<vmem>>, vector<1x8x96xf32>
    %174 = vector.shape_cast %173 : vector<1x8x96xf32> to vector<8x96xf32>
    %175 = vector.extract_strided_slice %174 {offsets = [0, 0], sizes = [1, 96], strides = [1, 1]} : vector<8x96xf32> to vector<1x96xf32>
    %176 = vector.extract_strided_slice %174 {offsets = [1, 0], sizes = [1, 32], strides = [1, 1]} : vector<8x96xf32> to vector<1x32xf32>
    %177 = vector.extract_strided_slice %174 {offsets = [2, 0], sizes = [1, 64], strides = [1, 1]} : vector<8x96xf32> to vector<1x64xf32>
    %178 = vector.extract_strided_slice %174 {offsets = [3, 0], sizes = [1, 32], strides = [1, 1]} : vector<8x96xf32> to vector<1x32xf32>
    %179 = vector.extract_strided_slice %174 {offsets = [4, 0], sizes = [1, 32], strides = [1, 1]} : vector<8x96xf32> to vector<1x32xf32>
    %180 = vector.extract_strided_slice %174 {offsets = [5, 0], sizes = [1, 32], strides = [1, 1]} : vector<8x96xf32> to vector<1x32xf32>
    %181 = vector.extract_strided_slice %174 {offsets = [6, 0], sizes = [1, 32], strides = [1, 1]} : vector<8x96xf32> to vector<1x32xf32>
    %182 = vector.extract_strided_slice %174 {offsets = [7, 0], sizes = [1, 32], strides = [1, 1]} : vector<8x96xf32> to vector<1x32xf32>
    %183 = arith.truncf %164 : vector<16x32xf32> to vector<16x32xbf16>
    %cst_69 = arith.constant dense<0.000000e+00> : vector<16x96xf32>
    %184 = tpu.matmul %183, %166, %cst_69 {dimension_numbers = #tpu.dot_dimension_numbers<[1], [0], [0], [1], [0, 0, 1, 1], [], []>} : vector<16x32xbf16>, vector<32x96xbf16>, vector<16x96xf32> -> vector<16x96xf32>
    %185 = vector.broadcast %175 : vector<1x96xf32> to vector<16x96xf32>
    %186 = arith.addf %184, %185 : vector<16x96xf32>
    %187 = vector.extract_strided_slice %186 {offsets = [0, 0], sizes = [16, 32], strides = [1, 1]} : vector<16x96xf32> to vector<16x32xf32>
    %188 = vector.extract_strided_slice %186 {offsets = [0, 32], sizes = [16, 32], strides = [1, 1]} : vector<16x96xf32> to vector<16x32xf32>
    %189 = vector.extract_strided_slice %186 {offsets = [0, 64], sizes = [16, 32], strides = [1, 1]} : vector<16x96xf32> to vector<16x32xf32>
    %190 = vector.extract_strided_slice %187 {offsets = [0, 0], sizes = [16, 8], strides = [1, 1]} : vector<16x32xf32> to vector<16x8xf32>
    %191 = vector.extract_strided_slice %188 {offsets = [0, 0], sizes = [16, 8], strides = [1, 1]} : vector<16x32xf32> to vector<16x8xf32>
    %cst_70 = arith.constant dense<0.000000e+00> : vector<16x16xf32>
    %192 = tpu.matmul %190, %191, %cst_70 {dimension_numbers = #tpu.dot_dimension_numbers<[1], [1], [0], [0], [0, 0, 1, 0], [], []>} : vector<16x8xf32>, vector<16x8xf32>, vector<16x16xf32> -> vector<16x16xf32>
    %cst_71 = arith.constant dense<0xFF800000> : vector<16xf32>
    %193 = vector.multi_reduction <maximumf>, %192, %cst_71 [1] : vector<16x16xf32> to vector<16xf32>
    %194 = vector.shape_cast %193 : vector<16xf32> to vector<16x1xf32>
    %195 = vector.broadcast %194 : vector<16x1xf32> to vector<16x16xf32>
    %196 = arith.subf %192, %195 : vector<16x16xf32>
    %197 = math.exp %196 : vector<16x16xf32>
    %cst_72 = arith.constant dense<0.000000e+00> : vector<16xf32>
    %198 = vector.multi_reduction <add>, %197, %cst_72 [1] : vector<16x16xf32> to vector<16xf32>
    %199 = vector.shape_cast %198 : vector<16xf32> to vector<16x1xf32>
    %200 = tpu.reciprocal %199 {approx = true} : vector<16x1xf32> -> vector<16x1xf32>
    %201 = vector.broadcast %200 : vector<16x1xf32> to vector<16x16xf32>
    %202 = arith.mulf %197, %201 : vector<16x16xf32>
    %203 = vector.extract_strided_slice %189 {offsets = [0, 0], sizes = [16, 8], strides = [1, 1]} : vector<16x32xf32> to vector<16x8xf32>
    %cst_73 = arith.constant dense<0.000000e+00> : vector<16x8xf32>
    %204 = tpu.matmul %202, %203, %cst_73 {dimension_numbers = #tpu.dot_dimension_numbers<[1], [0], [0], [1], [0, 0, 1, 1], [], []>} : vector<16x16xf32>, vector<16x8xf32>, vector<16x8xf32> -> vector<16x8xf32>
    %205 = vector.extract_strided_slice %168 {offsets = [0, 0], sizes = [8, 32], strides = [1, 1]} : vector<32x32xbf16> to vector<8x32xbf16>
    %206 = arith.truncf %204 : vector<16x8xf32> to vector<16x8xbf16>
    %cst_74 = arith.constant dense<0.000000e+00> : vector<16x32xf32>
    %207 = tpu.matmul %206, %205, %cst_74 {dimension_numbers = #tpu.dot_dimension_numbers<[1], [0], [0], [1], [0, 0, 1, 1], [], []>} : vector<16x8xbf16>, vector<8x32xbf16>, vector<16x32xf32> -> vector<16x32xf32>
    %208 = vector.extract_strided_slice %187 {offsets = [0, 8], sizes = [16, 8], strides = [1, 1]} : vector<16x32xf32> to vector<16x8xf32>
    %209 = vector.extract_strided_slice %188 {offsets = [0, 8], sizes = [16, 8], strides = [1, 1]} : vector<16x32xf32> to vector<16x8xf32>
    %cst_75 = arith.constant dense<0.000000e+00> : vector<16x16xf32>
    %210 = tpu.matmul %208, %209, %cst_75 {dimension_numbers = #tpu.dot_dimension_numbers<[1], [1], [0], [0], [0, 0, 1, 0], [], []>} : vector<16x8xf32>, vector<16x8xf32>, vector<16x16xf32> -> vector<16x16xf32>
    %cst_76 = arith.constant dense<0xFF800000> : vector<16xf32>
    %211 = vector.multi_reduction <maximumf>, %210, %cst_76 [1] : vector<16x16xf32> to vector<16xf32>
    %212 = vector.shape_cast %211 : vector<16xf32> to vector<16x1xf32>
    %213 = vector.broadcast %212 : vector<16x1xf32> to vector<16x16xf32>
    %214 = arith.subf %210, %213 : vector<16x16xf32>
    %215 = math.exp %214 : vector<16x16xf32>
    %cst_77 = arith.constant dense<0.000000e+00> : vector<16xf32>
    %216 = vector.multi_reduction <add>, %215, %cst_77 [1] : vector<16x16xf32> to vector<16xf32>
    %217 = vector.shape_cast %216 : vector<16xf32> to vector<16x1xf32>
    %218 = tpu.reciprocal %217 {approx = true} : vector<16x1xf32> -> vector<16x1xf32>
    %219 = vector.broadcast %218 : vector<16x1xf32> to vector<16x16xf32>
    %220 = arith.mulf %215, %219 : vector<16x16xf32>
    %221 = vector.extract_strided_slice %189 {offsets = [0, 8], sizes = [16, 8], strides = [1, 1]} : vector<16x32xf32> to vector<16x8xf32>
    %cst_78 = arith.constant dense<0.000000e+00> : vector<16x8xf32>
    %222 = tpu.matmul %220, %221, %cst_78 {dimension_numbers = #tpu.dot_dimension_numbers<[1], [0], [0], [1], [0, 0, 1, 1], [], []>} : vector<16x16xf32>, vector<16x8xf32>, vector<16x8xf32> -> vector<16x8xf32>
    %223 = vector.extract_strided_slice %168 {offsets = [8, 0], sizes = [8, 32], strides = [1, 1]} : vector<32x32xbf16> to vector<8x32xbf16>
    %224 = arith.truncf %222 : vector<16x8xf32> to vector<16x8xbf16>
    %cst_79 = arith.constant dense<0.000000e+00> : vector<16x32xf32>
    %225 = tpu.matmul %224, %223, %cst_79 {dimension_numbers = #tpu.dot_dimension_numbers<[1], [0], [0], [1], [0, 0, 1, 1], [], []>} : vector<16x8xbf16>, vector<8x32xbf16>, vector<16x32xf32> -> vector<16x32xf32>
    %226 = arith.addf %207, %225 : vector<16x32xf32>
    %227 = vector.extract_strided_slice %187 {offsets = [0, 16], sizes = [16, 8], strides = [1, 1]} : vector<16x32xf32> to vector<16x8xf32>
    %228 = vector.extract_strided_slice %188 {offsets = [0, 16], sizes = [16, 8], strides = [1, 1]} : vector<16x32xf32> to vector<16x8xf32>
    %cst_80 = arith.constant dense<0.000000e+00> : vector<16x16xf32>
    %229 = tpu.matmul %227, %228, %cst_80 {dimension_numbers = #tpu.dot_dimension_numbers<[1], [1], [0], [0], [0, 0, 1, 0], [], []>} : vector<16x8xf32>, vector<16x8xf32>, vector<16x16xf32> -> vector<16x16xf32>
    %cst_81 = arith.constant dense<0xFF800000> : vector<16xf32>
    %230 = vector.multi_reduction <maximumf>, %229, %cst_81 [1] : vector<16x16xf32> to vector<16xf32>
    %231 = vector.shape_cast %230 : vector<16xf32> to vector<16x1xf32>
    %232 = vector.broadcast %231 : vector<16x1xf32> to vector<16x16xf32>
    %233 = arith.subf %229, %232 : vector<16x16xf32>
    %234 = math.exp %233 : vector<16x16xf32>
    %cst_82 = arith.constant dense<0.000000e+00> : vector<16xf32>
    %235 = vector.multi_reduction <add>, %234, %cst_82 [1] : vector<16x16xf32> to vector<16xf32>
    %236 = vector.shape_cast %235 : vector<16xf32> to vector<16x1xf32>
    %237 = tpu.reciprocal %236 {approx = true} : vector<16x1xf32> -> vector<16x1xf32>
    %238 = vector.broadcast %237 : vector<16x1xf32> to vector<16x16xf32>
    %239 = arith.mulf %234, %238 : vector<16x16xf32>
    %240 = vector.extract_strided_slice %189 {offsets = [0, 16], sizes = [16, 8], strides = [1, 1]} : vector<16x32xf32> to vector<16x8xf32>
    %cst_83 = arith.constant dense<0.000000e+00> : vector<16x8xf32>
    %241 = tpu.matmul %239, %240, %cst_83 {dimension_numbers = #tpu.dot_dimension_numbers<[1], [0], [0], [1], [0, 0, 1, 1], [], []>} : vector<16x16xf32>, vector<16x8xf32>, vector<16x8xf32> -> vector<16x8xf32>
    %242 = vector.extract_strided_slice %168 {offsets = [16, 0], sizes = [8, 32], strides = [1, 1]} : vector<32x32xbf16> to vector<8x32xbf16>
    %243 = arith.truncf %241 : vector<16x8xf32> to vector<16x8xbf16>
    %cst_84 = arith.constant dense<0.000000e+00> : vector<16x32xf32>
    %244 = tpu.matmul %243, %242, %cst_84 {dimension_numbers = #tpu.dot_dimension_numbers<[1], [0], [0], [1], [0, 0, 1, 1], [], []>} : vector<16x8xbf16>, vector<8x32xbf16>, vector<16x32xf32> -> vector<16x32xf32>
    %245 = arith.addf %226, %244 : vector<16x32xf32>
    %246 = vector.extract_strided_slice %187 {offsets = [0, 24], sizes = [16, 8], strides = [1, 1]} : vector<16x32xf32> to vector<16x8xf32>
    %247 = vector.extract_strided_slice %188 {offsets = [0, 24], sizes = [16, 8], strides = [1, 1]} : vector<16x32xf32> to vector<16x8xf32>
    %cst_85 = arith.constant dense<0.000000e+00> : vector<16x16xf32>
    %248 = tpu.matmul %246, %247, %cst_85 {dimension_numbers = #tpu.dot_dimension_numbers<[1], [1], [0], [0], [0, 0, 1, 0], [], []>} : vector<16x8xf32>, vector<16x8xf32>, vector<16x16xf32> -> vector<16x16xf32>
    %cst_86 = arith.constant dense<0xFF800000> : vector<16xf32>
    %249 = vector.multi_reduction <maximumf>, %248, %cst_86 [1] : vector<16x16xf32> to vector<16xf32>
    %250 = vector.shape_cast %249 : vector<16xf32> to vector<16x1xf32>
    %251 = vector.broadcast %250 : vector<16x1xf32> to vector<16x16xf32>
    %252 = arith.subf %248, %251 : vector<16x16xf32>
    %253 = math.exp %252 : vector<16x16xf32>
    %cst_87 = arith.constant dense<0.000000e+00> : vector<16xf32>
    %254 = vector.multi_reduction <add>, %253, %cst_87 [1] : vector<16x16xf32> to vector<16xf32>
    %255 = vector.shape_cast %254 : vector<16xf32> to vector<16x1xf32>
    %256 = tpu.reciprocal %255 {approx = true} : vector<16x1xf32> -> vector<16x1xf32>
    %257 = vector.broadcast %256 : vector<16x1xf32> to vector<16x16xf32>
    %258 = arith.mulf %253, %257 : vector<16x16xf32>
    %259 = vector.extract_strided_slice %189 {offsets = [0, 24], sizes = [16, 8], strides = [1, 1]} : vector<16x32xf32> to vector<16x8xf32>
    %cst_88 = arith.constant dense<0.000000e+00> : vector<16x8xf32>
    %260 = tpu.matmul %258, %259, %cst_88 {dimension_numbers = #tpu.dot_dimension_numbers<[1], [0], [0], [1], [0, 0, 1, 1], [], []>} : vector<16x16xf32>, vector<16x8xf32>, vector<16x8xf32> -> vector<16x8xf32>
    %261 = vector.extract_strided_slice %168 {offsets = [24, 0], sizes = [8, 32], strides = [1, 1]} : vector<32x32xbf16> to vector<8x32xbf16>
    %262 = arith.truncf %260 : vector<16x8xf32> to vector<16x8xbf16>
    %cst_89 = arith.constant dense<0.000000e+00> : vector<16x32xf32>
    %263 = tpu.matmul %262, %261, %cst_89 {dimension_numbers = #tpu.dot_dimension_numbers<[1], [0], [0], [1], [0, 0, 1, 1], [], []>} : vector<16x8xbf16>, vector<8x32xbf16>, vector<16x32xf32> -> vector<16x32xf32>
    %264 = arith.addf %245, %263 : vector<16x32xf32>
    %265 = vector.broadcast %176 : vector<1x32xf32> to vector<16x32xf32>
    %266 = arith.addf %264, %265 : vector<16x32xf32>
    %267 = arith.addf %164, %266 : vector<16x32xf32>
    %cst_90 = arith.constant dense<0.000000e+00> : vector<16xf32>
    %268 = vector.multi_reduction <add>, %267, %cst_90 [1] : vector<16x32xf32> to vector<16xf32>
    %269 = vector.shape_cast %268 : vector<16xf32> to vector<16x1xf32>
    %cst_91 = arith.constant 3.200000e+01 : f32
    %270 = vector.broadcast %cst_91 : f32 to vector<16x1xf32>
    %271 = arith.divf %269, %270 : vector<16x1xf32>
    %272 = vector.broadcast %271 : vector<16x1xf32> to vector<16x32xf32>
    %273 = arith.subf %267, %272 : vector<16x32xf32>
    %274 = arith.mulf %273, %273 : vector<16x32xf32>
    %cst_92 = arith.constant dense<0.000000e+00> : vector<16xf32>
    %275 = vector.multi_reduction <add>, %274, %cst_92 [1] : vector<16x32xf32> to vector<16xf32>
    %276 = vector.shape_cast %275 : vector<16xf32> to vector<16x1xf32>
    %cst_93 = arith.constant 3.200000e+01 : f32
    %277 = vector.broadcast %cst_93 : f32 to vector<16x1xf32>
    %278 = arith.divf %276, %277 : vector<16x1xf32>
    %279 = vector.broadcast %271 : vector<16x1xf32> to vector<16x32xf32>
    %280 = arith.subf %267, %279 : vector<16x32xf32>
    %cst_94 = arith.constant 9.99999974E-6 : f32
    %281 = vector.broadcast %cst_94 : f32 to vector<16x1xf32>
    %282 = arith.addf %278, %281 : vector<16x1xf32>
    %283 = math.rsqrt %282 : vector<16x1xf32>
    %284 = vector.broadcast %283 : vector<16x1xf32> to vector<16x32xf32>
    %285 = arith.mulf %280, %284 : vector<16x32xf32>
    %286 = vector.broadcast %179 : vector<1x32xf32> to vector<16x32xf32>
    %287 = arith.mulf %285, %286 : vector<16x32xf32>
    %288 = vector.broadcast %180 : vector<1x32xf32> to vector<16x32xf32>
    %289 = arith.addf %287, %288 : vector<16x32xf32>
    %290 = arith.truncf %289 : vector<16x32xf32> to vector<16x32xbf16>
    %cst_95 = arith.constant dense<0.000000e+00> : vector<16x64xf32>
    %291 = tpu.matmul %290, %170, %cst_95 {dimension_numbers = #tpu.dot_dimension_numbers<[1], [0], [0], [1], [0, 0, 1, 1], [], []>} : vector<16x32xbf16>, vector<32x64xbf16>, vector<16x64xf32> -> vector<16x64xf32>
    %292 = vector.broadcast %177 : vector<1x64xf32> to vector<16x64xf32>
    %293 = arith.addf %291, %292 : vector<16x64xf32>
    %cst_96 = arith.constant 0.000000e+00 : f32
    %294 = vector.broadcast %cst_96 : f32 to vector<16x64xf32>
    %295 = arith.maximumf %293, %294 : vector<16x64xf32>
    %296 = arith.truncf %295 : vector<16x64xf32> to vector<16x64xbf16>
    %cst_97 = arith.constant dense<0.000000e+00> : vector<16x32xf32>
    %297 = tpu.matmul %296, %172, %cst_97 {dimension_numbers = #tpu.dot_dimension_numbers<[1], [0], [0], [1], [0, 0, 1, 1], [], []>} : vector<16x64xbf16>, vector<64x32xbf16>, vector<16x32xf32> -> vector<16x32xf32>
    %298 = vector.broadcast %178 : vector<1x32xf32> to vector<16x32xf32>
    %299 = arith.addf %297, %298 : vector<16x32xf32>
    %300 = arith.addf %289, %299 : vector<16x32xf32>
    %cst_98 = arith.constant dense<0.000000e+00> : vector<16xf32>
    %301 = vector.multi_reduction <add>, %300, %cst_98 [1] : vector<16x32xf32> to vector<16xf32>
    %302 = vector.shape_cast %301 : vector<16xf32> to vector<16x1xf32>
    %cst_99 = arith.constant 3.200000e+01 : f32
    %303 = vector.broadcast %cst_99 : f32 to vector<16x1xf32>
    %304 = arith.divf %302, %303 : vector<16x1xf32>
    %305 = vector.broadcast %304 : vector<16x1xf32> to vector<16x32xf32>
    %306 = arith.subf %300, %305 : vector<16x32xf32>
    %307 = arith.mulf %306, %306 : vector<16x32xf32>
    %cst_100 = arith.constant dense<0.000000e+00> : vector<16xf32>
    %308 = vector.multi_reduction <add>, %307, %cst_100 [1] : vector<16x32xf32> to vector<16xf32>
    %309 = vector.shape_cast %308 : vector<16xf32> to vector<16x1xf32>
    %cst_101 = arith.constant 3.200000e+01 : f32
    %310 = vector.broadcast %cst_101 : f32 to vector<16x1xf32>
    %311 = arith.divf %309, %310 : vector<16x1xf32>
    %312 = vector.broadcast %304 : vector<16x1xf32> to vector<16x32xf32>
    %313 = arith.subf %300, %312 : vector<16x32xf32>
    %cst_102 = arith.constant 9.99999974E-6 : f32
    %314 = vector.broadcast %cst_102 : f32 to vector<16x1xf32>
    %315 = arith.addf %311, %314 : vector<16x1xf32>
    %316 = math.rsqrt %315 : vector<16x1xf32>
    %317 = vector.broadcast %316 : vector<16x1xf32> to vector<16x32xf32>
    %318 = arith.mulf %313, %317 : vector<16x32xf32>
    %319 = vector.broadcast %181 : vector<1x32xf32> to vector<16x32xf32>
    %320 = arith.mulf %318, %319 : vector<16x32xf32>
    %321 = vector.broadcast %182 : vector<1x32xf32> to vector<16x32xf32>
    %322 = arith.addf %320, %321 : vector<16x32xf32>
    %c0_103 = arith.constant 0 : index
    %c0_104 = arith.constant 0 : index
    %c0_105 = arith.constant 0 : index
    %323 = vector.load %arg2[%c0_103, %c0_104, %c0_105] : memref<1x8x32xf32, #tpu.memory_space<vmem>>, vector<1x8x32xf32>
    %324 = vector.shape_cast %323 : vector<1x8x32xf32> to vector<8x32xf32>
    %325 = tpu.iota {dimensions = array<i32: 0>} : vector<8x8xi32>
    %326 = tpu.iota {dimensions = array<i32: 1>} : vector<8x8xi32>
    %327 = arith.cmpi sle, %326, %325 : vector<8x8xi32>
    %c0_106 = arith.constant 0 : index
    %c0_107 = arith.constant 0 : index
    %c0_108 = arith.constant 0 : index
    %328 = vector.load %arg10[%c0_106, %c0_107, %c0_108] : memref<2x32x96xbf16, #tpu.memory_space<vmem>>, vector<1x32x96xbf16>
    %329 = vector.shape_cast %328 : vector<1x32x96xbf16> to vector<32x96xbf16>
    %c0_109 = arith.constant 0 : index
    %c0_110 = arith.constant 0 : index
    %c0_111 = arith.constant 0 : index
    %330 = vector.load %arg11[%c0_109, %c0_110, %c0_111] : memref<2x32x32xbf16, #tpu.memory_space<vmem>>, vector<1x32x32xbf16>
    %331 = vector.shape_cast %330 : vector<1x32x32xbf16> to vector<32x32xbf16>
    %c0_112 = arith.constant 0 : index
    %c0_113 = arith.constant 0 : index
    %c0_114 = arith.constant 0 : index
    %332 = vector.load %arg12[%c0_112, %c0_113, %c0_114] : memref<2x32x32xbf16, #tpu.memory_space<vmem>>, vector<1x32x32xbf16>
    %333 = vector.shape_cast %332 : vector<1x32x32xbf16> to vector<32x32xbf16>
    %c0_115 = arith.constant 0 : index
    %c0_116 = arith.constant 0 : index
    %c0_117 = arith.constant 0 : index
    %334 = vector.load %arg13[%c0_115, %c0_116, %c0_117] : memref<2x32x64xbf16, #tpu.memory_space<vmem>>, vector<1x32x64xbf16>
    %335 = vector.shape_cast %334 : vector<1x32x64xbf16> to vector<32x64xbf16>
    %c0_118 = arith.constant 0 : index
    %c0_119 = arith.constant 0 : index
    %c0_120 = arith.constant 0 : index
    %336 = vector.load %arg14[%c0_118, %c0_119, %c0_120] : memref<2x32x32xbf16, #tpu.memory_space<vmem>>, vector<1x32x32xbf16>
    %337 = vector.shape_cast %336 : vector<1x32x32xbf16> to vector<32x32xbf16>
    %c0_121 = arith.constant 0 : index
    %c0_122 = arith.constant 0 : index
    %c0_123 = arith.constant 0 : index
    %338 = vector.load %arg15[%c0_121, %c0_122, %c0_123] : memref<2x32x64xbf16, #tpu.memory_space<vmem>>, vector<1x32x64xbf16>
    %339 = vector.shape_cast %338 : vector<1x32x64xbf16> to vector<32x64xbf16>
    %c0_124 = arith.constant 0 : index
    %c0_125 = arith.constant 0 : index
    %c0_126 = arith.constant 0 : index
    %340 = vector.load %arg16[%c0_124, %c0_125, %c0_126] : memref<2x64x32xbf16, #tpu.memory_space<vmem>>, vector<1x64x32xbf16>
    %341 = vector.shape_cast %340 : vector<1x64x32xbf16> to vector<64x32xbf16>
    %c0_127 = arith.constant 0 : index
    %c0_128 = arith.constant 0 : index
    %c0_129 = arith.constant 0 : index
    %342 = vector.load %arg17[%c0_127, %c0_128, %c0_129] : memref<2x13x96xf32, #tpu.memory_space<vmem>>, vector<1x13x96xf32>
    %343 = vector.shape_cast %342 : vector<1x13x96xf32> to vector<13x96xf32>
    %344 = vector.extract_strided_slice %343 {offsets = [0, 0], sizes = [1, 96], strides = [1, 1]} : vector<13x96xf32> to vector<1x96xf32>
    %345 = vector.extract_strided_slice %343 {offsets = [1, 0], sizes = [1, 32], strides = [1, 1]} : vector<13x96xf32> to vector<1x32xf32>
    %346 = vector.extract_strided_slice %343 {offsets = [2, 0], sizes = [1, 32], strides = [1, 1]} : vector<13x96xf32> to vector<1x32xf32>
    %347 = vector.extract_strided_slice %343 {offsets = [3, 0], sizes = [1, 64], strides = [1, 1]} : vector<13x96xf32> to vector<1x64xf32>
    %348 = vector.extract_strided_slice %343 {offsets = [4, 0], sizes = [1, 32], strides = [1, 1]} : vector<13x96xf32> to vector<1x32xf32>
    %349 = vector.extract_strided_slice %343 {offsets = [5, 0], sizes = [1, 64], strides = [1, 1]} : vector<13x96xf32> to vector<1x64xf32>
    %350 = vector.extract_strided_slice %343 {offsets = [6, 0], sizes = [1, 32], strides = [1, 1]} : vector<13x96xf32> to vector<1x32xf32>
    %351 = vector.extract_strided_slice %343 {offsets = [7, 0], sizes = [1, 32], strides = [1, 1]} : vector<13x96xf32> to vector<1x32xf32>
    %352 = vector.extract_strided_slice %343 {offsets = [8, 0], sizes = [1, 32], strides = [1, 1]} : vector<13x96xf32> to vector<1x32xf32>
    %353 = vector.extract_strided_slice %343 {offsets = [9, 0], sizes = [1, 32], strides = [1, 1]} : vector<13x96xf32> to vector<1x32xf32>
    %354 = vector.extract_strided_slice %343 {offsets = [10, 0], sizes = [1, 32], strides = [1, 1]} : vector<13x96xf32> to vector<1x32xf32>
    %355 = vector.extract_strided_slice %343 {offsets = [11, 0], sizes = [1, 32], strides = [1, 1]} : vector<13x96xf32> to vector<1x32xf32>
    %356 = vector.extract_strided_slice %343 {offsets = [12, 0], sizes = [1, 32], strides = [1, 1]} : vector<13x96xf32> to vector<1x32xf32>
    %357 = arith.truncf %324 : vector<8x32xf32> to vector<8x32xbf16>
    %cst_130 = arith.constant dense<0.000000e+00> : vector<8x96xf32>
    %358 = tpu.matmul %357, %329, %cst_130 {dimension_numbers = #tpu.dot_dimension_numbers<[1], [0], [0], [1], [0, 0, 1, 1], [], []>} : vector<8x32xbf16>, vector<32x96xbf16>, vector<8x96xf32> -> vector<8x96xf32>
    %359 = vector.broadcast %344 : vector<1x96xf32> to vector<8x96xf32>
    %360 = arith.addf %358, %359 : vector<8x96xf32>
    %361 = vector.extract_strided_slice %360 {offsets = [0, 0], sizes = [8, 32], strides = [1, 1]} : vector<8x96xf32> to vector<8x32xf32>
    %362 = vector.extract_strided_slice %360 {offsets = [0, 32], sizes = [8, 32], strides = [1, 1]} : vector<8x96xf32> to vector<8x32xf32>
    %363 = vector.extract_strided_slice %360 {offsets = [0, 64], sizes = [8, 32], strides = [1, 1]} : vector<8x96xf32> to vector<8x32xf32>
    %364 = vector.extract_strided_slice %361 {offsets = [0, 0], sizes = [8, 8], strides = [1, 1]} : vector<8x32xf32> to vector<8x8xf32>
    %365 = vector.extract_strided_slice %362 {offsets = [0, 0], sizes = [8, 8], strides = [1, 1]} : vector<8x32xf32> to vector<8x8xf32>
    %cst_131 = arith.constant dense<0.000000e+00> : vector<8x8xf32>
    %366 = tpu.matmul %364, %365, %cst_131 {dimension_numbers = #tpu.dot_dimension_numbers<[1], [1], [0], [0], [0, 0, 1, 0], [], []>} : vector<8x8xf32>, vector<8x8xf32>, vector<8x8xf32> -> vector<8x8xf32>
    %cst_132 = arith.constant -1.000000e+30 : f32
    %367 = vector.broadcast %cst_132 : f32 to vector<8x8xf32>
    %368 = arith.select %327, %366, %367 : vector<8x8xi1>, vector<8x8xf32>
    %cst_133 = arith.constant dense<0xFF800000> : vector<8xf32>
    %369 = vector.multi_reduction <maximumf>, %368, %cst_133 [1] : vector<8x8xf32> to vector<8xf32>
    %370 = vector.shape_cast %369 : vector<8xf32> to vector<8x1xf32>
    %371 = vector.broadcast %370 : vector<8x1xf32> to vector<8x8xf32>
    %372 = arith.subf %368, %371 : vector<8x8xf32>
    %373 = math.exp %372 : vector<8x8xf32>
    %cst_134 = arith.constant dense<0.000000e+00> : vector<8xf32>
    %374 = vector.multi_reduction <add>, %373, %cst_134 [1] : vector<8x8xf32> to vector<8xf32>
    %375 = vector.shape_cast %374 : vector<8xf32> to vector<8x1xf32>
    %376 = tpu.reciprocal %375 {approx = true} : vector<8x1xf32> -> vector<8x1xf32>
    %377 = vector.broadcast %376 : vector<8x1xf32> to vector<8x8xf32>
    %378 = arith.mulf %373, %377 : vector<8x8xf32>
    %379 = vector.extract_strided_slice %363 {offsets = [0, 0], sizes = [8, 8], strides = [1, 1]} : vector<8x32xf32> to vector<8x8xf32>
    %cst_135 = arith.constant dense<0.000000e+00> : vector<8x8xf32>
    %380 = tpu.matmul %378, %379, %cst_135 {dimension_numbers = #tpu.dot_dimension_numbers<[1], [0], [0], [1], [0, 0, 1, 1], [], []>} : vector<8x8xf32>, vector<8x8xf32>, vector<8x8xf32> -> vector<8x8xf32>
    %381 = vector.extract_strided_slice %331 {offsets = [0, 0], sizes = [8, 32], strides = [1, 1]} : vector<32x32xbf16> to vector<8x32xbf16>
    %382 = arith.truncf %380 : vector<8x8xf32> to vector<8x8xbf16>
    %cst_136 = arith.constant dense<0.000000e+00> : vector<8x32xf32>
    %383 = tpu.matmul %382, %381, %cst_136 {dimension_numbers = #tpu.dot_dimension_numbers<[1], [0], [0], [1], [0, 0, 1, 1], [], []>} : vector<8x8xbf16>, vector<8x32xbf16>, vector<8x32xf32> -> vector<8x32xf32>
    %384 = vector.extract_strided_slice %361 {offsets = [0, 8], sizes = [8, 8], strides = [1, 1]} : vector<8x32xf32> to vector<8x8xf32>
    %385 = vector.extract_strided_slice %362 {offsets = [0, 8], sizes = [8, 8], strides = [1, 1]} : vector<8x32xf32> to vector<8x8xf32>
    %cst_137 = arith.constant dense<0.000000e+00> : vector<8x8xf32>
    %386 = tpu.matmul %384, %385, %cst_137 {dimension_numbers = #tpu.dot_dimension_numbers<[1], [1], [0], [0], [0, 0, 1, 0], [], []>} : vector<8x8xf32>, vector<8x8xf32>, vector<8x8xf32> -> vector<8x8xf32>
    %cst_138 = arith.constant -1.000000e+30 : f32
    %387 = vector.broadcast %cst_138 : f32 to vector<8x8xf32>
    %388 = arith.select %327, %386, %387 : vector<8x8xi1>, vector<8x8xf32>
    %cst_139 = arith.constant dense<0xFF800000> : vector<8xf32>
    %389 = vector.multi_reduction <maximumf>, %388, %cst_139 [1] : vector<8x8xf32> to vector<8xf32>
    %390 = vector.shape_cast %389 : vector<8xf32> to vector<8x1xf32>
    %391 = vector.broadcast %390 : vector<8x1xf32> to vector<8x8xf32>
    %392 = arith.subf %388, %391 : vector<8x8xf32>
    %393 = math.exp %392 : vector<8x8xf32>
    %cst_140 = arith.constant dense<0.000000e+00> : vector<8xf32>
    %394 = vector.multi_reduction <add>, %393, %cst_140 [1] : vector<8x8xf32> to vector<8xf32>
    %395 = vector.shape_cast %394 : vector<8xf32> to vector<8x1xf32>
    %396 = tpu.reciprocal %395 {approx = true} : vector<8x1xf32> -> vector<8x1xf32>
    %397 = vector.broadcast %396 : vector<8x1xf32> to vector<8x8xf32>
    %398 = arith.mulf %393, %397 : vector<8x8xf32>
    %399 = vector.extract_strided_slice %363 {offsets = [0, 8], sizes = [8, 8], strides = [1, 1]} : vector<8x32xf32> to vector<8x8xf32>
    %cst_141 = arith.constant dense<0.000000e+00> : vector<8x8xf32>
    %400 = tpu.matmul %398, %399, %cst_141 {dimension_numbers = #tpu.dot_dimension_numbers<[1], [0], [0], [1], [0, 0, 1, 1], [], []>} : vector<8x8xf32>, vector<8x8xf32>, vector<8x8xf32> -> vector<8x8xf32>
    %401 = vector.extract_strided_slice %331 {offsets = [8, 0], sizes = [8, 32], strides = [1, 1]} : vector<32x32xbf16> to vector<8x32xbf16>
    %402 = arith.truncf %400 : vector<8x8xf32> to vector<8x8xbf16>
    %cst_142 = arith.constant dense<0.000000e+00> : vector<8x32xf32>
    %403 = tpu.matmul %402, %401, %cst_142 {dimension_numbers = #tpu.dot_dimension_numbers<[1], [0], [0], [1], [0, 0, 1, 1], [], []>} : vector<8x8xbf16>, vector<8x32xbf16>, vector<8x32xf32> -> vector<8x32xf32>
    %404 = arith.addf %383, %403 : vector<8x32xf32>
    %405 = vector.extract_strided_slice %361 {offsets = [0, 16], sizes = [8, 8], strides = [1, 1]} : vector<8x32xf32> to vector<8x8xf32>
    %406 = vector.extract_strided_slice %362 {offsets = [0, 16], sizes = [8, 8], strides = [1, 1]} : vector<8x32xf32> to vector<8x8xf32>
    %cst_143 = arith.constant dense<0.000000e+00> : vector<8x8xf32>
    %407 = tpu.matmul %405, %406, %cst_143 {dimension_numbers = #tpu.dot_dimension_numbers<[1], [1], [0], [0], [0, 0, 1, 0], [], []>} : vector<8x8xf32>, vector<8x8xf32>, vector<8x8xf32> -> vector<8x8xf32>
    %cst_144 = arith.constant -1.000000e+30 : f32
    %408 = vector.broadcast %cst_144 : f32 to vector<8x8xf32>
    %409 = arith.select %327, %407, %408 : vector<8x8xi1>, vector<8x8xf32>
    %cst_145 = arith.constant dense<0xFF800000> : vector<8xf32>
    %410 = vector.multi_reduction <maximumf>, %409, %cst_145 [1] : vector<8x8xf32> to vector<8xf32>
    %411 = vector.shape_cast %410 : vector<8xf32> to vector<8x1xf32>
    %412 = vector.broadcast %411 : vector<8x1xf32> to vector<8x8xf32>
    %413 = arith.subf %409, %412 : vector<8x8xf32>
    %414 = math.exp %413 : vector<8x8xf32>
    %cst_146 = arith.constant dense<0.000000e+00> : vector<8xf32>
    %415 = vector.multi_reduction <add>, %414, %cst_146 [1] : vector<8x8xf32> to vector<8xf32>
    %416 = vector.shape_cast %415 : vector<8xf32> to vector<8x1xf32>
    %417 = tpu.reciprocal %416 {approx = true} : vector<8x1xf32> -> vector<8x1xf32>
    %418 = vector.broadcast %417 : vector<8x1xf32> to vector<8x8xf32>
    %419 = arith.mulf %414, %418 : vector<8x8xf32>
    %420 = vector.extract_strided_slice %363 {offsets = [0, 16], sizes = [8, 8], strides = [1, 1]} : vector<8x32xf32> to vector<8x8xf32>
    %cst_147 = arith.constant dense<0.000000e+00> : vector<8x8xf32>
    %421 = tpu.matmul %419, %420, %cst_147 {dimension_numbers = #tpu.dot_dimension_numbers<[1], [0], [0], [1], [0, 0, 1, 1], [], []>} : vector<8x8xf32>, vector<8x8xf32>, vector<8x8xf32> -> vector<8x8xf32>
    %422 = vector.extract_strided_slice %331 {offsets = [16, 0], sizes = [8, 32], strides = [1, 1]} : vector<32x32xbf16> to vector<8x32xbf16>
    %423 = arith.truncf %421 : vector<8x8xf32> to vector<8x8xbf16>
    %cst_148 = arith.constant dense<0.000000e+00> : vector<8x32xf32>
    %424 = tpu.matmul %423, %422, %cst_148 {dimension_numbers = #tpu.dot_dimension_numbers<[1], [0], [0], [1], [0, 0, 1, 1], [], []>} : vector<8x8xbf16>, vector<8x32xbf16>, vector<8x32xf32> -> vector<8x32xf32>
    %425 = arith.addf %404, %424 : vector<8x32xf32>
    %426 = vector.extract_strided_slice %361 {offsets = [0, 24], sizes = [8, 8], strides = [1, 1]} : vector<8x32xf32> to vector<8x8xf32>
    %427 = vector.extract_strided_slice %362 {offsets = [0, 24], sizes = [8, 8], strides = [1, 1]} : vector<8x32xf32> to vector<8x8xf32>
    %cst_149 = arith.constant dense<0.000000e+00> : vector<8x8xf32>
    %428 = tpu.matmul %426, %427, %cst_149 {dimension_numbers = #tpu.dot_dimension_numbers<[1], [1], [0], [0], [0, 0, 1, 0], [], []>} : vector<8x8xf32>, vector<8x8xf32>, vector<8x8xf32> -> vector<8x8xf32>
    %cst_150 = arith.constant -1.000000e+30 : f32
    %429 = vector.broadcast %cst_150 : f32 to vector<8x8xf32>
    %430 = arith.select %327, %428, %429 : vector<8x8xi1>, vector<8x8xf32>
    %cst_151 = arith.constant dense<0xFF800000> : vector<8xf32>
    %431 = vector.multi_reduction <maximumf>, %430, %cst_151 [1] : vector<8x8xf32> to vector<8xf32>
    %432 = vector.shape_cast %431 : vector<8xf32> to vector<8x1xf32>
    %433 = vector.broadcast %432 : vector<8x1xf32> to vector<8x8xf32>
    %434 = arith.subf %430, %433 : vector<8x8xf32>
    %435 = math.exp %434 : vector<8x8xf32>
    %cst_152 = arith.constant dense<0.000000e+00> : vector<8xf32>
    %436 = vector.multi_reduction <add>, %435, %cst_152 [1] : vector<8x8xf32> to vector<8xf32>
    %437 = vector.shape_cast %436 : vector<8xf32> to vector<8x1xf32>
    %438 = tpu.reciprocal %437 {approx = true} : vector<8x1xf32> -> vector<8x1xf32>
    %439 = vector.broadcast %438 : vector<8x1xf32> to vector<8x8xf32>
    %440 = arith.mulf %435, %439 : vector<8x8xf32>
    %441 = vector.extract_strided_slice %363 {offsets = [0, 24], sizes = [8, 8], strides = [1, 1]} : vector<8x32xf32> to vector<8x8xf32>
    %cst_153 = arith.constant dense<0.000000e+00> : vector<8x8xf32>
    %442 = tpu.matmul %440, %441, %cst_153 {dimension_numbers = #tpu.dot_dimension_numbers<[1], [0], [0], [1], [0, 0, 1, 1], [], []>} : vector<8x8xf32>, vector<8x8xf32>, vector<8x8xf32> -> vector<8x8xf32>
    %443 = vector.extract_strided_slice %331 {offsets = [24, 0], sizes = [8, 32], strides = [1, 1]} : vector<32x32xbf16> to vector<8x32xbf16>
    %444 = arith.truncf %442 : vector<8x8xf32> to vector<8x8xbf16>
    %cst_154 = arith.constant dense<0.000000e+00> : vector<8x32xf32>
    %445 = tpu.matmul %444, %443, %cst_154 {dimension_numbers = #tpu.dot_dimension_numbers<[1], [0], [0], [1], [0, 0, 1, 1], [], []>} : vector<8x8xbf16>, vector<8x32xbf16>, vector<8x32xf32> -> vector<8x32xf32>
    %446 = arith.addf %425, %445 : vector<8x32xf32>
    %447 = vector.broadcast %345 : vector<1x32xf32> to vector<8x32xf32>
    %448 = arith.addf %446, %447 : vector<8x32xf32>
    %449 = arith.addf %324, %448 : vector<8x32xf32>
    %cst_155 = arith.constant dense<0.000000e+00> : vector<8xf32>
    %450 = vector.multi_reduction <add>, %449, %cst_155 [1] : vector<8x32xf32> to vector<8xf32>
    %451 = vector.shape_cast %450 : vector<8xf32> to vector<8x1xf32>
    %cst_156 = arith.constant 3.200000e+01 : f32
    %452 = vector.broadcast %cst_156 : f32 to vector<8x1xf32>
    %453 = arith.divf %451, %452 : vector<8x1xf32>
    %454 = vector.broadcast %453 : vector<8x1xf32> to vector<8x32xf32>
    %455 = arith.subf %449, %454 : vector<8x32xf32>
    %456 = arith.mulf %455, %455 : vector<8x32xf32>
    %cst_157 = arith.constant dense<0.000000e+00> : vector<8xf32>
    %457 = vector.multi_reduction <add>, %456, %cst_157 [1] : vector<8x32xf32> to vector<8xf32>
    %458 = vector.shape_cast %457 : vector<8xf32> to vector<8x1xf32>
    %cst_158 = arith.constant 3.200000e+01 : f32
    %459 = vector.broadcast %cst_158 : f32 to vector<8x1xf32>
    %460 = arith.divf %458, %459 : vector<8x1xf32>
    %461 = vector.broadcast %453 : vector<8x1xf32> to vector<8x32xf32>
    %462 = arith.subf %449, %461 : vector<8x32xf32>
    %cst_159 = arith.constant 9.99999974E-6 : f32
    %463 = vector.broadcast %cst_159 : f32 to vector<8x1xf32>
    %464 = arith.addf %460, %463 : vector<8x1xf32>
    %465 = math.rsqrt %464 : vector<8x1xf32>
    %466 = vector.broadcast %465 : vector<8x1xf32> to vector<8x32xf32>
    %467 = arith.mulf %462, %466 : vector<8x32xf32>
    %468 = vector.broadcast %351 : vector<1x32xf32> to vector<8x32xf32>
    %469 = arith.mulf %467, %468 : vector<8x32xf32>
    %470 = vector.broadcast %352 : vector<1x32xf32> to vector<8x32xf32>
    %471 = arith.addf %469, %470 : vector<8x32xf32>
    %472 = arith.truncf %471 : vector<8x32xf32> to vector<8x32xbf16>
    %cst_160 = arith.constant dense<0.000000e+00> : vector<8x32xf32>
    %473 = tpu.matmul %472, %333, %cst_160 {dimension_numbers = #tpu.dot_dimension_numbers<[1], [0], [0], [1], [0, 0, 1, 1], [], []>} : vector<8x32xbf16>, vector<32x32xbf16>, vector<8x32xf32> -> vector<8x32xf32>
    %474 = vector.broadcast %346 : vector<1x32xf32> to vector<8x32xf32>
    %475 = arith.addf %473, %474 : vector<8x32xf32>
    %476 = arith.truncf %322 : vector<16x32xf32> to vector<16x32xbf16>
    %cst_161 = arith.constant dense<0.000000e+00> : vector<16x64xf32>
    %477 = tpu.matmul %476, %335, %cst_161 {dimension_numbers = #tpu.dot_dimension_numbers<[1], [0], [0], [1], [0, 0, 1, 1], [], []>} : vector<16x32xbf16>, vector<32x64xbf16>, vector<16x64xf32> -> vector<16x64xf32>
    %478 = vector.broadcast %347 : vector<1x64xf32> to vector<16x64xf32>
    %479 = arith.addf %477, %478 : vector<16x64xf32>
    %480 = vector.extract_strided_slice %479 {offsets = [0, 0], sizes = [16, 32], strides = [1, 1]} : vector<16x64xf32> to vector<16x32xf32>
    %481 = vector.extract_strided_slice %479 {offsets = [0, 32], sizes = [16, 32], strides = [1, 1]} : vector<16x64xf32> to vector<16x32xf32>
    %482 = vector.extract_strided_slice %475 {offsets = [0, 0], sizes = [8, 8], strides = [1, 1]} : vector<8x32xf32> to vector<8x8xf32>
    %483 = vector.extract_strided_slice %480 {offsets = [0, 0], sizes = [16, 8], strides = [1, 1]} : vector<16x32xf32> to vector<16x8xf32>
    %cst_162 = arith.constant dense<0.000000e+00> : vector<8x16xf32>
    %484 = tpu.matmul %482, %483, %cst_162 {dimension_numbers = #tpu.dot_dimension_numbers<[1], [1], [0], [0], [0, 0, 1, 0], [], []>} : vector<8x8xf32>, vector<16x8xf32>, vector<8x16xf32> -> vector<8x16xf32>
    %cst_163 = arith.constant dense<0xFF800000> : vector<8xf32>
    %485 = vector.multi_reduction <maximumf>, %484, %cst_163 [1] : vector<8x16xf32> to vector<8xf32>
    %486 = vector.shape_cast %485 : vector<8xf32> to vector<8x1xf32>
    %487 = vector.broadcast %486 : vector<8x1xf32> to vector<8x16xf32>
    %488 = arith.subf %484, %487 : vector<8x16xf32>
    %489 = math.exp %488 : vector<8x16xf32>
    %cst_164 = arith.constant dense<0.000000e+00> : vector<8xf32>
    %490 = vector.multi_reduction <add>, %489, %cst_164 [1] : vector<8x16xf32> to vector<8xf32>
    %491 = vector.shape_cast %490 : vector<8xf32> to vector<8x1xf32>
    %492 = tpu.reciprocal %491 {approx = true} : vector<8x1xf32> -> vector<8x1xf32>
    %493 = vector.broadcast %492 : vector<8x1xf32> to vector<8x16xf32>
    %494 = arith.mulf %489, %493 : vector<8x16xf32>
    %495 = vector.extract_strided_slice %481 {offsets = [0, 0], sizes = [16, 8], strides = [1, 1]} : vector<16x32xf32> to vector<16x8xf32>
    %cst_165 = arith.constant dense<0.000000e+00> : vector<8x8xf32>
    %496 = tpu.matmul %494, %495, %cst_165 {dimension_numbers = #tpu.dot_dimension_numbers<[1], [0], [0], [1], [0, 0, 1, 1], [], []>} : vector<8x16xf32>, vector<16x8xf32>, vector<8x8xf32> -> vector<8x8xf32>
    %497 = vector.extract_strided_slice %337 {offsets = [0, 0], sizes = [8, 32], strides = [1, 1]} : vector<32x32xbf16> to vector<8x32xbf16>
    %498 = arith.truncf %496 : vector<8x8xf32> to vector<8x8xbf16>
    %cst_166 = arith.constant dense<0.000000e+00> : vector<8x32xf32>
    %499 = tpu.matmul %498, %497, %cst_166 {dimension_numbers = #tpu.dot_dimension_numbers<[1], [0], [0], [1], [0, 0, 1, 1], [], []>} : vector<8x8xbf16>, vector<8x32xbf16>, vector<8x32xf32> -> vector<8x32xf32>
    %500 = vector.extract_strided_slice %475 {offsets = [0, 8], sizes = [8, 8], strides = [1, 1]} : vector<8x32xf32> to vector<8x8xf32>
    %501 = vector.extract_strided_slice %480 {offsets = [0, 8], sizes = [16, 8], strides = [1, 1]} : vector<16x32xf32> to vector<16x8xf32>
    %cst_167 = arith.constant dense<0.000000e+00> : vector<8x16xf32>
    %502 = tpu.matmul %500, %501, %cst_167 {dimension_numbers = #tpu.dot_dimension_numbers<[1], [1], [0], [0], [0, 0, 1, 0], [], []>} : vector<8x8xf32>, vector<16x8xf32>, vector<8x16xf32> -> vector<8x16xf32>
    %cst_168 = arith.constant dense<0xFF800000> : vector<8xf32>
    %503 = vector.multi_reduction <maximumf>, %502, %cst_168 [1] : vector<8x16xf32> to vector<8xf32>
    %504 = vector.shape_cast %503 : vector<8xf32> to vector<8x1xf32>
    %505 = vector.broadcast %504 : vector<8x1xf32> to vector<8x16xf32>
    %506 = arith.subf %502, %505 : vector<8x16xf32>
    %507 = math.exp %506 : vector<8x16xf32>
    %cst_169 = arith.constant dense<0.000000e+00> : vector<8xf32>
    %508 = vector.multi_reduction <add>, %507, %cst_169 [1] : vector<8x16xf32> to vector<8xf32>
    %509 = vector.shape_cast %508 : vector<8xf32> to vector<8x1xf32>
    %510 = tpu.reciprocal %509 {approx = true} : vector<8x1xf32> -> vector<8x1xf32>
    %511 = vector.broadcast %510 : vector<8x1xf32> to vector<8x16xf32>
    %512 = arith.mulf %507, %511 : vector<8x16xf32>
    %513 = vector.extract_strided_slice %481 {offsets = [0, 8], sizes = [16, 8], strides = [1, 1]} : vector<16x32xf32> to vector<16x8xf32>
    %cst_170 = arith.constant dense<0.000000e+00> : vector<8x8xf32>
    %514 = tpu.matmul %512, %513, %cst_170 {dimension_numbers = #tpu.dot_dimension_numbers<[1], [0], [0], [1], [0, 0, 1, 1], [], []>} : vector<8x16xf32>, vector<16x8xf32>, vector<8x8xf32> -> vector<8x8xf32>
    %515 = vector.extract_strided_slice %337 {offsets = [8, 0], sizes = [8, 32], strides = [1, 1]} : vector<32x32xbf16> to vector<8x32xbf16>
    %516 = arith.truncf %514 : vector<8x8xf32> to vector<8x8xbf16>
    %cst_171 = arith.constant dense<0.000000e+00> : vector<8x32xf32>
    %517 = tpu.matmul %516, %515, %cst_171 {dimension_numbers = #tpu.dot_dimension_numbers<[1], [0], [0], [1], [0, 0, 1, 1], [], []>} : vector<8x8xbf16>, vector<8x32xbf16>, vector<8x32xf32> -> vector<8x32xf32>
    %518 = arith.addf %499, %517 : vector<8x32xf32>
    %519 = vector.extract_strided_slice %475 {offsets = [0, 16], sizes = [8, 8], strides = [1, 1]} : vector<8x32xf32> to vector<8x8xf32>
    %520 = vector.extract_strided_slice %480 {offsets = [0, 16], sizes = [16, 8], strides = [1, 1]} : vector<16x32xf32> to vector<16x8xf32>
    %cst_172 = arith.constant dense<0.000000e+00> : vector<8x16xf32>
    %521 = tpu.matmul %519, %520, %cst_172 {dimension_numbers = #tpu.dot_dimension_numbers<[1], [1], [0], [0], [0, 0, 1, 0], [], []>} : vector<8x8xf32>, vector<16x8xf32>, vector<8x16xf32> -> vector<8x16xf32>
    %cst_173 = arith.constant dense<0xFF800000> : vector<8xf32>
    %522 = vector.multi_reduction <maximumf>, %521, %cst_173 [1] : vector<8x16xf32> to vector<8xf32>
    %523 = vector.shape_cast %522 : vector<8xf32> to vector<8x1xf32>
    %524 = vector.broadcast %523 : vector<8x1xf32> to vector<8x16xf32>
    %525 = arith.subf %521, %524 : vector<8x16xf32>
    %526 = math.exp %525 : vector<8x16xf32>
    %cst_174 = arith.constant dense<0.000000e+00> : vector<8xf32>
    %527 = vector.multi_reduction <add>, %526, %cst_174 [1] : vector<8x16xf32> to vector<8xf32>
    %528 = vector.shape_cast %527 : vector<8xf32> to vector<8x1xf32>
    %529 = tpu.reciprocal %528 {approx = true} : vector<8x1xf32> -> vector<8x1xf32>
    %530 = vector.broadcast %529 : vector<8x1xf32> to vector<8x16xf32>
    %531 = arith.mulf %526, %530 : vector<8x16xf32>
    %532 = vector.extract_strided_slice %481 {offsets = [0, 16], sizes = [16, 8], strides = [1, 1]} : vector<16x32xf32> to vector<16x8xf32>
    %cst_175 = arith.constant dense<0.000000e+00> : vector<8x8xf32>
    %533 = tpu.matmul %531, %532, %cst_175 {dimension_numbers = #tpu.dot_dimension_numbers<[1], [0], [0], [1], [0, 0, 1, 1], [], []>} : vector<8x16xf32>, vector<16x8xf32>, vector<8x8xf32> -> vector<8x8xf32>
    %534 = vector.extract_strided_slice %337 {offsets = [16, 0], sizes = [8, 32], strides = [1, 1]} : vector<32x32xbf16> to vector<8x32xbf16>
    %535 = arith.truncf %533 : vector<8x8xf32> to vector<8x8xbf16>
    %cst_176 = arith.constant dense<0.000000e+00> : vector<8x32xf32>
    %536 = tpu.matmul %535, %534, %cst_176 {dimension_numbers = #tpu.dot_dimension_numbers<[1], [0], [0], [1], [0, 0, 1, 1], [], []>} : vector<8x8xbf16>, vector<8x32xbf16>, vector<8x32xf32> -> vector<8x32xf32>
    %537 = arith.addf %518, %536 : vector<8x32xf32>
    %538 = vector.extract_strided_slice %475 {offsets = [0, 24], sizes = [8, 8], strides = [1, 1]} : vector<8x32xf32> to vector<8x8xf32>
    %539 = vector.extract_strided_slice %480 {offsets = [0, 24], sizes = [16, 8], strides = [1, 1]} : vector<16x32xf32> to vector<16x8xf32>
    %cst_177 = arith.constant dense<0.000000e+00> : vector<8x16xf32>
    %540 = tpu.matmul %538, %539, %cst_177 {dimension_numbers = #tpu.dot_dimension_numbers<[1], [1], [0], [0], [0, 0, 1, 0], [], []>} : vector<8x8xf32>, vector<16x8xf32>, vector<8x16xf32> -> vector<8x16xf32>
    %cst_178 = arith.constant dense<0xFF800000> : vector<8xf32>
    %541 = vector.multi_reduction <maximumf>, %540, %cst_178 [1] : vector<8x16xf32> to vector<8xf32>
    %542 = vector.shape_cast %541 : vector<8xf32> to vector<8x1xf32>
    %543 = vector.broadcast %542 : vector<8x1xf32> to vector<8x16xf32>
    %544 = arith.subf %540, %543 : vector<8x16xf32>
    %545 = math.exp %544 : vector<8x16xf32>
    %cst_179 = arith.constant dense<0.000000e+00> : vector<8xf32>
    %546 = vector.multi_reduction <add>, %545, %cst_179 [1] : vector<8x16xf32> to vector<8xf32>
    %547 = vector.shape_cast %546 : vector<8xf32> to vector<8x1xf32>
    %548 = tpu.reciprocal %547 {approx = true} : vector<8x1xf32> -> vector<8x1xf32>
    %549 = vector.broadcast %548 : vector<8x1xf32> to vector<8x16xf32>
    %550 = arith.mulf %545, %549 : vector<8x16xf32>
    %551 = vector.extract_strided_slice %481 {offsets = [0, 24], sizes = [16, 8], strides = [1, 1]} : vector<16x32xf32> to vector<16x8xf32>
    %cst_180 = arith.constant dense<0.000000e+00> : vector<8x8xf32>
    %552 = tpu.matmul %550, %551, %cst_180 {dimension_numbers = #tpu.dot_dimension_numbers<[1], [0], [0], [1], [0, 0, 1, 1], [], []>} : vector<8x16xf32>, vector<16x8xf32>, vector<8x8xf32> -> vector<8x8xf32>
    %553 = vector.extract_strided_slice %337 {offsets = [24, 0], sizes = [8, 32], strides = [1, 1]} : vector<32x32xbf16> to vector<8x32xbf16>
    %554 = arith.truncf %552 : vector<8x8xf32> to vector<8x8xbf16>
    %cst_181 = arith.constant dense<0.000000e+00> : vector<8x32xf32>
    %555 = tpu.matmul %554, %553, %cst_181 {dimension_numbers = #tpu.dot_dimension_numbers<[1], [0], [0], [1], [0, 0, 1, 1], [], []>} : vector<8x8xbf16>, vector<8x32xbf16>, vector<8x32xf32> -> vector<8x32xf32>
    %556 = arith.addf %537, %555 : vector<8x32xf32>
    %557 = vector.broadcast %348 : vector<1x32xf32> to vector<8x32xf32>
    %558 = arith.addf %556, %557 : vector<8x32xf32>
    %559 = arith.addf %471, %558 : vector<8x32xf32>
    %cst_182 = arith.constant dense<0.000000e+00> : vector<8xf32>
    %560 = vector.multi_reduction <add>, %559, %cst_182 [1] : vector<8x32xf32> to vector<8xf32>
    %561 = vector.shape_cast %560 : vector<8xf32> to vector<8x1xf32>
    %cst_183 = arith.constant 3.200000e+01 : f32
    %562 = vector.broadcast %cst_183 : f32 to vector<8x1xf32>
    %563 = arith.divf %561, %562 : vector<8x1xf32>
    %564 = vector.broadcast %563 : vector<8x1xf32> to vector<8x32xf32>
    %565 = arith.subf %559, %564 : vector<8x32xf32>
    %566 = arith.mulf %565, %565 : vector<8x32xf32>
    %cst_184 = arith.constant dense<0.000000e+00> : vector<8xf32>
    %567 = vector.multi_reduction <add>, %566, %cst_184 [1] : vector<8x32xf32> to vector<8xf32>
    %568 = vector.shape_cast %567 : vector<8xf32> to vector<8x1xf32>
    %cst_185 = arith.constant 3.200000e+01 : f32
    %569 = vector.broadcast %cst_185 : f32 to vector<8x1xf32>
    %570 = arith.divf %568, %569 : vector<8x1xf32>
    %571 = vector.broadcast %563 : vector<8x1xf32> to vector<8x32xf32>
    %572 = arith.subf %559, %571 : vector<8x32xf32>
    %cst_186 = arith.constant 9.99999974E-6 : f32
    %573 = vector.broadcast %cst_186 : f32 to vector<8x1xf32>
    %574 = arith.addf %570, %573 : vector<8x1xf32>
    %575 = math.rsqrt %574 : vector<8x1xf32>
    %576 = vector.broadcast %575 : vector<8x1xf32> to vector<8x32xf32>
    %577 = arith.mulf %572, %576 : vector<8x32xf32>
    %578 = vector.broadcast %353 : vector<1x32xf32> to vector<8x32xf32>
    %579 = arith.mulf %577, %578 : vector<8x32xf32>
    %580 = vector.broadcast %354 : vector<1x32xf32> to vector<8x32xf32>
    %581 = arith.addf %579, %580 : vector<8x32xf32>
    %582 = arith.truncf %581 : vector<8x32xf32> to vector<8x32xbf16>
    %cst_187 = arith.constant dense<0.000000e+00> : vector<8x64xf32>
    %583 = tpu.matmul %582, %339, %cst_187 {dimension_numbers = #tpu.dot_dimension_numbers<[1], [0], [0], [1], [0, 0, 1, 1], [], []>} : vector<8x32xbf16>, vector<32x64xbf16>, vector<8x64xf32> -> vector<8x64xf32>
    %584 = vector.broadcast %349 : vector<1x64xf32> to vector<8x64xf32>
    %585 = arith.addf %583, %584 : vector<8x64xf32>
    %cst_188 = arith.constant 0.000000e+00 : f32
    %586 = vector.broadcast %cst_188 : f32 to vector<8x64xf32>
    %587 = arith.maximumf %585, %586 : vector<8x64xf32>
    %588 = arith.truncf %587 : vector<8x64xf32> to vector<8x64xbf16>
    %cst_189 = arith.constant dense<0.000000e+00> : vector<8x32xf32>
    %589 = tpu.matmul %588, %341, %cst_189 {dimension_numbers = #tpu.dot_dimension_numbers<[1], [0], [0], [1], [0, 0, 1, 1], [], []>} : vector<8x64xbf16>, vector<64x32xbf16>, vector<8x32xf32> -> vector<8x32xf32>
    %590 = vector.broadcast %350 : vector<1x32xf32> to vector<8x32xf32>
    %591 = arith.addf %589, %590 : vector<8x32xf32>
    %592 = arith.addf %581, %591 : vector<8x32xf32>
    %cst_190 = arith.constant dense<0.000000e+00> : vector<8xf32>
    %593 = vector.multi_reduction <add>, %592, %cst_190 [1] : vector<8x32xf32> to vector<8xf32>
    %594 = vector.shape_cast %593 : vector<8xf32> to vector<8x1xf32>
    %cst_191 = arith.constant 3.200000e+01 : f32
    %595 = vector.broadcast %cst_191 : f32 to vector<8x1xf32>
    %596 = arith.divf %594, %595 : vector<8x1xf32>
    %597 = vector.broadcast %596 : vector<8x1xf32> to vector<8x32xf32>
    %598 = arith.subf %592, %597 : vector<8x32xf32>
    %599 = arith.mulf %598, %598 : vector<8x32xf32>
    %cst_192 = arith.constant dense<0.000000e+00> : vector<8xf32>
    %600 = vector.multi_reduction <add>, %599, %cst_192 [1] : vector<8x32xf32> to vector<8xf32>
    %601 = vector.shape_cast %600 : vector<8xf32> to vector<8x1xf32>
    %cst_193 = arith.constant 3.200000e+01 : f32
    %602 = vector.broadcast %cst_193 : f32 to vector<8x1xf32>
    %603 = arith.divf %601, %602 : vector<8x1xf32>
    %604 = vector.broadcast %596 : vector<8x1xf32> to vector<8x32xf32>
    %605 = arith.subf %592, %604 : vector<8x32xf32>
    %cst_194 = arith.constant 9.99999974E-6 : f32
    %606 = vector.broadcast %cst_194 : f32 to vector<8x1xf32>
    %607 = arith.addf %603, %606 : vector<8x1xf32>
    %608 = math.rsqrt %607 : vector<8x1xf32>
    %609 = vector.broadcast %608 : vector<8x1xf32> to vector<8x32xf32>
    %610 = arith.mulf %605, %609 : vector<8x32xf32>
    %611 = vector.broadcast %355 : vector<1x32xf32> to vector<8x32xf32>
    %612 = arith.mulf %610, %611 : vector<8x32xf32>
    %613 = vector.broadcast %356 : vector<1x32xf32> to vector<8x32xf32>
    %614 = arith.addf %612, %613 : vector<8x32xf32>
    %c1_195 = arith.constant 1 : index
    %c0_196 = arith.constant 0 : index
    %c0_197 = arith.constant 0 : index
    %615 = vector.load %arg10[%c1_195, %c0_196, %c0_197] : memref<2x32x96xbf16, #tpu.memory_space<vmem>>, vector<1x32x96xbf16>
    %616 = vector.shape_cast %615 : vector<1x32x96xbf16> to vector<32x96xbf16>
    %c1_198 = arith.constant 1 : index
    %c0_199 = arith.constant 0 : index
    %c0_200 = arith.constant 0 : index
    %617 = vector.load %arg11[%c1_198, %c0_199, %c0_200] : memref<2x32x32xbf16, #tpu.memory_space<vmem>>, vector<1x32x32xbf16>
    %618 = vector.shape_cast %617 : vector<1x32x32xbf16> to vector<32x32xbf16>
    %c1_201 = arith.constant 1 : index
    %c0_202 = arith.constant 0 : index
    %c0_203 = arith.constant 0 : index
    %619 = vector.load %arg12[%c1_201, %c0_202, %c0_203] : memref<2x32x32xbf16, #tpu.memory_space<vmem>>, vector<1x32x32xbf16>
    %620 = vector.shape_cast %619 : vector<1x32x32xbf16> to vector<32x32xbf16>
    %c1_204 = arith.constant 1 : index
    %c0_205 = arith.constant 0 : index
    %c0_206 = arith.constant 0 : index
    %621 = vector.load %arg13[%c1_204, %c0_205, %c0_206] : memref<2x32x64xbf16, #tpu.memory_space<vmem>>, vector<1x32x64xbf16>
    %622 = vector.shape_cast %621 : vector<1x32x64xbf16> to vector<32x64xbf16>
    %c1_207 = arith.constant 1 : index
    %c0_208 = arith.constant 0 : index
    %c0_209 = arith.constant 0 : index
    %623 = vector.load %arg14[%c1_207, %c0_208, %c0_209] : memref<2x32x32xbf16, #tpu.memory_space<vmem>>, vector<1x32x32xbf16>
    %624 = vector.shape_cast %623 : vector<1x32x32xbf16> to vector<32x32xbf16>
    %c1_210 = arith.constant 1 : index
    %c0_211 = arith.constant 0 : index
    %c0_212 = arith.constant 0 : index
    %625 = vector.load %arg15[%c1_210, %c0_211, %c0_212] : memref<2x32x64xbf16, #tpu.memory_space<vmem>>, vector<1x32x64xbf16>
    %626 = vector.shape_cast %625 : vector<1x32x64xbf16> to vector<32x64xbf16>
    %c1_213 = arith.constant 1 : index
    %c0_214 = arith.constant 0 : index
    %c0_215 = arith.constant 0 : index
    %627 = vector.load %arg16[%c1_213, %c0_214, %c0_215] : memref<2x64x32xbf16, #tpu.memory_space<vmem>>, vector<1x64x32xbf16>
    %628 = vector.shape_cast %627 : vector<1x64x32xbf16> to vector<64x32xbf16>
    %c1_216 = arith.constant 1 : index
    %c0_217 = arith.constant 0 : index
    %c0_218 = arith.constant 0 : index
    %629 = vector.load %arg17[%c1_216, %c0_217, %c0_218] : memref<2x13x96xf32, #tpu.memory_space<vmem>>, vector<1x13x96xf32>
    %630 = vector.shape_cast %629 : vector<1x13x96xf32> to vector<13x96xf32>
    %631 = vector.extract_strided_slice %630 {offsets = [0, 0], sizes = [1, 96], strides = [1, 1]} : vector<13x96xf32> to vector<1x96xf32>
    %632 = vector.extract_strided_slice %630 {offsets = [1, 0], sizes = [1, 32], strides = [1, 1]} : vector<13x96xf32> to vector<1x32xf32>
    %633 = vector.extract_strided_slice %630 {offsets = [2, 0], sizes = [1, 32], strides = [1, 1]} : vector<13x96xf32> to vector<1x32xf32>
    %634 = vector.extract_strided_slice %630 {offsets = [3, 0], sizes = [1, 64], strides = [1, 1]} : vector<13x96xf32> to vector<1x64xf32>
    %635 = vector.extract_strided_slice %630 {offsets = [4, 0], sizes = [1, 32], strides = [1, 1]} : vector<13x96xf32> to vector<1x32xf32>
    %636 = vector.extract_strided_slice %630 {offsets = [5, 0], sizes = [1, 64], strides = [1, 1]} : vector<13x96xf32> to vector<1x64xf32>
    %637 = vector.extract_strided_slice %630 {offsets = [6, 0], sizes = [1, 32], strides = [1, 1]} : vector<13x96xf32> to vector<1x32xf32>
    %638 = vector.extract_strided_slice %630 {offsets = [7, 0], sizes = [1, 32], strides = [1, 1]} : vector<13x96xf32> to vector<1x32xf32>
    %639 = vector.extract_strided_slice %630 {offsets = [8, 0], sizes = [1, 32], strides = [1, 1]} : vector<13x96xf32> to vector<1x32xf32>
    %640 = vector.extract_strided_slice %630 {offsets = [9, 0], sizes = [1, 32], strides = [1, 1]} : vector<13x96xf32> to vector<1x32xf32>
    %641 = vector.extract_strided_slice %630 {offsets = [10, 0], sizes = [1, 32], strides = [1, 1]} : vector<13x96xf32> to vector<1x32xf32>
    %642 = vector.extract_strided_slice %630 {offsets = [11, 0], sizes = [1, 32], strides = [1, 1]} : vector<13x96xf32> to vector<1x32xf32>
    %643 = vector.extract_strided_slice %630 {offsets = [12, 0], sizes = [1, 32], strides = [1, 1]} : vector<13x96xf32> to vector<1x32xf32>
    %644 = arith.truncf %614 : vector<8x32xf32> to vector<8x32xbf16>
    %cst_219 = arith.constant dense<0.000000e+00> : vector<8x96xf32>
    %645 = tpu.matmul %644, %616, %cst_219 {dimension_numbers = #tpu.dot_dimension_numbers<[1], [0], [0], [1], [0, 0, 1, 1], [], []>} : vector<8x32xbf16>, vector<32x96xbf16>, vector<8x96xf32> -> vector<8x96xf32>
    %646 = vector.broadcast %631 : vector<1x96xf32> to vector<8x96xf32>
    %647 = arith.addf %645, %646 : vector<8x96xf32>
    %648 = vector.extract_strided_slice %647 {offsets = [0, 0], sizes = [8, 32], strides = [1, 1]} : vector<8x96xf32> to vector<8x32xf32>
    %649 = vector.extract_strided_slice %647 {offsets = [0, 32], sizes = [8, 32], strides = [1, 1]} : vector<8x96xf32> to vector<8x32xf32>
    %650 = vector.extract_strided_slice %647 {offsets = [0, 64], sizes = [8, 32], strides = [1, 1]} : vector<8x96xf32> to vector<8x32xf32>
    %651 = vector.extract_strided_slice %648 {offsets = [0, 0], sizes = [8, 8], strides = [1, 1]} : vector<8x32xf32> to vector<8x8xf32>
    %652 = vector.extract_strided_slice %649 {offsets = [0, 0], sizes = [8, 8], strides = [1, 1]} : vector<8x32xf32> to vector<8x8xf32>
    %cst_220 = arith.constant dense<0.000000e+00> : vector<8x8xf32>
    %653 = tpu.matmul %651, %652, %cst_220 {dimension_numbers = #tpu.dot_dimension_numbers<[1], [1], [0], [0], [0, 0, 1, 0], [], []>} : vector<8x8xf32>, vector<8x8xf32>, vector<8x8xf32> -> vector<8x8xf32>
    %cst_221 = arith.constant -1.000000e+30 : f32
    %654 = vector.broadcast %cst_221 : f32 to vector<8x8xf32>
    %655 = arith.select %327, %653, %654 : vector<8x8xi1>, vector<8x8xf32>
    %cst_222 = arith.constant dense<0xFF800000> : vector<8xf32>
    %656 = vector.multi_reduction <maximumf>, %655, %cst_222 [1] : vector<8x8xf32> to vector<8xf32>
    %657 = vector.shape_cast %656 : vector<8xf32> to vector<8x1xf32>
    %658 = vector.broadcast %657 : vector<8x1xf32> to vector<8x8xf32>
    %659 = arith.subf %655, %658 : vector<8x8xf32>
    %660 = math.exp %659 : vector<8x8xf32>
    %cst_223 = arith.constant dense<0.000000e+00> : vector<8xf32>
    %661 = vector.multi_reduction <add>, %660, %cst_223 [1] : vector<8x8xf32> to vector<8xf32>
    %662 = vector.shape_cast %661 : vector<8xf32> to vector<8x1xf32>
    %663 = tpu.reciprocal %662 {approx = true} : vector<8x1xf32> -> vector<8x1xf32>
    %664 = vector.broadcast %663 : vector<8x1xf32> to vector<8x8xf32>
    %665 = arith.mulf %660, %664 : vector<8x8xf32>
    %666 = vector.extract_strided_slice %650 {offsets = [0, 0], sizes = [8, 8], strides = [1, 1]} : vector<8x32xf32> to vector<8x8xf32>
    %cst_224 = arith.constant dense<0.000000e+00> : vector<8x8xf32>
    %667 = tpu.matmul %665, %666, %cst_224 {dimension_numbers = #tpu.dot_dimension_numbers<[1], [0], [0], [1], [0, 0, 1, 1], [], []>} : vector<8x8xf32>, vector<8x8xf32>, vector<8x8xf32> -> vector<8x8xf32>
    %668 = vector.extract_strided_slice %618 {offsets = [0, 0], sizes = [8, 32], strides = [1, 1]} : vector<32x32xbf16> to vector<8x32xbf16>
    %669 = arith.truncf %667 : vector<8x8xf32> to vector<8x8xbf16>
    %cst_225 = arith.constant dense<0.000000e+00> : vector<8x32xf32>
    %670 = tpu.matmul %669, %668, %cst_225 {dimension_numbers = #tpu.dot_dimension_numbers<[1], [0], [0], [1], [0, 0, 1, 1], [], []>} : vector<8x8xbf16>, vector<8x32xbf16>, vector<8x32xf32> -> vector<8x32xf32>
    %671 = vector.extract_strided_slice %648 {offsets = [0, 8], sizes = [8, 8], strides = [1, 1]} : vector<8x32xf32> to vector<8x8xf32>
    %672 = vector.extract_strided_slice %649 {offsets = [0, 8], sizes = [8, 8], strides = [1, 1]} : vector<8x32xf32> to vector<8x8xf32>
    %cst_226 = arith.constant dense<0.000000e+00> : vector<8x8xf32>
    %673 = tpu.matmul %671, %672, %cst_226 {dimension_numbers = #tpu.dot_dimension_numbers<[1], [1], [0], [0], [0, 0, 1, 0], [], []>} : vector<8x8xf32>, vector<8x8xf32>, vector<8x8xf32> -> vector<8x8xf32>
    %cst_227 = arith.constant -1.000000e+30 : f32
    %674 = vector.broadcast %cst_227 : f32 to vector<8x8xf32>
    %675 = arith.select %327, %673, %674 : vector<8x8xi1>, vector<8x8xf32>
    %cst_228 = arith.constant dense<0xFF800000> : vector<8xf32>
    %676 = vector.multi_reduction <maximumf>, %675, %cst_228 [1] : vector<8x8xf32> to vector<8xf32>
    %677 = vector.shape_cast %676 : vector<8xf32> to vector<8x1xf32>
    %678 = vector.broadcast %677 : vector<8x1xf32> to vector<8x8xf32>
    %679 = arith.subf %675, %678 : vector<8x8xf32>
    %680 = math.exp %679 : vector<8x8xf32>
    %cst_229 = arith.constant dense<0.000000e+00> : vector<8xf32>
    %681 = vector.multi_reduction <add>, %680, %cst_229 [1] : vector<8x8xf32> to vector<8xf32>
    %682 = vector.shape_cast %681 : vector<8xf32> to vector<8x1xf32>
    %683 = tpu.reciprocal %682 {approx = true} : vector<8x1xf32> -> vector<8x1xf32>
    %684 = vector.broadcast %683 : vector<8x1xf32> to vector<8x8xf32>
    %685 = arith.mulf %680, %684 : vector<8x8xf32>
    %686 = vector.extract_strided_slice %650 {offsets = [0, 8], sizes = [8, 8], strides = [1, 1]} : vector<8x32xf32> to vector<8x8xf32>
    %cst_230 = arith.constant dense<0.000000e+00> : vector<8x8xf32>
    %687 = tpu.matmul %685, %686, %cst_230 {dimension_numbers = #tpu.dot_dimension_numbers<[1], [0], [0], [1], [0, 0, 1, 1], [], []>} : vector<8x8xf32>, vector<8x8xf32>, vector<8x8xf32> -> vector<8x8xf32>
    %688 = vector.extract_strided_slice %618 {offsets = [8, 0], sizes = [8, 32], strides = [1, 1]} : vector<32x32xbf16> to vector<8x32xbf16>
    %689 = arith.truncf %687 : vector<8x8xf32> to vector<8x8xbf16>
    %cst_231 = arith.constant dense<0.000000e+00> : vector<8x32xf32>
    %690 = tpu.matmul %689, %688, %cst_231 {dimension_numbers = #tpu.dot_dimension_numbers<[1], [0], [0], [1], [0, 0, 1, 1], [], []>} : vector<8x8xbf16>, vector<8x32xbf16>, vector<8x32xf32> -> vector<8x32xf32>
    %691 = arith.addf %670, %690 : vector<8x32xf32>
    %692 = vector.extract_strided_slice %648 {offsets = [0, 16], sizes = [8, 8], strides = [1, 1]} : vector<8x32xf32> to vector<8x8xf32>
    %693 = vector.extract_strided_slice %649 {offsets = [0, 16], sizes = [8, 8], strides = [1, 1]} : vector<8x32xf32> to vector<8x8xf32>
    %cst_232 = arith.constant dense<0.000000e+00> : vector<8x8xf32>
    %694 = tpu.matmul %692, %693, %cst_232 {dimension_numbers = #tpu.dot_dimension_numbers<[1], [1], [0], [0], [0, 0, 1, 0], [], []>} : vector<8x8xf32>, vector<8x8xf32>, vector<8x8xf32> -> vector<8x8xf32>
    %cst_233 = arith.constant -1.000000e+30 : f32
    %695 = vector.broadcast %cst_233 : f32 to vector<8x8xf32>
    %696 = arith.select %327, %694, %695 : vector<8x8xi1>, vector<8x8xf32>
    %cst_234 = arith.constant dense<0xFF800000> : vector<8xf32>
    %697 = vector.multi_reduction <maximumf>, %696, %cst_234 [1] : vector<8x8xf32> to vector<8xf32>
    %698 = vector.shape_cast %697 : vector<8xf32> to vector<8x1xf32>
    %699 = vector.broadcast %698 : vector<8x1xf32> to vector<8x8xf32>
    %700 = arith.subf %696, %699 : vector<8x8xf32>
    %701 = math.exp %700 : vector<8x8xf32>
    %cst_235 = arith.constant dense<0.000000e+00> : vector<8xf32>
    %702 = vector.multi_reduction <add>, %701, %cst_235 [1] : vector<8x8xf32> to vector<8xf32>
    %703 = vector.shape_cast %702 : vector<8xf32> to vector<8x1xf32>
    %704 = tpu.reciprocal %703 {approx = true} : vector<8x1xf32> -> vector<8x1xf32>
    %705 = vector.broadcast %704 : vector<8x1xf32> to vector<8x8xf32>
    %706 = arith.mulf %701, %705 : vector<8x8xf32>
    %707 = vector.extract_strided_slice %650 {offsets = [0, 16], sizes = [8, 8], strides = [1, 1]} : vector<8x32xf32> to vector<8x8xf32>
    %cst_236 = arith.constant dense<0.000000e+00> : vector<8x8xf32>
    %708 = tpu.matmul %706, %707, %cst_236 {dimension_numbers = #tpu.dot_dimension_numbers<[1], [0], [0], [1], [0, 0, 1, 1], [], []>} : vector<8x8xf32>, vector<8x8xf32>, vector<8x8xf32> -> vector<8x8xf32>
    %709 = vector.extract_strided_slice %618 {offsets = [16, 0], sizes = [8, 32], strides = [1, 1]} : vector<32x32xbf16> to vector<8x32xbf16>
    %710 = arith.truncf %708 : vector<8x8xf32> to vector<8x8xbf16>
    %cst_237 = arith.constant dense<0.000000e+00> : vector<8x32xf32>
    %711 = tpu.matmul %710, %709, %cst_237 {dimension_numbers = #tpu.dot_dimension_numbers<[1], [0], [0], [1], [0, 0, 1, 1], [], []>} : vector<8x8xbf16>, vector<8x32xbf16>, vector<8x32xf32> -> vector<8x32xf32>
    %712 = arith.addf %691, %711 : vector<8x32xf32>
    %713 = vector.extract_strided_slice %648 {offsets = [0, 24], sizes = [8, 8], strides = [1, 1]} : vector<8x32xf32> to vector<8x8xf32>
    %714 = vector.extract_strided_slice %649 {offsets = [0, 24], sizes = [8, 8], strides = [1, 1]} : vector<8x32xf32> to vector<8x8xf32>
    %cst_238 = arith.constant dense<0.000000e+00> : vector<8x8xf32>
    %715 = tpu.matmul %713, %714, %cst_238 {dimension_numbers = #tpu.dot_dimension_numbers<[1], [1], [0], [0], [0, 0, 1, 0], [], []>} : vector<8x8xf32>, vector<8x8xf32>, vector<8x8xf32> -> vector<8x8xf32>
    %cst_239 = arith.constant -1.000000e+30 : f32
    %716 = vector.broadcast %cst_239 : f32 to vector<8x8xf32>
    %717 = arith.select %327, %715, %716 : vector<8x8xi1>, vector<8x8xf32>
    %cst_240 = arith.constant dense<0xFF800000> : vector<8xf32>
    %718 = vector.multi_reduction <maximumf>, %717, %cst_240 [1] : vector<8x8xf32> to vector<8xf32>
    %719 = vector.shape_cast %718 : vector<8xf32> to vector<8x1xf32>
    %720 = vector.broadcast %719 : vector<8x1xf32> to vector<8x8xf32>
    %721 = arith.subf %717, %720 : vector<8x8xf32>
    %722 = math.exp %721 : vector<8x8xf32>
    %cst_241 = arith.constant dense<0.000000e+00> : vector<8xf32>
    %723 = vector.multi_reduction <add>, %722, %cst_241 [1] : vector<8x8xf32> to vector<8xf32>
    %724 = vector.shape_cast %723 : vector<8xf32> to vector<8x1xf32>
    %725 = tpu.reciprocal %724 {approx = true} : vector<8x1xf32> -> vector<8x1xf32>
    %726 = vector.broadcast %725 : vector<8x1xf32> to vector<8x8xf32>
    %727 = arith.mulf %722, %726 : vector<8x8xf32>
    %728 = vector.extract_strided_slice %650 {offsets = [0, 24], sizes = [8, 8], strides = [1, 1]} : vector<8x32xf32> to vector<8x8xf32>
    %cst_242 = arith.constant dense<0.000000e+00> : vector<8x8xf32>
    %729 = tpu.matmul %727, %728, %cst_242 {dimension_numbers = #tpu.dot_dimension_numbers<[1], [0], [0], [1], [0, 0, 1, 1], [], []>} : vector<8x8xf32>, vector<8x8xf32>, vector<8x8xf32> -> vector<8x8xf32>
    %730 = vector.extract_strided_slice %618 {offsets = [24, 0], sizes = [8, 32], strides = [1, 1]} : vector<32x32xbf16> to vector<8x32xbf16>
    %731 = arith.truncf %729 : vector<8x8xf32> to vector<8x8xbf16>
    %cst_243 = arith.constant dense<0.000000e+00> : vector<8x32xf32>
    %732 = tpu.matmul %731, %730, %cst_243 {dimension_numbers = #tpu.dot_dimension_numbers<[1], [0], [0], [1], [0, 0, 1, 1], [], []>} : vector<8x8xbf16>, vector<8x32xbf16>, vector<8x32xf32> -> vector<8x32xf32>
    %733 = arith.addf %712, %732 : vector<8x32xf32>
    %734 = vector.broadcast %632 : vector<1x32xf32> to vector<8x32xf32>
    %735 = arith.addf %733, %734 : vector<8x32xf32>
    %736 = arith.addf %614, %735 : vector<8x32xf32>
    %cst_244 = arith.constant dense<0.000000e+00> : vector<8xf32>
    %737 = vector.multi_reduction <add>, %736, %cst_244 [1] : vector<8x32xf32> to vector<8xf32>
    %738 = vector.shape_cast %737 : vector<8xf32> to vector<8x1xf32>
    %cst_245 = arith.constant 3.200000e+01 : f32
    %739 = vector.broadcast %cst_245 : f32 to vector<8x1xf32>
    %740 = arith.divf %738, %739 : vector<8x1xf32>
    %741 = vector.broadcast %740 : vector<8x1xf32> to vector<8x32xf32>
    %742 = arith.subf %736, %741 : vector<8x32xf32>
    %743 = arith.mulf %742, %742 : vector<8x32xf32>
    %cst_246 = arith.constant dense<0.000000e+00> : vector<8xf32>
    %744 = vector.multi_reduction <add>, %743, %cst_246 [1] : vector<8x32xf32> to vector<8xf32>
    %745 = vector.shape_cast %744 : vector<8xf32> to vector<8x1xf32>
    %cst_247 = arith.constant 3.200000e+01 : f32
    %746 = vector.broadcast %cst_247 : f32 to vector<8x1xf32>
    %747 = arith.divf %745, %746 : vector<8x1xf32>
    %748 = vector.broadcast %740 : vector<8x1xf32> to vector<8x32xf32>
    %749 = arith.subf %736, %748 : vector<8x32xf32>
    %cst_248 = arith.constant 9.99999974E-6 : f32
    %750 = vector.broadcast %cst_248 : f32 to vector<8x1xf32>
    %751 = arith.addf %747, %750 : vector<8x1xf32>
    %752 = math.rsqrt %751 : vector<8x1xf32>
    %753 = vector.broadcast %752 : vector<8x1xf32> to vector<8x32xf32>
    %754 = arith.mulf %749, %753 : vector<8x32xf32>
    %755 = vector.broadcast %638 : vector<1x32xf32> to vector<8x32xf32>
    %756 = arith.mulf %754, %755 : vector<8x32xf32>
    %757 = vector.broadcast %639 : vector<1x32xf32> to vector<8x32xf32>
    %758 = arith.addf %756, %757 : vector<8x32xf32>
    %759 = arith.truncf %758 : vector<8x32xf32> to vector<8x32xbf16>
    %cst_249 = arith.constant dense<0.000000e+00> : vector<8x32xf32>
    %760 = tpu.matmul %759, %620, %cst_249 {dimension_numbers = #tpu.dot_dimension_numbers<[1], [0], [0], [1], [0, 0, 1, 1], [], []>} : vector<8x32xbf16>, vector<32x32xbf16>, vector<8x32xf32> -> vector<8x32xf32>
    %761 = vector.broadcast %633 : vector<1x32xf32> to vector<8x32xf32>
    %762 = arith.addf %760, %761 : vector<8x32xf32>
    %763 = arith.truncf %322 : vector<16x32xf32> to vector<16x32xbf16>
    %cst_250 = arith.constant dense<0.000000e+00> : vector<16x64xf32>
    %764 = tpu.matmul %763, %622, %cst_250 {dimension_numbers = #tpu.dot_dimension_numbers<[1], [0], [0], [1], [0, 0, 1, 1], [], []>} : vector<16x32xbf16>, vector<32x64xbf16>, vector<16x64xf32> -> vector<16x64xf32>
    %765 = vector.broadcast %634 : vector<1x64xf32> to vector<16x64xf32>
    %766 = arith.addf %764, %765 : vector<16x64xf32>
    %767 = vector.extract_strided_slice %766 {offsets = [0, 0], sizes = [16, 32], strides = [1, 1]} : vector<16x64xf32> to vector<16x32xf32>
    %768 = vector.extract_strided_slice %766 {offsets = [0, 32], sizes = [16, 32], strides = [1, 1]} : vector<16x64xf32> to vector<16x32xf32>
    %769 = vector.extract_strided_slice %762 {offsets = [0, 0], sizes = [8, 8], strides = [1, 1]} : vector<8x32xf32> to vector<8x8xf32>
    %770 = vector.extract_strided_slice %767 {offsets = [0, 0], sizes = [16, 8], strides = [1, 1]} : vector<16x32xf32> to vector<16x8xf32>
    %cst_251 = arith.constant dense<0.000000e+00> : vector<8x16xf32>
    %771 = tpu.matmul %769, %770, %cst_251 {dimension_numbers = #tpu.dot_dimension_numbers<[1], [1], [0], [0], [0, 0, 1, 0], [], []>} : vector<8x8xf32>, vector<16x8xf32>, vector<8x16xf32> -> vector<8x16xf32>
    %cst_252 = arith.constant dense<0xFF800000> : vector<8xf32>
    %772 = vector.multi_reduction <maximumf>, %771, %cst_252 [1] : vector<8x16xf32> to vector<8xf32>
    %773 = vector.shape_cast %772 : vector<8xf32> to vector<8x1xf32>
    %774 = vector.broadcast %773 : vector<8x1xf32> to vector<8x16xf32>
    %775 = arith.subf %771, %774 : vector<8x16xf32>
    %776 = math.exp %775 : vector<8x16xf32>
    %cst_253 = arith.constant dense<0.000000e+00> : vector<8xf32>
    %777 = vector.multi_reduction <add>, %776, %cst_253 [1] : vector<8x16xf32> to vector<8xf32>
    %778 = vector.shape_cast %777 : vector<8xf32> to vector<8x1xf32>
    %779 = tpu.reciprocal %778 {approx = true} : vector<8x1xf32> -> vector<8x1xf32>
    %780 = vector.broadcast %779 : vector<8x1xf32> to vector<8x16xf32>
    %781 = arith.mulf %776, %780 : vector<8x16xf32>
    %782 = vector.extract_strided_slice %768 {offsets = [0, 0], sizes = [16, 8], strides = [1, 1]} : vector<16x32xf32> to vector<16x8xf32>
    %cst_254 = arith.constant dense<0.000000e+00> : vector<8x8xf32>
    %783 = tpu.matmul %781, %782, %cst_254 {dimension_numbers = #tpu.dot_dimension_numbers<[1], [0], [0], [1], [0, 0, 1, 1], [], []>} : vector<8x16xf32>, vector<16x8xf32>, vector<8x8xf32> -> vector<8x8xf32>
    %784 = vector.extract_strided_slice %624 {offsets = [0, 0], sizes = [8, 32], strides = [1, 1]} : vector<32x32xbf16> to vector<8x32xbf16>
    %785 = arith.truncf %783 : vector<8x8xf32> to vector<8x8xbf16>
    %cst_255 = arith.constant dense<0.000000e+00> : vector<8x32xf32>
    %786 = tpu.matmul %785, %784, %cst_255 {dimension_numbers = #tpu.dot_dimension_numbers<[1], [0], [0], [1], [0, 0, 1, 1], [], []>} : vector<8x8xbf16>, vector<8x32xbf16>, vector<8x32xf32> -> vector<8x32xf32>
    %787 = vector.extract_strided_slice %762 {offsets = [0, 8], sizes = [8, 8], strides = [1, 1]} : vector<8x32xf32> to vector<8x8xf32>
    %788 = vector.extract_strided_slice %767 {offsets = [0, 8], sizes = [16, 8], strides = [1, 1]} : vector<16x32xf32> to vector<16x8xf32>
    %cst_256 = arith.constant dense<0.000000e+00> : vector<8x16xf32>
    %789 = tpu.matmul %787, %788, %cst_256 {dimension_numbers = #tpu.dot_dimension_numbers<[1], [1], [0], [0], [0, 0, 1, 0], [], []>} : vector<8x8xf32>, vector<16x8xf32>, vector<8x16xf32> -> vector<8x16xf32>
    %cst_257 = arith.constant dense<0xFF800000> : vector<8xf32>
    %790 = vector.multi_reduction <maximumf>, %789, %cst_257 [1] : vector<8x16xf32> to vector<8xf32>
    %791 = vector.shape_cast %790 : vector<8xf32> to vector<8x1xf32>
    %792 = vector.broadcast %791 : vector<8x1xf32> to vector<8x16xf32>
    %793 = arith.subf %789, %792 : vector<8x16xf32>
    %794 = math.exp %793 : vector<8x16xf32>
    %cst_258 = arith.constant dense<0.000000e+00> : vector<8xf32>
    %795 = vector.multi_reduction <add>, %794, %cst_258 [1] : vector<8x16xf32> to vector<8xf32>
    %796 = vector.shape_cast %795 : vector<8xf32> to vector<8x1xf32>
    %797 = tpu.reciprocal %796 {approx = true} : vector<8x1xf32> -> vector<8x1xf32>
    %798 = vector.broadcast %797 : vector<8x1xf32> to vector<8x16xf32>
    %799 = arith.mulf %794, %798 : vector<8x16xf32>
    %800 = vector.extract_strided_slice %768 {offsets = [0, 8], sizes = [16, 8], strides = [1, 1]} : vector<16x32xf32> to vector<16x8xf32>
    %cst_259 = arith.constant dense<0.000000e+00> : vector<8x8xf32>
    %801 = tpu.matmul %799, %800, %cst_259 {dimension_numbers = #tpu.dot_dimension_numbers<[1], [0], [0], [1], [0, 0, 1, 1], [], []>} : vector<8x16xf32>, vector<16x8xf32>, vector<8x8xf32> -> vector<8x8xf32>
    %802 = vector.extract_strided_slice %624 {offsets = [8, 0], sizes = [8, 32], strides = [1, 1]} : vector<32x32xbf16> to vector<8x32xbf16>
    %803 = arith.truncf %801 : vector<8x8xf32> to vector<8x8xbf16>
    %cst_260 = arith.constant dense<0.000000e+00> : vector<8x32xf32>
    %804 = tpu.matmul %803, %802, %cst_260 {dimension_numbers = #tpu.dot_dimension_numbers<[1], [0], [0], [1], [0, 0, 1, 1], [], []>} : vector<8x8xbf16>, vector<8x32xbf16>, vector<8x32xf32> -> vector<8x32xf32>
    %805 = arith.addf %786, %804 : vector<8x32xf32>
    %806 = vector.extract_strided_slice %762 {offsets = [0, 16], sizes = [8, 8], strides = [1, 1]} : vector<8x32xf32> to vector<8x8xf32>
    %807 = vector.extract_strided_slice %767 {offsets = [0, 16], sizes = [16, 8], strides = [1, 1]} : vector<16x32xf32> to vector<16x8xf32>
    %cst_261 = arith.constant dense<0.000000e+00> : vector<8x16xf32>
    %808 = tpu.matmul %806, %807, %cst_261 {dimension_numbers = #tpu.dot_dimension_numbers<[1], [1], [0], [0], [0, 0, 1, 0], [], []>} : vector<8x8xf32>, vector<16x8xf32>, vector<8x16xf32> -> vector<8x16xf32>
    %cst_262 = arith.constant dense<0xFF800000> : vector<8xf32>
    %809 = vector.multi_reduction <maximumf>, %808, %cst_262 [1] : vector<8x16xf32> to vector<8xf32>
    %810 = vector.shape_cast %809 : vector<8xf32> to vector<8x1xf32>
    %811 = vector.broadcast %810 : vector<8x1xf32> to vector<8x16xf32>
    %812 = arith.subf %808, %811 : vector<8x16xf32>
    %813 = math.exp %812 : vector<8x16xf32>
    %cst_263 = arith.constant dense<0.000000e+00> : vector<8xf32>
    %814 = vector.multi_reduction <add>, %813, %cst_263 [1] : vector<8x16xf32> to vector<8xf32>
    %815 = vector.shape_cast %814 : vector<8xf32> to vector<8x1xf32>
    %816 = tpu.reciprocal %815 {approx = true} : vector<8x1xf32> -> vector<8x1xf32>
    %817 = vector.broadcast %816 : vector<8x1xf32> to vector<8x16xf32>
    %818 = arith.mulf %813, %817 : vector<8x16xf32>
    %819 = vector.extract_strided_slice %768 {offsets = [0, 16], sizes = [16, 8], strides = [1, 1]} : vector<16x32xf32> to vector<16x8xf32>
    %cst_264 = arith.constant dense<0.000000e+00> : vector<8x8xf32>
    %820 = tpu.matmul %818, %819, %cst_264 {dimension_numbers = #tpu.dot_dimension_numbers<[1], [0], [0], [1], [0, 0, 1, 1], [], []>} : vector<8x16xf32>, vector<16x8xf32>, vector<8x8xf32> -> vector<8x8xf32>
    %821 = vector.extract_strided_slice %624 {offsets = [16, 0], sizes = [8, 32], strides = [1, 1]} : vector<32x32xbf16> to vector<8x32xbf16>
    %822 = arith.truncf %820 : vector<8x8xf32> to vector<8x8xbf16>
    %cst_265 = arith.constant dense<0.000000e+00> : vector<8x32xf32>
    %823 = tpu.matmul %822, %821, %cst_265 {dimension_numbers = #tpu.dot_dimension_numbers<[1], [0], [0], [1], [0, 0, 1, 1], [], []>} : vector<8x8xbf16>, vector<8x32xbf16>, vector<8x32xf32> -> vector<8x32xf32>
    %824 = arith.addf %805, %823 : vector<8x32xf32>
    %825 = vector.extract_strided_slice %762 {offsets = [0, 24], sizes = [8, 8], strides = [1, 1]} : vector<8x32xf32> to vector<8x8xf32>
    %826 = vector.extract_strided_slice %767 {offsets = [0, 24], sizes = [16, 8], strides = [1, 1]} : vector<16x32xf32> to vector<16x8xf32>
    %cst_266 = arith.constant dense<0.000000e+00> : vector<8x16xf32>
    %827 = tpu.matmul %825, %826, %cst_266 {dimension_numbers = #tpu.dot_dimension_numbers<[1], [1], [0], [0], [0, 0, 1, 0], [], []>} : vector<8x8xf32>, vector<16x8xf32>, vector<8x16xf32> -> vector<8x16xf32>
    %cst_267 = arith.constant dense<0xFF800000> : vector<8xf32>
    %828 = vector.multi_reduction <maximumf>, %827, %cst_267 [1] : vector<8x16xf32> to vector<8xf32>
    %829 = vector.shape_cast %828 : vector<8xf32> to vector<8x1xf32>
    %830 = vector.broadcast %829 : vector<8x1xf32> to vector<8x16xf32>
    %831 = arith.subf %827, %830 : vector<8x16xf32>
    %832 = math.exp %831 : vector<8x16xf32>
    %cst_268 = arith.constant dense<0.000000e+00> : vector<8xf32>
    %833 = vector.multi_reduction <add>, %832, %cst_268 [1] : vector<8x16xf32> to vector<8xf32>
    %834 = vector.shape_cast %833 : vector<8xf32> to vector<8x1xf32>
    %835 = tpu.reciprocal %834 {approx = true} : vector<8x1xf32> -> vector<8x1xf32>
    %836 = vector.broadcast %835 : vector<8x1xf32> to vector<8x16xf32>
    %837 = arith.mulf %832, %836 : vector<8x16xf32>
    %838 = vector.extract_strided_slice %768 {offsets = [0, 24], sizes = [16, 8], strides = [1, 1]} : vector<16x32xf32> to vector<16x8xf32>
    %cst_269 = arith.constant dense<0.000000e+00> : vector<8x8xf32>
    %839 = tpu.matmul %837, %838, %cst_269 {dimension_numbers = #tpu.dot_dimension_numbers<[1], [0], [0], [1], [0, 0, 1, 1], [], []>} : vector<8x16xf32>, vector<16x8xf32>, vector<8x8xf32> -> vector<8x8xf32>
    %840 = vector.extract_strided_slice %624 {offsets = [24, 0], sizes = [8, 32], strides = [1, 1]} : vector<32x32xbf16> to vector<8x32xbf16>
    %841 = arith.truncf %839 : vector<8x8xf32> to vector<8x8xbf16>
    %cst_270 = arith.constant dense<0.000000e+00> : vector<8x32xf32>
    %842 = tpu.matmul %841, %840, %cst_270 {dimension_numbers = #tpu.dot_dimension_numbers<[1], [0], [0], [1], [0, 0, 1, 1], [], []>} : vector<8x8xbf16>, vector<8x32xbf16>, vector<8x32xf32> -> vector<8x32xf32>
    %843 = arith.addf %824, %842 : vector<8x32xf32>
    %844 = vector.broadcast %635 : vector<1x32xf32> to vector<8x32xf32>
    %845 = arith.addf %843, %844 : vector<8x32xf32>
    %846 = arith.addf %758, %845 : vector<8x32xf32>
    %cst_271 = arith.constant dense<0.000000e+00> : vector<8xf32>
    %847 = vector.multi_reduction <add>, %846, %cst_271 [1] : vector<8x32xf32> to vector<8xf32>
    %848 = vector.shape_cast %847 : vector<8xf32> to vector<8x1xf32>
    %cst_272 = arith.constant 3.200000e+01 : f32
    %849 = vector.broadcast %cst_272 : f32 to vector<8x1xf32>
    %850 = arith.divf %848, %849 : vector<8x1xf32>
    %851 = vector.broadcast %850 : vector<8x1xf32> to vector<8x32xf32>
    %852 = arith.subf %846, %851 : vector<8x32xf32>
    %853 = arith.mulf %852, %852 : vector<8x32xf32>
    %cst_273 = arith.constant dense<0.000000e+00> : vector<8xf32>
    %854 = vector.multi_reduction <add>, %853, %cst_273 [1] : vector<8x32xf32> to vector<8xf32>
    %855 = vector.shape_cast %854 : vector<8xf32> to vector<8x1xf32>
    %cst_274 = arith.constant 3.200000e+01 : f32
    %856 = vector.broadcast %cst_274 : f32 to vector<8x1xf32>
    %857 = arith.divf %855, %856 : vector<8x1xf32>
    %858 = vector.broadcast %850 : vector<8x1xf32> to vector<8x32xf32>
    %859 = arith.subf %846, %858 : vector<8x32xf32>
    %cst_275 = arith.constant 9.99999974E-6 : f32
    %860 = vector.broadcast %cst_275 : f32 to vector<8x1xf32>
    %861 = arith.addf %857, %860 : vector<8x1xf32>
    %862 = math.rsqrt %861 : vector<8x1xf32>
    %863 = vector.broadcast %862 : vector<8x1xf32> to vector<8x32xf32>
    %864 = arith.mulf %859, %863 : vector<8x32xf32>
    %865 = vector.broadcast %640 : vector<1x32xf32> to vector<8x32xf32>
    %866 = arith.mulf %864, %865 : vector<8x32xf32>
    %867 = vector.broadcast %641 : vector<1x32xf32> to vector<8x32xf32>
    %868 = arith.addf %866, %867 : vector<8x32xf32>
    %869 = arith.truncf %868 : vector<8x32xf32> to vector<8x32xbf16>
    %cst_276 = arith.constant dense<0.000000e+00> : vector<8x64xf32>
    %870 = tpu.matmul %869, %626, %cst_276 {dimension_numbers = #tpu.dot_dimension_numbers<[1], [0], [0], [1], [0, 0, 1, 1], [], []>} : vector<8x32xbf16>, vector<32x64xbf16>, vector<8x64xf32> -> vector<8x64xf32>
    %871 = vector.broadcast %636 : vector<1x64xf32> to vector<8x64xf32>
    %872 = arith.addf %870, %871 : vector<8x64xf32>
    %cst_277 = arith.constant 0.000000e+00 : f32
    %873 = vector.broadcast %cst_277 : f32 to vector<8x64xf32>
    %874 = arith.maximumf %872, %873 : vector<8x64xf32>
    %875 = arith.truncf %874 : vector<8x64xf32> to vector<8x64xbf16>
    %cst_278 = arith.constant dense<0.000000e+00> : vector<8x32xf32>
    %876 = tpu.matmul %875, %628, %cst_278 {dimension_numbers = #tpu.dot_dimension_numbers<[1], [0], [0], [1], [0, 0, 1, 1], [], []>} : vector<8x64xbf16>, vector<64x32xbf16>, vector<8x32xf32> -> vector<8x32xf32>
    %877 = vector.broadcast %637 : vector<1x32xf32> to vector<8x32xf32>
    %878 = arith.addf %876, %877 : vector<8x32xf32>
    %879 = arith.addf %868, %878 : vector<8x32xf32>
    %cst_279 = arith.constant dense<0.000000e+00> : vector<8xf32>
    %880 = vector.multi_reduction <add>, %879, %cst_279 [1] : vector<8x32xf32> to vector<8xf32>
    %881 = vector.shape_cast %880 : vector<8xf32> to vector<8x1xf32>
    %cst_280 = arith.constant 3.200000e+01 : f32
    %882 = vector.broadcast %cst_280 : f32 to vector<8x1xf32>
    %883 = arith.divf %881, %882 : vector<8x1xf32>
    %884 = vector.broadcast %883 : vector<8x1xf32> to vector<8x32xf32>
    %885 = arith.subf %879, %884 : vector<8x32xf32>
    %886 = arith.mulf %885, %885 : vector<8x32xf32>
    %cst_281 = arith.constant dense<0.000000e+00> : vector<8xf32>
    %887 = vector.multi_reduction <add>, %886, %cst_281 [1] : vector<8x32xf32> to vector<8xf32>
    %888 = vector.shape_cast %887 : vector<8xf32> to vector<8x1xf32>
    %cst_282 = arith.constant 3.200000e+01 : f32
    %889 = vector.broadcast %cst_282 : f32 to vector<8x1xf32>
    %890 = arith.divf %888, %889 : vector<8x1xf32>
    %891 = vector.broadcast %883 : vector<8x1xf32> to vector<8x32xf32>
    %892 = arith.subf %879, %891 : vector<8x32xf32>
    %cst_283 = arith.constant 9.99999974E-6 : f32
    %893 = vector.broadcast %cst_283 : f32 to vector<8x1xf32>
    %894 = arith.addf %890, %893 : vector<8x1xf32>
    %895 = math.rsqrt %894 : vector<8x1xf32>
    %896 = vector.broadcast %895 : vector<8x1xf32> to vector<8x32xf32>
    %897 = arith.mulf %892, %896 : vector<8x32xf32>
    %898 = vector.broadcast %642 : vector<1x32xf32> to vector<8x32xf32>
    %899 = arith.mulf %897, %898 : vector<8x32xf32>
    %900 = vector.broadcast %643 : vector<1x32xf32> to vector<8x32xf32>
    %901 = arith.addf %899, %900 : vector<8x32xf32>
    %c0_284 = arith.constant 0 : index
    %c0_285 = arith.constant 0 : index
    %902 = vector.load %arg18[%c0_284, %c0_285] : memref<32x128xbf16, #tpu.memory_space<vmem>>, vector<32x128xbf16>
    %903 = arith.truncf %901 : vector<8x32xf32> to vector<8x32xbf16>
    %cst_286 = arith.constant dense<0.000000e+00> : vector<8x128xf32>
    %904 = tpu.matmul %903, %902, %cst_286 {dimension_numbers = #tpu.dot_dimension_numbers<[1], [0], [0], [1], [0, 0, 1, 1], [], []>} : vector<8x32xbf16>, vector<32x128xbf16>, vector<8x128xf32> -> vector<8x128xf32>
    %c0_287 = arith.constant 0 : index
    %c0_288 = arith.constant 0 : index
    %905 = vector.load %arg19[%c0_287, %c0_288] : memref<1x128xf32, #tpu.memory_space<vmem>>, vector<1x128xf32>
    %906 = vector.broadcast %905 : vector<1x128xf32> to vector<8x128xf32>
    %907 = arith.addf %904, %906 : vector<8x128xf32>
    %c0_289 = arith.constant 0 : index
    %c0_290 = arith.constant 0 : index
    %c0_291 = arith.constant 0 : index
    %908 = vector.load %arg20[%c0_289, %c0_290, %c0_291] : memref<1x8x128xf32, #tpu.memory_space<vmem>>, vector<1x8x128xf32>
    %909 = vector.shape_cast %908 : vector<1x8x128xf32> to vector<8x128xf32>
    %910 = vector.shape_cast %907 : vector<8x128xf32> to vector<1x8x128xf32>
    tpu.vector_store %arg20[%c0_289, %c0_290, %c0_291], %910 {strides = array<i32>} : memref<1x8x128xf32, #tpu.memory_space<vmem>>, vector<1x8x128xf32>,
    return
  }
  func.func @transform_0(%arg0: i32) -> (i32, i32, i32) {
    %c0_i32 = arith.constant 0 : i32
    %c0_i32_0 = arith.constant 0 : i32
    %c0_i32_1 = arith.constant 0 : i32
    return %arg0, %c0_i32, %c0_i32_0 : i32, i32, i32
  }
  func.func @transform_1(%arg0: i32) -> (i32, i32, i32) {
    %c0_i32 = arith.constant 0 : i32
    %c0_i32_0 = arith.constant 0 : i32
    %c0_i32_1 = arith.constant 0 : i32
    return %arg0, %c0_i32, %c0_i32_0 : i32, i32, i32
  }
  func.func @transform_2(%arg0: i32) -> (i32, i32) {
    %c0_i32 = arith.constant 0 : i32
    %c0_i32_0 = arith.constant 0 : i32
    %c0_i32_1 = arith.constant 0 : i32
    return %c0_i32, %c0_i32_0 : i32, i32
  }
  func.func @transform_3(%arg0: i32) -> (i32, i32) {
    %c0_i32 = arith.constant 0 : i32
    %c0_i32_0 = arith.constant 0 : i32
    %c0_i32_1 = arith.constant 0 : i32
    return %c0_i32, %c0_i32_0 : i32, i32
  }
  func.func @transform_4(%arg0: i32) -> (i32, i32, i32) {
    %c0_i32 = arith.constant 0 : i32
    %c0_i32_0 = arith.constant 0 : i32
    %c0_i32_1 = arith.constant 0 : i32
    %c0_i32_2 = arith.constant 0 : i32
    return %c0_i32, %c0_i32_0, %c0_i32_1 : i32, i32, i32
  }
  func.func @transform_5(%arg0: i32) -> (i32, i32, i32) {
    %c0_i32 = arith.constant 0 : i32
    %c0_i32_0 = arith.constant 0 : i32
    %c0_i32_1 = arith.constant 0 : i32
    %c0_i32_2 = arith.constant 0 : i32
    return %c0_i32, %c0_i32_0, %c0_i32_1 : i32, i32, i32
  }
  func.func @transform_6(%arg0: i32) -> (i32, i32, i32) {
    %c0_i32 = arith.constant 0 : i32
    %c0_i32_0 = arith.constant 0 : i32
    %c0_i32_1 = arith.constant 0 : i32
    %c0_i32_2 = arith.constant 0 : i32
    return %c0_i32, %c0_i32_0, %c0_i32_1 : i32, i32, i32
  }
  func.func @transform_7(%arg0: i32) -> (i32, i32, i32) {
    %c0_i32 = arith.constant 0 : i32
    %c0_i32_0 = arith.constant 0 : i32
    %c0_i32_1 = arith.constant 0 : i32
    %c0_i32_2 = arith.constant 0 : i32
    return %c0_i32, %c0_i32_0, %c0_i32_1 : i32, i32, i32
  }
  func.func @transform_8(%arg0: i32) -> (i32, i32, i32) {
    %c0_i32 = arith.constant 0 : i32
    %c0_i32_0 = arith.constant 0 : i32
    %c0_i32_1 = arith.constant 0 : i32
    %c0_i32_2 = arith.constant 0 : i32
    return %c0_i32, %c0_i32_0, %c0_i32_1 : i32, i32, i32
  }
  func.func @transform_9(%arg0: i32) -> (i32, i32, i32) {
    %c0_i32 = arith.constant 0 : i32
    %c0_i32_0 = arith.constant 0 : i32
    %c0_i32_1 = arith.constant 0 : i32
    %c0_i32_2 = arith.constant 0 : i32
    return %c0_i32, %c0_i32_0, %c0_i32_1 : i32, i32, i32
  }
  func.func @transform_10(%arg0: i32) -> (i32, i32, i32) {
    %c0_i32 = arith.constant 0 : i32
    %c0_i32_0 = arith.constant 0 : i32
    %c0_i32_1 = arith.constant 0 : i32
    %c0_i32_2 = arith.constant 0 : i32
    return %c0_i32, %c0_i32_0, %c0_i32_1 : i32, i32, i32
  }
  func.func @transform_11(%arg0: i32) -> (i32, i32, i32) {
    %c0_i32 = arith.constant 0 : i32
    %c0_i32_0 = arith.constant 0 : i32
    %c0_i32_1 = arith.constant 0 : i32
    %c0_i32_2 = arith.constant 0 : i32
    return %c0_i32, %c0_i32_0, %c0_i32_1 : i32, i32, i32
  }
  func.func @transform_12(%arg0: i32) -> (i32, i32, i32) {
    %c0_i32 = arith.constant 0 : i32
    %c0_i32_0 = arith.constant 0 : i32
    %c0_i32_1 = arith.constant 0 : i32
    %c0_i32_2 = arith.constant 0 : i32
    return %c0_i32, %c0_i32_0, %c0_i32_1 : i32, i32, i32
  }
  func.func @transform_13(%arg0: i32) -> (i32, i32, i32) {
    %c0_i32 = arith.constant 0 : i32
    %c0_i32_0 = arith.constant 0 : i32
    %c0_i32_1 = arith.constant 0 : i32
    %c0_i32_2 = arith.constant 0 : i32
    return %c0_i32, %c0_i32_0, %c0_i32_1 : i32, i32, i32
  }
  func.func @transform_14(%arg0: i32) -> (i32, i32, i32) {
    %c0_i32 = arith.constant 0 : i32
    %c0_i32_0 = arith.constant 0 : i32
    %c0_i32_1 = arith.constant 0 : i32
    %c0_i32_2 = arith.constant 0 : i32
    return %c0_i32, %c0_i32_0, %c0_i32_1 : i32, i32, i32
  }
  func.func @transform_15(%arg0: i32) -> (i32, i32, i32) {
    %c0_i32 = arith.constant 0 : i32
    %c0_i32_0 = arith.constant 0 : i32
    %c0_i32_1 = arith.constant 0 : i32
    %c0_i32_2 = arith.constant 0 : i32
    return %c0_i32, %c0_i32_0, %c0_i32_1 : i32, i32, i32
  }
  func.func @transform_16(%arg0: i32) -> (i32, i32, i32) {
    %c0_i32 = arith.constant 0 : i32
    %c0_i32_0 = arith.constant 0 : i32
    %c0_i32_1 = arith.constant 0 : i32
    %c0_i32_2 = arith.constant 0 : i32
    return %c0_i32, %c0_i32_0, %c0_i32_1 : i32, i32, i32
  }
  func.func @transform_17(%arg0: i32) -> (i32, i32) {
    %c0_i32 = arith.constant 0 : i32
    %c0_i32_0 = arith.constant 0 : i32
    %c0_i32_1 = arith.constant 0 : i32
    return %c0_i32, %c0_i32_0 : i32, i32
  }
  func.func @transform_18(%arg0: i32) -> (i32, i32) {
    %c0_i32 = arith.constant 0 : i32
    %c0_i32_0 = arith.constant 0 : i32
    %c0_i32_1 = arith.constant 0 : i32
    return %c0_i32, %c0_i32_0 : i32, i32
  }
  func.func @transform_19(%arg0: i32) -> (i32, i32, i32) {
    %c0_i32 = arith.constant 0 : i32
    %c0_i32_0 = arith.constant 0 : i32
    %c0_i32_1 = arith.constant 0 : i32
    return %arg0, %c0_i32, %c0_i32_0 : i32, i32, i32
  }
}

</mosaic_0001>

<bundles_post_ra>
// kernel: _lambda_.1
= control target key start
LH: loop header
LB: loop body
LE: loop exit
PB: predicated region body
PF: predicated region fallthrough
CT: control target
= control target key end

     0   :  { %s6843_s0 = inlined_call_operand.vmem [shape: f32[2,16,48], index: 0, kind: input, shape index: {}]   ;;  %s6844_s1 = inlined_call_operand.vmem [shape: f32[2,8,32], index: 1, kind: input, shape index: {}]   ;;  %s6845_s2 = inlined_call_operand.hbm [shape: bf16[48,32], index: 2, kind: input, shape index: {}]   ;;  %s6846_s3 = inlined_call_operand.hbm [shape: f32[16,32], index: 3, kind: input, shape index: {}]   ;;  %s6847_s4 = inlined_call_operand.hbm [shape: bf16[2,32,96], index: 4, kind: input, shape index: {}]   ;;  %s6848_s5 = inlined_call_operand.hbm [shape: bf16[2,32,32], index: 5, kind: input, shape index: {}]   ;;  %s6849_s6 = inlined_call_operand.hbm [shape: bf16[2,32,64], index: 6, kind: input, shape index: {}]   ;;  %s6850_s7 = inlined_call_operand.vmem [shape: bf16[2,64,32], index: 7, kind: input, shape index: {}]   ;;  %s6851_s8 = inlined_call_operand.hbm [shape: f32[2,8,96], index: 8, kind: input, shape index: {}]   ;;  %s6852_s9 = inlined_call_operand.hbm [shape: bf16[2,32,96], index: 9, kind: input, shape index: {}]   ;;  %s6853_s10 = inlined_call_operand.hbm [shape: bf16[2,32,32], index: 10, kind: input, shape index: {}]   ;;  %s6854_s11 = inlined_call_operand.hbm [shape: bf16[2,32,32], index: 11, kind: input, shape index: {}]   ;;  %s6855_s12 = inlined_call_operand.hbm [shape: bf16[2,32,64], index: 12, kind: input, shape index: {}]   ;;  %s6856_s13 = inlined_call_operand.hbm [shape: bf16[2,32,32], index: 13, kind: input, shape index: {}]   ;;  %s6857_s14 = inlined_call_operand.hbm [shape: bf16[2,32,64], index: 14, kind: input, shape index: {}]   ;;  %s6858_s15 = inlined_call_operand.vmem [shape: bf16[2,64,32], index: 15, kind: input, shape index: {}]   ;;  %s6859_s16 = inlined_call_operand.vmem [shape: f32[2,13,96], index: 16, kind: input, shape index: {}]   ;;  %s6860_s17 = inlined_call_operand.vmem [shape: bf16[32,128], index: 17, kind: input, shape index: {}]   ;;  %s6861_s18 = inlined_call_operand.vmem [shape: f32[1,128], index: 18, kind: input, shape index: {}]   ;;  %s6862_s19 = inlined_call_operand.hbm [shape: f32[2,8,128], index: 19, kind: output, shape index: {}]  }
   0x1   :  { %6876 = sst [smem:[#allocation39_spill]] %s6843_s0 }
   0x2   :  { %6877 = sst [smem:[#allocation40_spill]] %s6844_s1 }
   0x3   :  { %6878 = sst [smem:[#allocation41_spill]] %s6845_s2 }
   0x4   :  { %6879 = sst [smem:[#allocation42_spill]] %s6846_s3 }
   0x5   :  { %6880 = sst [smem:[#allocation43_spill]] %s6848_s5 }
   0x6   :  { %6881 = sst [smem:[#allocation44_spill]] %s6851_s8 }
   0x7   :  { %6882 = sst [smem:[#allocation45_spill]] %s6860_s17 }
   0x8   :  { %6883 = sst [smem:[#allocation46_spill]] %s6861_s18 }
   0x9   :  { %6884 = sst [smem:[#allocation47_spill]] %s6862_s19 }
   0xa   :  { %24 = vsyncpa [#allocation3], 0 }
   0xb   :  { %25 = vsyncpa [#allocation6], 0 }
   0xc   :  { %26 = vsyncpa [#allocation9], 0 }
   0xd   :  { %27 = vsyncpa [#allocation12], 0 }
   0xe   :  { %28 = vsyncpa [#allocation15], 0 }
   0xf   :  { %29 = vsyncpa [#allocation18], 0 }
  0x10   :  { %30 = vsyncpa [#allocation21], 0 }
  0x11   :  { %31 = vsyncpa [#allocation4], 0 }
  0x12   :  { %33 = vsyncpa [#allocation4 + $0x1], 0  ;;  %s5956_s0 = smov 0   ;;  %s5958_s30 = smov 0  }
  0x13   :  { %s5960_s20 = smov 0   ;;  %s5962_s21 = smov 0  }
  0x14 LB: > { %6885 = sst [smem:[#allocation31_spill]] %s5814_s0  ;;  %s5977_s1 = sadd.s32 4294967295, %s5826_s21   ;;  %s5826_s21 = sphi %s5962_s21, %s6914_s21   ;;  %s5822_s20 = sphi %s5960_s20, %s6917_s20   ;;  %s5818_s30 = sphi %s5958_s30, %s6916_s30   ;;  %s5814_s0 = sphi %s5956_s0, %s6915_s0  }
  0x15   : > { %6886 = sst [smem:[#allocation32_spill]] %s5818_s30  ;;  %s4534_s22 = sadd.s32 4294967294, %s5826_s21  }
  0x16   : > { %6887 = sst [smem:[#allocation33_spill]] %s5822_s20  ;;  %s5981_s2 = sadd.s32 1, %s5826_s21  }
  0x17   : > { %6888 = sst [smem:[#allocation34_spill]] %s5826_s21  ;;  %s455_s23 = sadd.s32 1, %s5822_s20 }
  0x18   : > { %6889 = sst [smem:[#allocation35_spill]] %s5981_s2  ;;  %s452_s24 = ssub.s32 %s5826_s21, %s5981_s2 }
  0x19   : > { %p465_p0 = scmp.ne.s32.totalorder %s5822_s20, %s5818_s30  ;;  %p453_p1 = scmp.eq.s32.totalorder %s452_s24, 0 }
  0x1a   : > { %p466_p2 = scmp.eq.s32.totalorder %s5977_s1, 1  ;;  %p471_p3 = scmp.ne.s32.totalorder %s5818_s30, %s5814_s0 }
  0x1b   : > { %p472_p4 = scmp.eq.s32.totalorder %s4534_s22, 1  ;;  %p4535_p7 = scmp.ge.s32.totalorder %s5826_s21, 1 }
  0x1c   : > { %s5992_s25 = scalar_select %p453_p1, %s5822_s20, %s455_s23  }
  0x1d   : > { %p5994_p5 = por %p466_p2, %p465_p0  ;;  %p5998_p6 = por %p472_p4, %p471_p3 }
  0x1e   : > { %6890 = sst [smem:[#allocation36_spill]] %s5992_s25  ;;  %p479_p8 = scmp.lt.s32.totalorder %s5826_s21, 3 }
  0x1f   : > { %s6891_s3 = scalar_select %p5994_p5, 1, 0 }
  0x20   : > { %s6893_s26 = scalar_select %p5998_p6, 1, 0 }
  0x21   : > { %6892 = sst [smem:[#allocation37_spill]] %s6891_s3  ;;  %p5051_p9 = scmp.eq.s32.totalorder %s5977_s1, 0 }
  0x22   : > { %6894 = sst [smem:[#allocation38_spill]] %s6893_s26  ;;  %p6005_p10 = pnand %p4535_p7, %p479_p8 }
  0x23   : > { %s6896_s22 = sld [smem:[#allocation42_spill]]  ;;  %s5828_s24 = smov [#allocation5]  }
  0x24   : > { %p5010_p11 = pneg %p6005_p10  ;;  %s506_s25 = sshll.u32 %s5828_s24, 4  ;;  %s507_s25 = int_to_ptr.vmem [resolvable:$true] %s506_s25 }
  0x25   : > { %s6898_s5 = sld [smem:[#allocation43_spill]]  ;;  %s5829_s28 = smov 128  }
  0x26   : > { %p6016_p12 = pnand %p5051_p9, %p5010_p11  ;;  %s5830_s29 = smov 8  }
  0x27   : > { %s6899_s8 = sld [smem:[#allocation44_spill]]  ;;  %s5832_s19 = smov 64  }
  0x28   : > { %s5833_s2 = smov 4   ;;  %s5835_s18 = smov [#allocation14]  }
  0x29   : > { %s504_s23 = sshll.u32 %s6896_s22, 4  ;;  %s5831_s22 = smov [#allocation8]   ;;  %s505_s23 = int_to_ptr.hbm [resolvable:$true] %s504_s23 }
  0x2a   : > { %5016 = dma.hbm_to_vmem [thread:$0]  (!%p6016_p12), %s505_s23, 256, %s507_s25, [#allocation6], %s5829_s28, %s5829_s28, %s5830_s29  }
  0x2b   : > { %s532_s0 = sshll.u32 %s6898_s5, 4  ;;  %s534_s24 = sshll.u32 %s5831_s22, 4  ;;  %s533_s0 = int_to_ptr.hbm [resolvable:$true] %s532_s0  ;;  %s535_s24 = int_to_ptr.vmem [resolvable:$true] %s534_s24 }
  0x2c   : > { %5022 = dma.hbm_to_vmem [thread:$0]  (!%p6016_p12), %s533_s0, 512, %s535_s24, [#allocation9], %s5832_s19, %s5832_s19, %s5833_s2  }
  0x2d   : > { %s563_s3 = sshll.u32 %s6899_s8, 4  ;;  %s591_s25 = sshll.u32 %s6853_s10, 4  ;;  %s564_s3 = int_to_ptr.hbm [resolvable:$true] %s563_s3  ;;  %s592_s25 = int_to_ptr.hbm [resolvable:$true] %s591_s25 }
  0x2e   : > { %s5834_s23 = smov [#allocation11]   ;;  %s593_s21 = sshll.u32 %s5835_s18, 4  ;;  %s594_s21 = int_to_ptr.vmem [resolvable:$true] %s593_s21 }
  0x2f   : > { %s565_s22 = sshll.u32 %s5834_s23, 4  ;;  %s619_s17 = sshll.u32 %s6855_s12, 4  ;;  %s566_s22 = int_to_ptr.vmem [resolvable:$true] %s565_s22  ;;  %s620_s17 = int_to_ptr.hbm [resolvable:$true] %s619_s17 }
  0x30   : > { %5028 = dma.hbm_to_vmem [thread:$0]  (!%p6016_p12), %s564_s3, 256, %s566_s22, [#allocation12], %s5829_s28, %s5829_s28, %s5830_s29  }
  0x31   : > { %5034 = dma.hbm_to_vmem [thread:$0]  (!%p6016_p12), %s592_s25, 512, %s594_s21, [#allocation15], %s5832_s19, %s5832_s19, %s5833_s2  }
  0x32   : > { %s6900_s24 = sld [smem:[#allocation41_spill]]  ;;  %s5836_s23 = smov [#allocation17]  }
  0x33   : > { %s621_s3 = sshll.u32 %s5836_s23, 4  ;;  %s5837_s8 = smov [#allocation2]   ;;  %s622_s3 = int_to_ptr.vmem [resolvable:$true] %s621_s3 }
  0x34   : > { %5040 = dma.hbm_to_vmem [thread:$0]  (!%p6016_p12), %s620_s17, 512, %s622_s3, [#allocation18], %s5832_s19, %s5832_s19, %s5833_s2  }
  0x35   : > { %s492_s30 = sshll.u32 %s5837_s8, 4  ;;  %s518_s25 = sshll.u32 %s6847_s4, 4  ;;  %s493_s30 = int_to_ptr.vmem [resolvable:$true] %s492_s30  ;;  %s519_s25 = int_to_ptr.hbm [resolvable:$true] %s518_s25 }
  0x36   : > { %s546_s21 = sshll.u32 %s6849_s6, 4  ;;  %s5838_s5 = smov [#allocation7]   ;;  %s547_s21 = int_to_ptr.hbm [resolvable:$true] %s546_s21 }
  0x37   : > { %s520_s17 = sshll.u32 %s5838_s5, 4  ;;  %s5839_s0 = smov [#allocation10]   ;;  %s521_s17 = int_to_ptr.vmem [resolvable:$true] %s520_s17 }
  0x38   : > { %s490_s26 = sshll.u32 %s6900_s24, 4  ;;  %s548_s24 = sshll.u32 %s5839_s0, 4  ;;  %s491_s26 = int_to_ptr.hbm [resolvable:$true] %s490_s26  ;;  %s549_s24 = int_to_ptr.vmem [resolvable:$true] %s548_s24 }
  0x39   : > { %5013 = dma.hbm_to_vmem [thread:$0]  (!%p6016_p12), %s491_s26, 384, %s493_s30, [#allocation3], %s5832_s19, %s5832_s19, %s5833_s2  }
  0x3a   : > { %5019 = dma.hbm_to_vmem [thread:$0]  (!%p6016_p12), %s519_s25, 512, %s521_s17, [#allocation6], %s5832_s19, %s5832_s19, %s5833_s2  }
  0x3b   : > { %s577_s26 = sshll.u32 %s6852_s9, 4  ;;  %s605_s28 = sshll.u32 %s6854_s11, 4  ;;  %s578_s26 = int_to_ptr.hbm [resolvable:$true] %s577_s26  ;;  %s606_s28 = int_to_ptr.hbm [resolvable:$true] %s605_s28 }
  0x3c   : > { %5025 = dma.hbm_to_vmem [thread:$0]  (!%p6016_p12), %s547_s21, 512, %s549_s24, [#allocation9], %s5832_s19, %s5832_s19, %s5833_s2  }
  0x3d   : > { %s5840_s29 = smov [#allocation13]   ;;  %s5841_s22 = smov [#allocation16]  }
  0x3e   : > { %s579_s25 = sshll.u32 %s5840_s29, 4  ;;  %s607_s18 = sshll.u32 %s5841_s22, 4  ;;  %s580_s25 = int_to_ptr.vmem [resolvable:$true] %s579_s25  ;;  %s608_s18 = int_to_ptr.vmem [resolvable:$true] %s607_s18 }
  0x3f   : > { %5031 = dma.hbm_to_vmem [thread:$0]  (!%p6016_p12), %s578_s26, 512, %s580_s25, [#allocation12], %s5832_s19, %s5832_s19, %s5833_s2  }
  0x40   : > { %s633_s21 = sshll.u32 %s6856_s13, 4  ;;  %s647_s23 = sshll.u32 %s6857_s14, 4  ;;  %s634_s21 = int_to_ptr.hbm [resolvable:$true] %s633_s21  ;;  %s648_s23 = int_to_ptr.hbm [resolvable:$true] %s647_s23 }
  0x41   : > { %5037 = dma.hbm_to_vmem [thread:$0]  (!%p6016_p12), %s606_s28, 512, %s608_s18, [#allocation15], %s5832_s19, %s5832_s19, %s5833_s2  }
  0x42   : > { %s5842_s3 = smov [#allocation19]   ;;  %s5843_s8 = smov [#allocation20]  }
  0x43   : > { %s635_s26 = sshll.u32 %s5842_s3, 4  ;;  %s649_s30 = sshll.u32 %s5843_s8, 4  ;;  %s636_s26 = int_to_ptr.vmem [resolvable:$true] %s635_s26  ;;  %s650_s30 = int_to_ptr.vmem [resolvable:$true] %s649_s30 }
  0x44   : > { %5043 = dma.hbm_to_vmem [thread:$0]  (!%p6016_p12), %s634_s21, 512, %s636_s26, [#allocation18], %s5832_s19, %s5832_s19, %s5833_s2  }
  0x45   : > { %5046 = dma.hbm_to_vmem [thread:$0]  (!%p6016_p12), %s648_s23, 512, %s650_s30, [#allocation21], %s5832_s19, %s5832_s19, %s5833_s2  }
  0x46   : > { %692 = sbr.rel (%p6005_p10) target bundleno = 11684 (0x2da4), region = 96 }
  0x4b   : > { %5781 = dma.done.wait (%p5051_p9), [#allocation3], 384  }
  0x4c   : > { %5783 = vsyncadd (%p5051_p9), [#allocation3], 4294966912 }
  0x4d   : > { %5785 = dma.done.wait (%p5051_p9), [#allocation6], 768  }
  0x4e   : > { %5787 = vsyncadd (%p5051_p9), [#allocation6], 4294966528 }
  0x4f   : > { %5789 = dma.done.wait (%p5051_p9), [#allocation9], 1024  }
  0x50   : > { %5791 = vsyncadd (%p5051_p9), [#allocation9], 4294966272 }
  0x51   : > { %5793 = dma.done.wait (%p5051_p9), [#allocation12], 768  }
  0x52   : > { %5795 = vsyncadd (%p5051_p9), [#allocation12], 4294966528 }
  0x53   : > { %5797 = dma.done.wait (%p5051_p9), [#allocation15], 1024  }
  0x54   : > { %5799 = vsyncadd (%p5051_p9), [#allocation15], 4294966272 }
  0x55   : > { %5801 = dma.done.wait (%p5051_p9), [#allocation18], 1024  }
  0x56   : > { %5803 = vsyncadd (%p5051_p9), [#allocation18], 4294966272 }
  0x57   : > { %5805 = dma.done.wait (%p5051_p9), [#allocation21], 512  }
  0x58   : > { %5807 = vsyncadd (%p5051_p9), [#allocation21], 4294966784  ;;  %p808_p13 = scmp.lt.s32.totalorder %s5977_s1, 1  ;;  %v4917_v0 = vld [vmem:[#allocation2 + $0x10] sm:$0xff]  ;;  %v4916_v1 = vld [vmem:[#allocation2 + $0x8] sm:$0xff]  ;;  %s6901_s28 = sld [smem:[#allocation39_spill]] }
  0x59   : > { %856 = vmatpush.bf16.msra.mxu0 %v4917_v0  ;;  %v4915_v2 = vld [vmem:[#allocation2] sm:$0xff]  ;;  %vm847_vm0 = vcmask 392192   ;;  %v4919_v6 = vld [vmem:[#allocation7 + $0x8] sm:$0xff]  ;;  %v4918_v7 = vld [vmem:[#allocation7] sm:$0xff]  ;;  %vm900_vm1 = vcmask 261120   ;;  %s5844_s25 = smov 96  }
  0x5a   : > { %s6139_s19 = scalar_select %p808_p13, %s5977_s1, 1  ;;  %910 = vmatpush.bf16.msra.mxu1 %v4919_v6  ;;  %v827_v9 = vld [vmem:[#allocation5] sm:$0xff]  ;;  %v828_v10 = vld [vmem:[#allocation5 + $0x8] sm:$0xff]  ;;  %v6152_v16 = vld [vmem:[#allocation11] sm:$0xff]  ;;  %vm924_vm2 = vcmask 64512   ;;  %vm956_vm3 = vcmask 130048  }
  0x5b   : > { %v887_v17 = vperm.slane %v6152_v16, 0  ;;  %s5845_s22 = smov 88   ;;  %s5846_s18 = smov 120   ;;  %v869_v37 = vld [vmem:[#allocation8] sm:$0xf]  ;;  %vm1115_vm4 = vcmask 1043456  }
  0x5c   : > { %s4914_s20 = sshll.u32 %s6139_s19, 4  ;;  %s5847_s5 = smov 80   ;;  %v1137_v38 = vsel %vm1115_vm4, %v869_v37, 0  ;;  %vm1512_vm12 = vcmask 523264  }
  0x5d   : > { %857 = vmatpush.bf16.msra.mxu0 %v4916_v1  ;;  %s5848_s17 = smov 72   ;;  %s5849_s21 = smov 104  }
  0x5e   : > { %s812_s29 = scalar_lea.vmem %s6901_s28, %s4914_s20  ;;  %911 = vmatpush.bf16.msra.mxu1 %v4918_v7  ;;  %s5850_s0 = smov 64  }
  0x5f   : > { %v818_v3 = vld [vmem:[%s812_s29] sm:$0xff]  ;;  %v819_v4 = vld [vmem:[%s812_s29 + $0x8] sm:$0xff]  ;;  %s5851_s24 = smov 112   ;;  %s5852_s23 = smov 56  }
  0x60   : > { %v826_v5 = vpack.c.bf16 %v819_v4, %v818_v3  ;;  %s6874_s3 = smov 40   ;;  %s5854_s26 = smov 48  }
  0x61   : > { %858 = vmatpush.bf16.msra.mxu0 %v4915_v2  ;;  %s4565_s8 = sshll.u32 %s6139_s19, 3  ;;  %s6903_s27 = sld [smem:[#allocation40_spill]] }
  0x62   : > { %s6907_s29 = sld [smem:[#allocation32_spill]]  ;;  %s4911_s30 = sshll.u32 %s5977_s1, 3 }
  0x64   : > { %4578 = vmatmul.msk.bf16.vlgmr.msra.gmra.mxu0 %vm847_vm0, %v826_v5 }
  0x65   : > { %1146 = vmatpush.bf16.msrb.mxu0 %v1137_v38 }
  0x67   : > { %s816_s2 = scalar_lea.vmem %s6903_s27, %s4565_s8 }
  0x68   : > { %s805_s8 = sand.u32 1, %s6907_s29  }
  0x69   : > { %s4562_s20 = sshll.u32 %s805_s8, 3  ;;  %s4331_s27 = scalar_lea.sflag [#allocation4], %s805_s8 }
  0xe1   : > { %v860_v8 = vpop.f32.mrf.mxu0 }
  0xe2   : > { %v6145_v12 = vadd.f32 %v860_v8, %v827_v9 }
  0xe9   : > { %v862_v11 = vpop.f32.mrf.mxu0 }
  0xea   : > { %v6147_v13 = vadd.f32 %v862_v11, %v828_v10 }
  0xec   : > { %v886_v14 = vpack.c.bf16 %v6147_v13, %v6145_v12 }
  0xee   : > { %4587 = vmatmul.msk.bf16.vlgmr.msra.gmra.mxu1 %vm900_vm1, %v886_v14 }
 0x16b   : > { %v913_v15 = vpop.f32.mrf.mxu1 }
 0x16c   : > { %v914_v20 = vadd.f32 %v913_v15, %v887_v17 }
 0x173   : > { %v915_v18 = vpop.f32.mrf.mxu1 }
 0x174   : > { %v916_v19 = vadd.f32 %v915_v18, %v887_v17 }
 0x176   : > { %922 = vrot.lane.b32.xlu0 %v916_v19, %s5844_s25  ;;  %v6171_v40 = vpack.i.bf16 %v914_v20, %v916_v19 }
 0x17e   : > { %920 = vrot.lane.b32.xlu0 %v914_v20, %s5844_s25 }
 0x1e8   : > { %v923_v21 = vpop.permute.xlu0 %922 }
 0x1e9   : > { %4588 = vmatpush.xpose.msk.msra.mxu2 %vm924_vm2, %v923_v21 }
 0x1f0   : > { %v921_v22 = vpop.permute.xlu0 %920 }
 0x1f1   : > { %4589 = vmatpush.xpose.msk.msra.mxu2 %vm924_vm2, %v921_v22 }
 0x1f4   : > { %4590 = vmatmul.msk.f32.vlgmr.msra.gmra.mxu2 %vm924_vm2, %v914_v20 }
 0x1fc   : > { %4591 = vmatmul.msk.f32.gmra.mxu2 %vm924_vm2, %v916_v19 }
 0x277   : > { %v950_v23 = vpop.f32.mrf.mxu2 }
 0x278   : > { %v957_v24 = vsel %vm956_vm3, %v950_v23, -inf }
 0x279   : > { %958 = vmax.xlane.f32.xlu1 %v957_v24 }
 0x27f   : > { %v953_v25 = vpop.f32.mrf.mxu2 }
 0x280   : > { %v960_v26 = vsel %vm956_vm3, %v953_v25, -inf }
 0x281   : > { %961 = vmax.xlane.f32.xlu1 %v960_v26 }
 0x29a   : > { %1021 = vrot.lane.b32.xlu1 %v916_v19, %s5845_s22 }
 0x2a2   : > { %1017 = vrot.lane.b32.xlu1 %v916_v19, %s5846_s18 }
 0x2aa   : > { %1157 = vrot.lane.b32.xlu1 %v914_v20, %s5847_s5 }
 0x2b2   : > { %1278 = vrot.lane.b32.xlu1 %v916_v19, %s5848_s17 }
 0x2ba   : > { %1272 = vrot.lane.b32.xlu1 %v914_v20, %s5849_s21 }
 0x2ec   : > { %v959_v27 = vpop.xlane.xlu1 %958 }
 0x2ed   : > { %v963_v28 = vsub.f32 %v950_v23, %v959_v27 }
 0x2ef   : > { %v965_v29 = vmul.f32 1.442695, %v963_v28 }
 0x2f1   : > { %5217 = vpow2.f32 %v965_v29 }
 0x2f4   : > { %v962_v30 = vpop.xlane.xlu1 %961 }
 0x2f5   : > { %v964_v31 = vsub.f32 %v953_v25, %v962_v30 }
 0x2f7   : > { %v5218_v32 = vpop.eup %5217  ;;  %v967_v33 = vmul.f32 1.442695, %v964_v31 }
 0x2f8   : > { %v969_v34 = vsel %vm956_vm3, %v5218_v32, 0.0 }
 0x2f9   : > { %5219 = vpow2.f32 %v967_v33  ;;  %970 = vadd.xlane.f32.xlu2 %v969_v34 }
 0x2ff   : > { %v5220_v35 = vpop.eup %5219 }
 0x300   : > { %v972_v36 = vsel %vm956_vm3, %v5220_v35, 0.0 }
 0x301   : > { %973 = vadd.xlane.f32.xlu0 %v972_v36 }
 0x30c   : > { %v1022_v39 = vpop.permute.xlu1 %1021 }
 0x311   : > { %5137 = vrot.lane.b32.xlu2 %v6171_v40, %s5850_s0 }
 0x314   : > { %v1018_v41 = vpop.permute.xlu1 %1017 }
 0x315   : > { %1276 = vrot.lane.b32.xlu0 %v914_v20, %s5848_s17 }
 0x319   : > { %1019 = vrot.lane.b32.xlu2 %v914_v20, %s5845_s22 }
 0x31c   : > { %v1158_v42 = vpop.permute.xlu1 %1157 }
 0x321   : > { %1015 = vrot.lane.b32.xlu2 %v914_v20, %s5846_s18 }
 0x324   : > { %v1279_v43 = vpop.permute.xlu1 %1278 }
 0x325   : > { %4609 = vmatpush.xpose.msk.msra.mxu0 %vm924_vm2, %v1279_v43 }
 0x329   : > { %1159 = vrot.lane.b32.xlu2 %v916_v19, %s5847_s5 }
 0x32c   : > { %v1273_v2 = vpop.permute.xlu1 %1272 }
 0x331   : > { %1153 = vrot.lane.b32.xlu2 %v914_v20, %s5851_s24 }
 0x339   : > { %1155 = vrot.lane.b32.xlu2 %v916_v19, %s5851_s24 }
 0x341   : > { %1274 = vrot.lane.b32.xlu2 %v916_v19, %s5849_s21 }
 0x36c   : > { %v971_v44 = vpop.xlane.xlu2 %970 }
 0x36d   : > { %5221 = vrcp.f32 %v971_v44 }
 0x373   : > { %v5222_v47 = vpop.eup %5221 }
 0x374   : > { %v5138_v45 = vpop.permute.xlu2 %5137  ;;  %v974_v46 = vpop.xlane.xlu0 %973  ;;  %v977_v50 = vmul.f32 %v5222_v47, %v5218_v32 }
 0x375   : > { %v5139_v48 = vunpack.i.l.bf16 %v5138_v45  ;;  %5223 = vrcp.f32 %v974_v46  ;;  %v5140_v49 = vunpack.i.h.bf16 %v5138_v45 }
 0x377   : > { %1005 = vmatpush.msra.mxu3 %v5139_v48 }
 0x379   : > { %1006 = vmatpush.msra.mxu3 %v5140_v49 }
 0x37a   : > { %4592 = vmatmul.msk.f32.vlgmr.msra.gmra.mxu3 %vm956_vm3, %v977_v50 }
 0x37b   : > { %4594 = vmatpush.xpose.msk.msrb.mxu3 %vm924_vm2, %v1022_v39  ;;  %v5224_v52 = vpop.eup %5223 }
 0x37c   : > { %v1020_v51 = vpop.permute.xlu2 %1019  ;;  %v978_v53 = vmul.f32 %v5224_v52, %v5220_v35 }
 0x37f   : > { %4595 = vmatpush.xpose.msk.msrb.mxu3 %vm924_vm2, %v1020_v51 }
 0x382   : > { %4593 = vmatmul.msk.f32.gmra.mxu3 %vm956_vm3, %v978_v53 }
 0x384   : > { %v1016_v54 = vpop.permute.xlu2 %1015 }
 0x387   : > { %v1277_v55 = vpop.permute.xlu0 %1276 }
 0x388   : > { %4610 = vmatpush.xpose.msk.msra.mxu0 %vm924_vm2, %v1277_v55 }
 0x38a   : > { %4596 = vmatmul.msk.f32.vlgmr.msrb.gmra.mxu3 %vm924_vm2, %v1016_v54 }
 0x38c   : > { %v1160_v56 = vpop.permute.xlu2 %1159 }
 0x38d   : > { %4602 = vmatpush.xpose.msk.msra.mxu3 %vm924_vm2, %v1160_v56 }
 0x391   : > { %4603 = vmatpush.xpose.msk.msra.mxu3 %vm924_vm2, %v1158_v42 }
 0x392   : > { %4597 = vmatmul.msk.f32.gmra.mxu3 %vm924_vm2, %v1018_v41 }
 0x394   : > { %v1154_v57 = vpop.permute.xlu2 %1153 }
 0x39a   : > { %4604 = vmatmul.msk.f32.vlgmr.msra.gmra.mxu3 %vm924_vm2, %v1154_v57 }
 0x39c   : > { %v1156_v58 = vpop.permute.xlu2 %1155 }
 0x3a2   : > { %4605 = vmatmul.msk.f32.gmra.mxu3 %vm924_vm2, %v1156_v58 }
 0x3a4   : > { %v1275_v5 = vpop.permute.xlu2 %1274 }
 0x3fd   : > { %v1008_v59 = vpop.f32.mrf.mxu3 }
 0x405   : > { %v1011_v60 = vpop.f32.mrf.mxu3 }
 0x406   : > { %v1014_v61 = vpack.c.bf16 %v1011_v60, %v1008_v59 }
 0x408   : > { %4601 = vmatmul.msk.bf16.vlgmr.msrb.gmra.mxu0 %vm924_vm2, %v1014_v61 }
 0x40d   : > { %v1048_v62 = vpop.f32.mrf.mxu3 }
 0x40e   : > { %v1054_v63 = vsel %vm956_vm3, %v1048_v62, -inf }
 0x40f   : > { %1055 = vmax.xlane.f32.xlu1 %v1054_v63 }
 0x415   : > { %v1051_v0 = vpop.f32.mrf.mxu3 }
 0x416   : > { %v1057_v1 = vsel %vm956_vm3, %v1051_v0, -inf }
 0x417   : > { %1058 = vmax.xlane.f32.xlu0 %v1057_v1 }
 0x418   : > { %4611 = vmatmul.msk.f32.vlgmr.msra.gmra.mxu0 %vm924_vm2, %v1273_v2 }
 0x41d   : > { %v1186_v3 = vpop.f32.mrf.mxu3 }
 0x41e   : > { %v1192_v4 = vsel %vm956_vm3, %v1186_v3, -inf }
 0x41f   : > { %1193 = vmax.xlane.f32.xlu2 %v1192_v4  ;;  %v870_v4 = vld [vmem:[#allocation8 + $0x4] sm:$0xf] }
 0x420   : > { %4612 = vmatmul.msk.f32.gmra.mxu0 %vm924_vm2, %v1275_v5  ;;  %v1117_v5 = vsel %vm1115_vm4, %v870_v4, 0 }
 0x421   : > { %1126 = vmatpush.bf16.msrb.mxu2 %v1117_v5 }
 0x425   : > { %v1189_v6 = vpop.f32.mrf.mxu3 }
 0x426   : > { %v1195_v7 = vsel %vm956_vm3, %v1189_v6, -inf }
 0x427   : > { %1196 = vmax.xlane.f32.xlu0 %v1195_v7 }
 0x43b   : > { %5142 = vrot.lane.b32.xlu0 %v6171_v40, %s5852_s23 }
 0x443   : > { %5152 = vrot.lane.b32.xlu0 %v6171_v40, %s6874_s3  ;;  %s6902_s3 = smov 40  }
 0x482   : > { %v1056_v9 = vpop.xlane.xlu1 %1055 }
 0x483   : > { %v1060_v10 = vsub.f32 %v1048_v62, %v1056_v9 }
 0x485   : > { %v6205_v8 = vpop.f32.mrf.mxu0  ;;  %v1062_v14 = vmul.f32 1.442695, %v1060_v10 }
 0x487   : > { %5225 = vpow2.f32 %v1062_v14 }
 0x48a   : > { %v1059_v15 = vpop.xlane.xlu0 %1058 }
 0x48b   : > { %v1061_v18 = vsub.f32 %v1051_v0, %v1059_v15 }
 0x48d   : > { %v6207_v11 = vpop.f32.mrf.mxu0  ;;  %v1064_v22 = vmul.f32 1.442695, %v1061_v18  ;;  %v5226_v25 = vpop.eup %5225  ;;  %v871_v18 = vld [vmem:[#allocation8 + $0x8] sm:$0xf] }
 0x48e   : > { %v1066_v29 = vsel %vm956_vm3, %v5226_v25, 0.0 }
 0x48f   : > { %5227 = vpow2.f32 %v1064_v22 }
 0x492   : > { %v1194_v17 = vpop.xlane.xlu2 %1193 }
 0x493   : > { %v1198_v19 = vsub.f32 %v1186_v3, %v1194_v17 }
 0x495   : > { %v1305_v20 = vpop.f32.mrf.mxu0  ;;  %v1200_v23 = vmul.f32 1.442695, %v1198_v19  ;;  %v5228_v31 = vpop.eup %5227  ;;  %v1254_v19 = vsel %vm1115_vm4, %v871_v18, 0 }
 0x496   : > { %v1311_v21 = vsel %vm956_vm3, %v1305_v20, -inf  ;;  %v1069_v33 = vsel %vm956_vm3, %v5228_v31, 0.0  ;;  %1263 = vmatpush.bf16.msra.mxu2 %v1254_v19 }
 0x497   : > { %1312 = vmax.xlane.f32.xlu1 %v1311_v21  ;;  %5229 = vpow2.f32 %v1200_v23 }
 0x49a   : > { %v1197_v24 = vpop.xlane.xlu0 %1196 }
 0x49b   : > { %v1199_v26 = vsub.f32 %v1189_v6, %v1197_v24 }
 0x49d   : > { %v1308_v27 = vpop.f32.mrf.mxu0  ;;  %v1202_v30 = vmul.f32 1.442695, %v1199_v26  ;;  %v5230_v32 = vpop.eup %5229 }
 0x49e   : > { %v1314_v28 = vsel %vm956_vm3, %v1308_v27, -inf  ;;  %v1204_v34 = vsel %vm956_vm3, %v5230_v32, 0.0 }
 0x49f   : > { %1315 = vmax.xlane.f32.xlu2 %v1314_v28  ;;  %1067 = vadd.xlane.f32.xlu1 %v1066_v29  ;;  %5231 = vpow2.f32 %v1202_v30 }
 0x4a5   : > { %v5232_v35 = vpop.eup %5231 }
 0x4a6   : > { %v1207_v37 = vsel %vm956_vm3, %v5232_v35, 0.0 }
 0x4a7   : > { %1070 = vadd.xlane.f32.xlu2 %v1069_v33  ;;  %1205 = vadd.xlane.f32.xlu1 %v1204_v34 }
 0x4ad   : > { %v5143_v36 = vpop.permute.xlu0 %5142 }
 0x4ae   : > { %v5144_v38 = vunpack.i.l.bf16 %v5143_v36  ;;  %v5145_v39 = vunpack.i.h.bf16 %v5143_v36 }
 0x4af   : > { %1208 = vadd.xlane.f32.xlu2 %v1207_v37 }
 0x4b0   : > { %1102 = vmatpush.msrb.mxu1 %v5144_v38 }
 0x4b2   : > { %1103 = vmatpush.msrb.mxu1 %v5145_v39 }
 0x4b5   : > { %v5153_v41 = vpop.permute.xlu0 %5152 }
 0x4b6   : > { %v5154_v42 = vunpack.i.l.bf16 %v5153_v41  ;;  %v5155_v43 = vunpack.i.h.bf16 %v5153_v41 }
 0x4b8   : > { %1359 = vmatpush.msrb.mxu3 %v5154_v42 }
 0x4ba   : > { %1360 = vmatpush.msrb.mxu3 %v5155_v43 }
 0x4c0   : > { %5147 = vrot.lane.b32.xlu1 %v6171_v40, %s5854_s26 }
 0x50a   : > { %v1313_v44 = vpop.xlane.xlu1 %1312 }
 0x50b   : > { %v1317_v45 = vsub.f32 %v1305_v20, %v1313_v44 }
 0x50d   : > { %v1319_v46 = vmul.f32 1.442695, %v1317_v45 }
 0x50f   : > { %5233 = vpow2.f32 %v1319_v46 }
 0x512   : > { %v1316_v47 = vpop.xlane.xlu2 %1315  ;;  %v1068_v48 = vpop.xlane.xlu1 %1067 }
 0x513   : > { %v1318_v49 = vsub.f32 %v1308_v27, %v1316_v47  ;;  %5235 = vrcp.f32 %v1068_v48 }
 0x515   : > { %v5234_v50 = vpop.eup %5233  ;;  %v1321_v51 = vmul.f32 1.442695, %v1318_v49  ;;  %v5855_v49 = vmov 32.0  }
 0x516   : > { %v1323_v52 = vsel %vm956_vm3, %v5234_v50, 0.0 }
 0x517   : > { %5237 = vpow2.f32 %v1321_v51  ;;  %1324 = vadd.xlane.f32.xlu2 %v1323_v52 }
 0x519   : > { %v5236_v53 = vpop.eup %5235 }
 0x51a   : > { %v1071_v54 = vpop.xlane.xlu2 %1070  ;;  %v1074_v55 = vmul.f32 %v5236_v53, %v5226_v25  ;;  %v1206_v59 = vpop.xlane.xlu1 %1205  ;;  %v872_v25 = vld [vmem:[#allocation8 + $0xc] sm:$0xf] }
 0x51b   : > { %5239 = vrcp.f32 %v1071_v54  ;;  %v1373_v26 = vsel %vm1115_vm4, %v872_v25, 0 }
 0x51c   : > { %4598 = vmatmul.msk.f32.vlgmr.msrb.gmra.mxu1 %vm956_vm3, %v1074_v55  ;;  %5241 = vrcp.f32 %v1206_v59 }
 0x51d   : > { %v5238_v40 = vpop.eup %5237 }
 0x51e   : > { %v1326_v56 = vsel %vm956_vm3, %v5238_v40, 0.0 }
 0x51f   : > { %1327 = vadd.xlane.f32.xlu2 %v1326_v56 }
 0x521   : > { %v5240_v57 = vpop.eup %5239 }
 0x522   : > { %v1075_v58 = vmul.f32 %v5240_v57, %v5228_v31  ;;  %v1209_v60 = vpop.xlane.xlu2 %1208  ;;  %v5242_v62 = vpop.eup %5241 }
 0x523   : > { %5243 = vrcp.f32 %v1209_v60  ;;  %v1212_v1 = vmul.f32 %v5242_v62, %v5230_v32  ;;  %v4921_v62 = vld [vmem:[#allocation10 + $0x8] sm:$0xff] }
 0x524   : > { %4599 = vmatmul.msk.f32.gmra.mxu1 %vm956_vm3, %v1075_v58 }
 0x529   : > { %v5244_v2 = vpop.eup %5243 }
 0x52a   : > { %v1213_v3 = vmul.f32 %v5244_v2, %v5232_v35  ;;  %v1391_v35 = vperm.slane %v6152_v16, 1 }
 0x532   : > { %v5148_v61 = vpop.permute.xlu1 %5147 }
 0x533   : > { %v5149_v63 = vunpack.i.l.bf16 %v5148_v61  ;;  %v5150_v0 = vunpack.i.h.bf16 %v5148_v61 }
 0x535   : > { %1240 = vmatpush.msra.mxu1 %v5149_v63 }
 0x537   : > { %1241 = vmatpush.msra.mxu1 %v5150_v0 }
 0x538   : > { %4606 = vmatmul.msk.f32.vlgmr.msra.gmra.mxu1 %vm956_vm3, %v1212_v1  ;;  %v4920_v1 = vld [vmem:[#allocation10] sm:$0xff] }
 0x539   : > { %1382 = vmatpush.bf16.msrb.mxu1 %v1373_v26 }
 0x540   : > { %4607 = vmatmul.msk.f32.gmra.mxu1 %vm956_vm3, %v1213_v3 }
 0x58a   : > { %v1325_v6 = vpop.xlane.xlu2 %1324 }
 0x58b   : > { %5245 = vrcp.f32 %v1325_v6 }
 0x591   : > { %v5246_v7 = vpop.eup %5245 }
 0x592   : > { %v1331_v9 = vmul.f32 %v5246_v7, %v5234_v50  ;;  %v1328_v10 = vpop.xlane.xlu2 %1327 }
 0x593   : > { %5247 = vrcp.f32 %v1328_v10 }
 0x594   : > { %4613 = vmatmul.msk.f32.vlgmr.msrb.gmra.mxu3 %vm956_vm3, %v1331_v9  ;;  %5249 = vrcp.f32 %v5855_v49 }
 0x599   : > { %v5248_v14 = vpop.eup %5247  ;;  %v1105_v15 = vpop.f32.mrf.mxu1 }
 0x59a   : > { %v1332_v17 = vmul.f32 %v5248_v14, %v5238_v40  ;;  %v5250_v50 = vpop.eup %5249 }
 0x59b   : > { %v1403_v51 = vmul.f32 32.0, %v5250_v50  ;;  %vm1407_vm5 = vweird.f32 %v5250_v50 }
 0x59c   : > { %4614 = vmatmul.msk.f32.gmra.mxu3 %vm956_vm3, %v1332_v17 }
 0x59d   : > { %v1404_v52 = vsub.f32 1.0, %v1403_v51 }
 0x5a1   : > { %v1108_v20 = vpop.f32.mrf.mxu1 }
 0x5a2   : > { %v1111_v21 = vpack.c.bf16 %v1108_v20, %v1105_v15 }
 0x5a4   : > { %4600 = vmatmul.msk.bf16.vlgmr.msrb.gmra.mxu2 %vm924_vm2, %v1111_v21 }
 0x5a5   : > { %1476 = vmatpush.bf16.msrb.mxu2 %v4921_v62  ;;  %v4927_v62 = vld [vmem:[#allocation7 + $0x18] sm:$0xff] }
 0x5a6   : > { %1631 = vmatpush.bf16.msra.mxu3 %v4927_v62 }
 0x5a9   : > { %1477 = vmatpush.bf16.msrb.mxu2 %v4920_v1 }
 0x5b5   : > { %v1243_v22 = vpop.f32.mrf.mxu1 }
 0x5bd   : > { %v1246_v23 = vpop.f32.mrf.mxu1 }
 0x5be   : > { %v1249_v24 = vpack.c.bf16 %v1246_v23, %v1243_v22  ;;  %v1447_v23 = vperm.slane %v6152_v16, 4 }
 0x5c0   : > { %4608 = vmatmul.msk.bf16.vlgmr.msra.gmra.mxu2 %vm924_vm2, %v1249_v24 }
 0x617   : > { %v1362_v27 = vpop.f32.mrf.mxu3 }
 0x61f   : > { %v1365_v28 = vpop.f32.mrf.mxu3 }
 0x620   : > { %v1368_v29 = vpack.c.bf16 %v1365_v28, %v1362_v27  ;;  %v1450_v27 = vperm.slane %v6152_v16, 5 }
 0x622   : > { %4615 = vmatmul.msk.bf16.vlgmr.msrb.gmra.mxu1 %vm924_vm2, %v1368_v29 }
 0x627   : > { %v1128_v30 = vpop.f32.mrf.mxu2 }
 0x628   : > { %v1149_v33 = vadd.f32 %v6205_v8, %v1128_v30 }
 0x62f   : > { %v1130_v31 = vpop.f32.mrf.mxu2 }
 0x630   : > { %v1151_v41 = vadd.f32 %v6207_v11, %v1130_v31  ;;  %v1405_v11 = vmul.f32 %v5250_v50, %v1404_v52 }
 0x632   : > { %v1406_v53 = vadd.f32 %v5250_v50, %v1405_v11 }
 0x643   : > { %v1265_v32 = vpop.f32.mrf.mxu2 }
 0x644   : > { %v1270_v34 = vadd.f32 %v1265_v32, %v1149_v33 }
 0x64b   : > { %v1267_v39 = vpop.f32.mrf.mxu2 }
 0x64c   : > { %v1271_v43 = vadd.f32 %v1267_v39, %v1151_v41  ;;  %v1454_v39 = vperm.slane %v6152_v16, 2 }
 0x69f   : > { %v1384_v36 = vpop.f32.mrf.mxu1 }
 0x6a0   : > { %v1389_v37 = vadd.f32 %v1384_v36, %v1270_v34  ;;  %v4925_v34 = vld [vmem:[%s6850_s7 + $0x18] sm:$0xff]  ;;  %v4923_v36 = vld [vmem:[%s6850_s7 + $0x8] sm:$0xff] }
 0x6a1   : > { %1520 = vmatpush.bf16.msrb.mxu0 %v4925_v34  ;;  %v6281_v34 = vld [vmem:[#allocation11 + $0x8] sm:$0xff] }
 0x6a2   : > { %v1392_v38 = vadd.f32 %v1391_v35, %v1389_v37  ;;  %v4922_v37 = vld [vmem:[%s6850_s7] sm:$0xff] }
 0x6a4   : > { %v1394_v42 = vadd.f32 %v1392_v38, %v6145_v12  ;;  %v6238_v12 = vsel %vm1407_vm5, %v5250_v50, %v1406_v53 }
 0x6a6   : > { %v1396_v44 = vsel %vm900_vm1, %v1394_v42, 0.0 }
 0x6a7   : > { %v1386_v45 = vpop.f32.mrf.mxu1  ;;  %1397 = vadd.xlane.f32.xlu0 %v1396_v44 }
 0x6a8   : > { %v1390_v46 = vadd.f32 %v1386_v45, %v1271_v43 }
 0x6aa   : > { %v1393_v47 = vadd.f32 %v1391_v35, %v1390_v46  ;;  %v4924_v35 = vld [vmem:[%s6850_s7 + $0x10] sm:$0xff] }
 0x6ab   : > { %1521 = vmatpush.bf16.msrb.mxu0 %v4924_v35  ;;  %v1609_v35 = vperm.slane %v6281_v34, 0 }
 0x6ac   : > { %v1395_v8 = vadd.f32 %v1393_v47, %v6147_v13  ;;  %v1487_v47 = vperm.slane %v6152_v16, 3 }
 0x6ae   : > { %v1399_v48 = vsel %vm900_vm1, %v1395_v8, 0.0 }
 0x6af   : > { %1400 = vadd.xlane.f32.xlu2 %v1399_v48  ;;  %1522 = vmatpush.bf16.msrb.mxu0 %v4923_v36 }
 0x6b3   : > { %1523 = vmatpush.bf16.msrb.mxu0 %v4922_v37 }
 0x71a   : > { %v1398_v54 = vpop.xlane.xlu0 %1397 }
 0x71b   : > { %v1409_v55 = vmul.f32 %v6238_v12, %v1398_v54 }
 0x71d   : > { %v1411_v40 = vsub.f32 %v1394_v42, %v1409_v55 }
 0x71f   : > { %v1413_v56 = vmul.f32 %v1411_v40, %v1411_v40 }
 0x721   : > { %v1415_v13 = vsel %vm900_vm1, %v1413_v56, 0.0 }
 0x722   : > { %1416 = vadd.xlane.f32.xlu1 %v1415_v13  ;;  %v1401_v57 = vpop.xlane.xlu2 %1400 }
 0x723   : > { %v1410_v58 = vmul.f32 %v6238_v12, %v1401_v57 }
 0x725   : > { %v1412_v59 = vsub.f32 %v1395_v8, %v1410_v58 }
 0x727   : > { %v1414_v60 = vmul.f32 %v1412_v59, %v1412_v59 }
 0x729   : > { %v1418_v61 = vsel %vm900_vm1, %v1414_v60, 0.0 }
 0x72a   : > { %1419 = vadd.xlane.f32.xlu2 %v1418_v61 }
 0x795   : > { %v1417_v63 = vpop.xlane.xlu1 %1416 }
 0x796   : > { %v1421_v0 = vmul.f32 %v1417_v63, %v6238_v12 }
 0x798   : > { %v1423_v2 = vadd.f32 1e-05, %v1421_v0 }
 0x79a   : > { %5251 = vrsqrt.f32 %v1423_v2  ;;  %vm1431_vm7 = vweird.f32 %v1423_v2 }
 0x79d   : > { %v1420_v3 = vpop.xlane.xlu2 %1419 }
 0x79e   : > { %v1422_v4 = vmul.f32 %v1420_v3, %v6238_v12 }
 0x7a0   : > { %v5252_v5 = vpop.eup %5251  ;;  %v1424_v6 = vadd.f32 1e-05, %v1422_v4 }
 0x7a1   : > { %v1426_v7 = vmul.f32 %v5252_v5, %v1423_v2  ;;  %vm1432_vm6 = vweird.f32 %v5252_v5  ;;  %v4926_v2 = vld [vmem:[#allocation7 + $0x10] sm:$0xff] }
 0x7a2   : > { %5253 = vrsqrt.f32 %v1424_v6  ;;  %vm1433_vm8 = vmor %vm1431_vm7, %vm1432_vm6  ;;  %vm1441_vm10 = vweird.f32 %v1424_v6  ;;  %1632 = vmatpush.bf16.msra.mxu3 %v4926_v2 }
 0x7a3   : > { %v1427_v9 = vmul.f32 %v5252_v5, %v1426_v7 }
 0x7a5   : > { %v1428_v10 = vmul.f32 0.5, %v1427_v9 }
 0x7a7   : > { %v1429_v14 = vsub.f32 1.5, %v1428_v10 }
 0x7a8   : > { %v5254_v15 = vpop.eup %5253 }
 0x7a9   : > { %v1430_v17 = vmul.f32 %v5252_v5, %v1429_v14  ;;  %v1436_v18 = vmul.f32 %v5254_v15, %v1424_v6  ;;  %vm1442_vm9 = vweird.f32 %v5254_v15 }
 0x7aa   : > { %vm1443_vm11 = vmor %vm1441_vm10, %vm1442_vm9 }
 0x7ab   : > { %v1437_v19 = vmul.f32 %v5254_v15, %v1436_v18  ;;  %v1434_v20 = vsel %vm1433_vm8, %v5252_v5, %v1430_v17 }
 0x7ac   : > { %v1445_v24 = vmul.f32 %v1434_v20, %v1411_v40 }
 0x7ad   : > { %v1438_v21 = vmul.f32 0.5, %v1437_v19 }
 0x7ae   : > { %v1448_v28 = vmul.f32 %v1447_v23, %v1445_v24 }
 0x7af   : > { %v1439_v22 = vsub.f32 1.5, %v1438_v21 }
 0x7b0   : > { %v1451_v31 = vadd.f32 %v1450_v27, %v1448_v28  ;;  %v1579_v28 = vperm.slane %v6152_v16, 7 }
 0x7b1   : > { %v1440_v25 = vmul.f32 %v5254_v15, %v1439_v22 }
 0x7b3   : > { %v1444_v26 = vsel %vm1443_vm11, %v5254_v15, %v1440_v25 }
 0x7b4   : > { %v1446_v29 = vmul.f32 %v1444_v26, %v1412_v59 }
 0x7b6   : > { %v1449_v30 = vmul.f32 %v1447_v23, %v1446_v29  ;;  %v1576_v23 = vperm.slane %v6152_v16, 6 }
 0x7b8   : > { %v1452_v32 = vadd.f32 %v1450_v27, %v1449_v30 }
 0x7ba   : > { %v1453_v33 = vpack.c.bf16 %v1452_v32, %v1451_v31 }
 0x7bc   : > { %4624 = vmatmul.msk.bf16.vlgmr.msrb.gmra.mxu2 %vm900_vm1, %v1453_v33 }
 0x83f   : > { %v1479_v38 = vpop.f32.mrf.mxu2 }
 0x840   : > { %v1480_v41 = vadd.f32 %v1479_v38, %v1454_v39 }
 0x842   : > { %v1484_v44 = vmax.f32 %v1480_v41, 0.0 }
 0x847   : > { %v1481_v42 = vpop.f32.mrf.mxu2 }
 0x848   : > { %v1482_v43 = vadd.f32 %v1481_v42, %v1454_v39 }
 0x84a   : > { %v1485_v45 = vmax.f32 %v1482_v43, 0.0 }
 0x84c   : > { %v1486_v46 = vpack.c.bf16 %v1485_v45, %v1484_v44 }
 0x84e   : > { %4641 = vmatmul.msk.bf16.vlgmr.msrb.gmra.mxu0 %vm1512_vm12, %v1486_v46 }
 0x8cb   : > { %v1525_v8 = vpop.f32.mrf.mxu0 }
 0x8cc   : > { %v1526_v48 = vadd.f32 %v1525_v8, %v1487_v47 }
 0x8ce   : > { %v1530_v49 = vadd.f32 %v1526_v48, %v1451_v31 }
 0x8d0   : > { %v1532_v50 = vsel %vm900_vm1, %v1530_v49, 0.0 }
 0x8d1   : > { %1533 = vadd.xlane.f32.xlu2 %v1532_v50 }
 0x8d3   : > { %v1527_v51 = vpop.f32.mrf.mxu0 }
 0x8d4   : > { %v1528_v52 = vadd.f32 %v1527_v51, %v1487_v47 }
 0x8d6   : > { %v1531_v11 = vadd.f32 %v1528_v52, %v1452_v32 }
 0x8d8   : > { %v1535_v53 = vsel %vm900_vm1, %v1531_v11, 0.0 }
 0x8d9   : > { %1536 = vadd.xlane.f32.xlu2 %v1535_v53 }
 0x944   : > { %v1534_v54 = vpop.xlane.xlu2 %1533 }
 0x945   : > { %v1538_v55 = vmul.f32 %v1534_v54, %v6238_v12 }
 0x947   : > { %v1540_v40 = vsub.f32 %v1530_v49, %v1538_v55 }
 0x949   : > { %v1542_v56 = vmul.f32 %v1540_v40, %v1540_v40 }
 0x94b   : > { %v1544_v13 = vsel %vm900_vm1, %v1542_v56, 0.0 }
 0x94c   : > { %1545 = vadd.xlane.f32.xlu2 %v1544_v13  ;;  %v1537_v57 = vpop.xlane.xlu2 %1536  ;;  %v1588_v13 = vld [vmem:[#allocation8 + $0x10] sm:$0xf] }
 0x94d   : > { %v1539_v58 = vmul.f32 %v1537_v57, %v6238_v12  ;;  %v1855_v57 = vsel %vm1115_vm4, %v1588_v13, 0 }
 0x94f   : > { %v1541_v59 = vsub.f32 %v1531_v11, %v1539_v58 }
 0x951   : > { %v1543_v60 = vmul.f32 %v1541_v59, %v1541_v59 }
 0x953   : > { %v1547_v61 = vsel %vm900_vm1, %v1543_v60, 0.0 }
 0x954   : > { %1548 = vadd.xlane.f32.xlu0 %v1547_v61 }
 0x9bf   : > { %v1546_v63 = vpop.xlane.xlu2 %1545 }
 0x9c0   : > { %v1550_v0 = vmul.f32 %v1546_v63, %v6238_v12 }
 0x9c2   : > { %v1552_v1 = vadd.f32 1e-05, %v1550_v0 }
 0x9c4   : > { %5255 = vrsqrt.f32 %v1552_v1  ;;  %vm1560_vm14 = vweird.f32 %v1552_v1 }
 0x9c7   : > { %v1549_v3 = vpop.xlane.xlu0 %1548 }
 0x9c8   : > { %v1551_v4 = vmul.f32 %v1549_v3, %v6238_v12 }
 0x9ca   : > { %v5256_v5 = vpop.eup %5255  ;;  %v1553_v6 = vadd.f32 1e-05, %v1551_v4 }
 0x9cb   : > { %v1555_v7 = vmul.f32 %v5256_v5, %v1552_v1  ;;  %vm1561_vm13 = vweird.f32 %v5256_v5 }
 0x9cc   : > { %5257 = vrsqrt.f32 %v1553_v6  ;;  %vm1562_vm15 = vmor %vm1560_vm14, %vm1561_vm13  ;;  %vm1570_vm5 = vweird.f32 %v1553_v6 }
 0x9cd   : > { %v1556_v9 = vmul.f32 %v5256_v5, %v1555_v7 }
 0x9cf   : > { %v1557_v10 = vmul.f32 0.5, %v1556_v9 }
 0x9d1   : > { %v1558_v14 = vsub.f32 1.5, %v1557_v10 }
 0x9d2   : > { %v5258_v15 = vpop.eup %5257 }
 0x9d3   : > { %v1559_v17 = vmul.f32 %v5256_v5, %v1558_v14  ;;  %v1565_v18 = vmul.f32 %v5258_v15, %v1553_v6  ;;  %vm1571_vm0 = vweird.f32 %v5258_v15 }
 0x9d4   : > { %vm1572_vm6 = vmor %vm1570_vm5, %vm1571_vm0 }
 0x9d5   : > { %v1566_v19 = vmul.f32 %v5258_v15, %v1565_v18  ;;  %v1563_v20 = vsel %vm1562_vm15, %v5256_v5, %v1559_v17 }
 0x9d6   : > { %v1574_v24 = vmul.f32 %v1563_v20, %v1540_v40 }
 0x9d7   : > { %v1567_v21 = vmul.f32 0.5, %v1566_v19 }
 0x9d8   : > { %v1577_v27 = vmul.f32 %v1576_v23, %v1574_v24 }
 0x9d9   : > { %v1568_v22 = vsub.f32 1.5, %v1567_v21 }
 0x9da   : > { %v6276_v32 = vadd.f32 %v1579_v28, %v1577_v27 }
 0x9db   : > { %v1569_v25 = vmul.f32 %v5258_v15, %v1568_v22 }
 0x9dd   : > { %v1573_v26 = vsel %vm1572_vm6, %v5258_v15, %v1569_v25 }
 0x9de   : > { %v1575_v29 = vmul.f32 %v1573_v26, %v1541_v59 }
 0x9e0   : > { %v1578_v30 = vmul.f32 %v1576_v23, %v1575_v29 }
 0x9e2   : > { %v6274_v31 = vadd.f32 %v1579_v28, %v1578_v30 }
 0x9e4   : > { %v1608_v33 = vpack.c.bf16 %v6274_v31, %v6276_v32 }
 0x9e6   : > { %4658 = vmatmul.msk.bf16.vlgmr.msra.gmra.mxu3 %vm900_vm1, %v1608_v33 }
 0xa69   : > { %v1634_v36 = vpop.f32.mrf.mxu3 }
 0xa6a   : > { %v1635_v37 = vadd.f32 %v1634_v36, %v1609_v35 }
 0xa6c   : > { %1641 = vrot.lane.b32.xlu0 %v1635_v37, %s5844_s25 }
 0xa71   : > { %v1636_v16 = vpop.f32.mrf.mxu3 }
 0xa72   : > { %v1637_v38 = vadd.f32 %v1636_v16, %v1609_v35 }
 0xa74   : > { %1643 = vrot.lane.b32.xlu2 %v1637_v38, %s5844_s25  ;;  %v6286_v39 = vpack.i.bf16 %v1635_v37, %v1637_v38 }
 0xa7c   : > { %5157 = vrot.lane.b32.xlu2 %v6286_v39, %s5850_s0 }
 0xa84   : > { %1738 = vrot.lane.b32.xlu2 %v1635_v37, %s5845_s22 }
 0xa8c   : > { %1734 = vrot.lane.b32.xlu2 %v1635_v37, %s5846_s18 }
 0xa94   : > { %1996 = vrot.lane.b32.xlu2 %v1637_v38, %s5848_s17 }
 0xa9c   : > { %1877 = vrot.lane.b32.xlu2 %v1637_v38, %s5847_s5 }
 0xaa4   : > { %1990 = vrot.lane.b32.xlu2 %v1635_v37, %s5849_s21 }
 0xaac   : > { %1992 = vrot.lane.b32.xlu2 %v1637_v38, %s5849_s21 }
 0xace   : > { %v1644_v41 = vpop.permute.xlu2 %1643 }
 0xacf   : > { %4659 = vmatpush.xpose.msk.msra.mxu1 %vm924_vm2, %v1644_v41 }
 0xad6   : > { %v5158_v42 = vpop.permute.xlu2 %5157 }
 0xad7   : > { %v5159_v43 = vunpack.i.l.bf16 %v5158_v42  ;;  %v5160_v44 = vunpack.i.h.bf16 %v5158_v42 }
 0xad9   : > { %1724 = vmatpush.msra.mxu2 %v5159_v43 }
 0xadb   : > { %1725 = vmatpush.msra.mxu2 %v5160_v44 }
 0xadd   : > { %1864 = vmatpush.bf16.msrb.mxu2 %v1855_v57 }
 0xade   : > { %v1642_v45 = vpop.permute.xlu0 %1641  ;;  %v1739_v58 = vpop.permute.xlu2 %1738 }
 0xadf   : > { %4660 = vmatpush.xpose.msk.msra.mxu1 %vm924_vm2, %v1642_v45 }
 0xae2   : > { %4661 = vmatmul.msk.f32.vlgmr.msra.gmra.mxu1 %vm924_vm2, %v1635_v37 }
 0xae6   : > { %v1735_v59 = vpop.permute.xlu2 %1734 }
 0xaea   : > { %4662 = vmatmul.msk.f32.gmra.mxu1 %vm924_vm2, %v1637_v38 }
 0xaee   : > { %v1997_v0 = vpop.permute.xlu2 %1996 }
 0xaf6   : > { %v1878_v4 = vpop.permute.xlu2 %1877 }
 0xafe   : > { %v1991_v20 = vpop.permute.xlu2 %1990 }
 0xb06   : > { %v1993_v24 = vpop.permute.xlu2 %1992 }
 0xb5f   : > { %v1670_v46 = vpop.f32.mrf.mxu1 }
 0xb60   : > { %v1676_v47 = vsel %vm956_vm3, %v1670_v46, -inf }
 0xb61   : > { %1677 = vmax.xlane.f32.xlu1 %v1676_v47 }
 0xb67   : > { %v1673_v8 = vpop.f32.mrf.mxu1 }
 0xb68   : > { %v1679_v48 = vsel %vm956_vm3, %v1673_v8, -inf }
 0xb69   : > { %1680 = vmax.xlane.f32.xlu1 %v1679_v48 }
 0xbd4   : > { %v1678_v49 = vpop.xlane.xlu1 %1677 }
 0xbd5   : > { %v1682_v50 = vsub.f32 %v1670_v46, %v1678_v49 }
 0xbd7   : > { %v1684_v51 = vmul.f32 1.442695, %v1682_v50 }
 0xbd9   : > { %5259 = vpow2.f32 %v1684_v51 }
 0xbdc   : > { %v1681_v52 = vpop.xlane.xlu1 %1680 }
 0xbdd   : > { %v1683_v11 = vsub.f32 %v1673_v8, %v1681_v52 }
 0xbdf   : > { %v5260_v53 = vpop.eup %5259  ;;  %v1686_v54 = vmul.f32 1.442695, %v1683_v11 }
 0xbe0   : > { %v1688_v55 = vsel %vm956_vm3, %v5260_v53, 0.0 }
 0xbe1   : > { %5261 = vpow2.f32 %v1686_v54  ;;  %1689 = vadd.xlane.f32.xlu1 %v1688_v55 }
 0xbe7   : > { %v5262_v40 = vpop.eup %5261 }
 0xbe8   : > { %v1691_v56 = vsel %vm956_vm3, %v5262_v40, 0.0 }
 0xbe9   : > { %1692 = vadd.xlane.f32.xlu0 %v1691_v56 }
 0xbfa   : > { %1740 = vrot.lane.b32.xlu1 %v1637_v38, %s5845_s22 }
 0xbfd   : > { %1875 = vrot.lane.b32.xlu0 %v1635_v37, %s5847_s5 }
 0xc02   : > { %1736 = vrot.lane.b32.xlu1 %v1637_v38, %s5846_s18 }
 0xc0a   : > { %1994 = vrot.lane.b32.xlu1 %v1635_v37, %s5848_s17 }
 0xc12   : > { %1871 = vrot.lane.b32.xlu1 %v1635_v37, %s5851_s24 }
 0xc1a   : > { %1873 = vrot.lane.b32.xlu1 %v1637_v38, %s5851_s24 }
 0xc54   : > { %v1690_v60 = vpop.xlane.xlu1 %1689 }
 0xc55   : > { %5263 = vrcp.f32 %v1690_v60 }
 0xc5b   : > { %v5264_v61 = vpop.eup %5263 }
 0xc5c   : > { %v1696_v62 = vmul.f32 %v5264_v61, %v5260_v53  ;;  %v1693_v63 = vpop.xlane.xlu0 %1692 }
 0xc5d   : > { %5265 = vrcp.f32 %v1693_v63 }
 0xc5e   : > { %4663 = vmatmul.msk.f32.vlgmr.msra.gmra.mxu2 %vm956_vm3, %v1696_v62 }
 0xc5f   : > { %4680 = vmatpush.xpose.msk.msra.mxu2 %vm924_vm2, %v1997_v0 }
 0xc63   : > { %v5266_v1 = vpop.eup %5265 }
 0xc64   : > { %v1697_v2 = vmul.f32 %v5266_v1, %v5262_v40 }
 0xc66   : > { %4664 = vmatmul.msk.f32.gmra.mxu2 %vm956_vm3, %v1697_v2 }
 0xc6c   : > { %v1741_v3 = vpop.permute.xlu1 %1740 }
 0xc6d   : > { %4665 = vmatpush.xpose.msk.msra.mxu0 %vm924_vm2, %v1741_v3 }
 0xc6f   : > { %v1876_v6 = vpop.permute.xlu0 %1875 }
 0xc71   : > { %4666 = vmatpush.xpose.msk.msra.mxu0 %vm924_vm2, %v1739_v58 }
 0xc74   : > { %4667 = vmatmul.msk.f32.vlgmr.msra.gmra.mxu0 %vm924_vm2, %v1735_v59  ;;  %v1737_v5 = vpop.permute.xlu1 %1736 }
 0xc75   : > { %4673 = vmatpush.xpose.msk.msrb.mxu0 %vm924_vm2, %v1878_v4 }
 0xc79   : > { %4674 = vmatpush.xpose.msk.msrb.mxu0 %vm924_vm2, %v1876_v6 }
 0xc7c   : > { %4668 = vmatmul.msk.f32.gmra.mxu0 %vm924_vm2, %v1737_v5  ;;  %v1995_v7 = vpop.permute.xlu1 %1994 }
 0xc7d   : > { %4681 = vmatpush.xpose.msk.msra.mxu2 %vm924_vm2, %v1995_v7 }
 0xc84   : > { %v1872_v9 = vpop.permute.xlu1 %1871 }
 0xc85   : > { %4675 = vmatmul.msk.f32.vlgmr.msrb.gmra.mxu0 %vm924_vm2, %v1872_v9 }
 0xc8c   : > { %v1874_v10 = vpop.permute.xlu1 %1873 }
 0xc8d   : > { %4676 = vmatmul.msk.f32.gmra.mxu0 %vm924_vm2, %v1874_v10 }
 0xce1   : > { %v1727_v14 = vpop.f32.mrf.mxu2 }
 0xce9   : > { %v1730_v15 = vpop.f32.mrf.mxu2 }
 0xcea   : > { %v1733_v17 = vpack.c.bf16 %v1730_v15, %v1727_v14 }
 0xcec   : > { %4672 = vmatmul.msk.bf16.vlgmr.msrb.gmra.mxu2 %vm924_vm2, %v1733_v17 }
 0xcf1   : > { %v1767_v18 = vpop.f32.mrf.mxu0 }
 0xcf2   : > { %v1773_v19 = vsel %vm956_vm3, %v1767_v18, -inf }
 0xcf3   : > { %1774 = vmax.xlane.f32.xlu2 %v1773_v19 }
 0xcf9   : > { %v1770_v21 = vpop.f32.mrf.mxu0 }
 0xcfa   : > { %v1776_v22 = vsel %vm956_vm3, %v1770_v21, -inf }
 0xcfb   : > { %1777 = vmax.xlane.f32.xlu1 %v1776_v22 }
 0xcfc   : > { %4682 = vmatmul.msk.f32.vlgmr.msra.gmra.mxu2 %vm924_vm2, %v1991_v20 }
 0xd02   : > { %v1904_v23 = vpop.f32.mrf.mxu0 }
 0xd03   : > { %v1910_v25 = vsel %vm956_vm3, %v1904_v23, -inf }
 0xd04   : > { %4683 = vmatmul.msk.f32.gmra.mxu2 %vm924_vm2, %v1993_v24  ;;  %1911 = vmax.xlane.f32.xlu0 %v1910_v25 }
 0xd0a   : > { %v1907_v26 = vpop.f32.mrf.mxu0 }
 0xd0b   : > { %v1913_v27 = vsel %vm956_vm3, %v1907_v26, -inf }
 0xd0c   : > { %1914 = vmax.xlane.f32.xlu1 %v1913_v27 }
 0xd25   : > { %5162 = vrot.lane.b32.xlu1 %v6286_v39, %s5852_s23 }
 0xd66   : > { %v1775_v35 = vpop.xlane.xlu2 %1774 }
 0xd67   : > { %v1779_v36 = vsub.f32 %v1767_v18, %v1775_v35 }
 0xd69   : > { %v1781_v41 = vmul.f32 1.442695, %v1779_v36 }
 0xd6e   : > { %v1778_v28 = vpop.xlane.xlu1 %1777 }
 0xd6f   : > { %v1780_v29 = vsub.f32 %v1770_v21, %v1778_v28  ;;  %v6332_v30 = vpop.f32.mrf.mxu2 }
 0xd71   : > { %v1783_v33 = vmul.f32 1.442695, %v1780_v29 }
 0xd73   : > { %5267 = vpow2.f32 %v1783_v33 }
 0xd74   : > { %5269 = vpow2.f32 %v1781_v41 }
 0xd77   : > { %v6334_v37 = vpop.f32.mrf.mxu2  ;;  %v1912_v42 = vpop.xlane.xlu0 %1911 }
 0xd78   : > { %v1916_v43 = vsub.f32 %v1904_v23, %v1912_v42  ;;  %v1589_v23 = vld [vmem:[#allocation8 + $0x14] sm:$0xf] }
 0xd79   : > { %v5268_v16 = vpop.eup %5267  ;;  %v1835_v24 = vsel %vm1115_vm4, %v1589_v23, 0  ;;  %v6384_v23 = vld [vmem:[%s6859_s16] sm:$0xff] }
 0xd7a   : > { %v1788_v38 = vsel %vm956_vm3, %v5268_v16, 0.0  ;;  %v1918_v8 = vmul.f32 1.442695, %v1916_v43  ;;  %v5270_v49 = vpop.eup %5269  ;;  %1844 = vmatpush.bf16.msrb.mxu1 %v1835_v24 }
 0xd7b   : > { %1789 = vadd.xlane.f32.xlu0 %v1788_v38  ;;  %v1785_v51 = vsel %vm956_vm3, %v5270_v49, 0.0 }
 0xd7c   : > { %5271 = vpow2.f32 %v1918_v8 }
 0xd7f   : > { %v2023_v44 = vpop.f32.mrf.mxu2  ;;  %v1915_v45 = vpop.xlane.xlu1 %1914 }
 0xd80   : > { %v1917_v46 = vsub.f32 %v1907_v26, %v1915_v45  ;;  %v2029_v47 = vsel %vm956_vm3, %v2023_v44, -inf  ;;  %v1590_v26 = vld [vmem:[#allocation8 + $0x18] sm:$0xf] }
 0xd81   : > { %2030 = vmax.xlane.f32.xlu2 %v2029_v47  ;;  %v1972_v27 = vsel %vm1115_vm4, %v1590_v26, 0  ;;  %v1591_v47 = vld [vmem:[#allocation8 + $0x1c] sm:$0xf]  ;;  %v2333_v26 = vperm.slane %v6384_v23, 0 }
 0xd82   : > { %v1920_v48 = vmul.f32 1.442695, %v1917_v46  ;;  %v5272_v11 = vpop.eup %5271  ;;  %1981 = vmatpush.bf16.msra.mxu1 %v1972_v27  ;;  %v2091_v8 = vsel %vm1115_vm4, %v1591_v47, 0 }
 0xd83   : > { %v1922_v54 = vsel %vm956_vm3, %v5272_v11, 0.0 }
 0xd84   : > { %5273 = vpow2.f32 %v1920_v48 }
 0xd87   : > { %v2026_v50 = vpop.f32.mrf.mxu2 }
 0xd88   : > { %v2032_v52 = vsel %vm956_vm3, %v2026_v50, -inf }
 0xd89   : > { %1786 = vadd.xlane.f32.xlu2 %v1785_v51  ;;  %2033 = vmax.xlane.f32.xlu0 %v2032_v52 }
 0xd8a   : > { %v5274_v53 = vpop.eup %5273 }
 0xd8b   : > { %v1925_v55 = vsel %vm956_vm3, %v5274_v53, 0.0 }
 0xd91   : > { %1923 = vadd.xlane.f32.xlu2 %v1922_v54  ;;  %1926 = vadd.xlane.f32.xlu0 %v1925_v55  ;;  %v2109_v55 = vperm.slane %v6281_v34, 1 }
 0xd97   : > { %v5163_v40 = vpop.permute.xlu1 %5162 }
 0xd98   : > { %v5164_v56 = vunpack.i.l.bf16 %v5163_v40  ;;  %v5165_v13 = vunpack.i.h.bf16 %v5163_v40 }
 0xd9a   : > { %1821 = vmatpush.msrb.mxu3 %v5164_v56 }
 0xd9c   : > { %1822 = vmatpush.msrb.mxu3 %v5165_v13 }
 0xda9   : > { %5167 = vrot.lane.b32.xlu2 %v6286_v39, %s5854_s26 }
 0xdee   : > { %v1790_v57 = vpop.xlane.xlu0 %1789 }
 0xdf4   : > { %v2031_v58 = vpop.xlane.xlu2 %2030 }
 0xdf5   : > { %v2035_v59 = vsub.f32 %v2023_v44, %v2031_v58 }
 0xdf7   : > { %v2037_v60 = vmul.f32 1.442695, %v2035_v59 }
 0xdf9   : > { %5275 = vpow2.f32 %v2037_v60 }
 0xdfc   : > { %v1787_v61 = vpop.xlane.xlu2 %1786  ;;  %v2034_v62 = vpop.xlane.xlu0 %2033 }
 0xdfd   : > { %5277 = vrcp.f32 %v1787_v61  ;;  %v2036_v63 = vsub.f32 %v2026_v50, %v2034_v62 }
 0xdff   : > { %v5276_v0 = vpop.eup %5275  ;;  %v2039_v1 = vmul.f32 1.442695, %v2036_v63 }
 0xe00   : > { %v2041_v2 = vsel %vm956_vm3, %v5276_v0, 0.0 }
 0xe01   : > { %5279 = vpow2.f32 %v2039_v1  ;;  %2042 = vadd.xlane.f32.xlu0 %v2041_v2  ;;  %v6371_v2 = vld [vmem:[%s816_s2] sm:$0xff]  ;;  %s6906_s2 = sld [smem:[#allocation45_spill]] }
 0xe02   : > { %5281 = vrcp.f32 %v1790_v57 }
 0xe03   : > { %v5278_v3 = vpop.eup %5277 }
 0xe04   : > { %v1793_v4 = vmul.f32 %v5278_v3, %v5270_v49  ;;  %v1924_v5 = vpop.xlane.xlu2 %1923  ;;  %v1927_v18 = vpop.xlane.xlu0 %1926  ;;  %v2332_v3 = vpack.c.bf16 %v6371_v2, %v6371_v2 }
 0xe05   : > { %5283 = vrcp.f32 %v1924_v5 }
 0xe06   : > { %4669 = vmatmul.msk.f32.vlgmr.msrb.gmra.mxu3 %vm956_vm3, %v1793_v4  ;;  %5285 = vrcp.f32 %v1927_v18  ;;  %v4929_v18 = vld [vmem:[#allocation10 + $0x18] sm:$0xff] }
 0xe07   : > { %v5280_v6 = vpop.eup %5279 }
 0xe08   : > { %v2044_v7 = vsel %vm956_vm3, %v5280_v6, 0.0  ;;  %v5282_v9 = vpop.eup %5281 }
 0xe09   : > { %2045 = vadd.xlane.f32.xlu1 %v2044_v7  ;;  %v1794_v14 = vmul.f32 %v5282_v9, %v5268_v16 }
 0xe0b   : > { %v5284_v19 = vpop.eup %5283 }
 0xe0c   : > { %v5168_v10 = vpop.permute.xlu2 %5167  ;;  %v1930_v20 = vmul.f32 %v5284_v19, %v5272_v11  ;;  %v5286_v21 = vpop.eup %5285 }
 0xe0d   : > { %v5169_v15 = vunpack.i.l.bf16 %v5168_v10  ;;  %v5170_v17 = vunpack.i.h.bf16 %v5168_v10  ;;  %v1931_v22 = vmul.f32 %v5286_v21, %v5274_v53 }
 0xe0e   : > { %4670 = vmatmul.msk.f32.gmra.mxu3 %vm956_vm3, %v1794_v14 }
 0xe0f   : > { %1958 = vmatpush.msra.mxu3 %v5169_v15 }
 0xe11   : > { %1959 = vmatpush.msra.mxu3 %v5170_v17 }
 0xe13   : > { %2100 = vmatpush.bf16.msrb.mxu3 %v2091_v8  ;;  %v2158_v8 = vperm.slane %v6281_v34, 4 }
 0xe15   : > { %5172 = vrot.lane.b32.xlu0 %v6286_v39, %s6902_s3 }
 0xe16   : > { %4677 = vmatmul.msk.f32.vlgmr.msra.gmra.mxu3 %vm956_vm3, %v1930_v20 }
 0xe1e   : > { %4678 = vmatmul.msk.f32.gmra.mxu3 %vm956_vm3, %v1931_v22  ;;  %v4928_v22 = vld [vmem:[#allocation10 + $0x10] sm:$0xff] }
 0xe74   : > { %v2043_v25 = vpop.xlane.xlu0 %2042 }
 0xe75   : > { %5287 = vrcp.f32 %v2043_v25 }
 0xe7b   : > { %v5288_v33 = vpop.eup %5287 }
 0xe7c   : > { %v2046_v28 = vpop.xlane.xlu1 %2045  ;;  %v2049_v16 = vmul.f32 %v5288_v33, %v5276_v0 }
 0xe7d   : > { %5289 = vrcp.f32 %v2046_v28 }
 0xe83   : > { %v5290_v38 = vpop.eup %5289 }
 0xe84   : > { %v2050_v43 = vmul.f32 %v5290_v38, %v5280_v6 }
 0xe87   : > { %v5173_v29 = vpop.permute.xlu0 %5172 }
 0xe88   : > { %v5174_v39 = vunpack.i.l.bf16 %v5173_v29  ;;  %v5175_v36 = vunpack.i.h.bf16 %v5173_v29 }
 0xe89   : > { %v1824_v35 = vpop.f32.mrf.mxu3 }
 0xe8a   : > { %2077 = vmatpush.msra.mxu0 %v5174_v39 }
 0xe8c   : > { %2078 = vmatpush.msra.mxu0 %v5175_v36 }
 0xe8d   : > { %4684 = vmatmul.msk.f32.vlgmr.msra.gmra.mxu0 %vm956_vm3, %v2049_v16 }
 0xe91   : > { %v1827_v41 = vpop.f32.mrf.mxu3 }
 0xe92   : > { %v1830_v42 = vpack.c.bf16 %v1827_v41, %v1824_v35 }
 0xe94   : > { %4671 = vmatmul.msk.bf16.vlgmr.msrb.gmra.mxu1 %vm924_vm2, %v1830_v42 }
 0xe95   : > { %4685 = vmatmul.msk.f32.gmra.mxu0 %vm956_vm3, %v2050_v43  ;;  %2187 = vmatpush.bf16.msrb.mxu1 %v4929_v18 }
 0xe99   : > { %v1961_v44 = vpop.f32.mrf.mxu3  ;;  %2188 = vmatpush.bf16.msrb.mxu1 %v4928_v22 }
 0xea1   : > { %v1964_v45 = vpop.f32.mrf.mxu3 }
 0xea2   : > { %v1967_v46 = vpack.c.bf16 %v1964_v45, %v1961_v44 }
 0xea4   : > { %4679 = vmatmul.msk.bf16.vlgmr.msra.gmra.mxu1 %vm924_vm2, %v1967_v46 }
 0xf0a   : > { %v2080_v48 = vpop.f32.mrf.mxu0 }
 0xf11   : > { %v1846_v51 = vpop.f32.mrf.mxu1 }
 0xf12   : > { %v2083_v49 = vpop.f32.mrf.mxu0  ;;  %v1867_v53 = vadd.f32 %v6332_v30, %v1846_v51  ;;  %v2161_v51 = vperm.slane %v6281_v34, 5 }
 0xf13   : > { %v2086_v50 = vpack.c.bf16 %v2083_v49, %v2080_v48 }
 0xf15   : > { %4686 = vmatmul.msk.bf16.vlgmr.msrb.gmra.mxu3 %vm924_vm2, %v2086_v50 }
 0xf19   : > { %v1848_v52 = vpop.f32.mrf.mxu1 }
 0xf1a   : > { %v1869_v58 = vadd.f32 %v6334_v37, %v1848_v52  ;;  %v4935_v37 = vld [vmem:[#allocation13 + $0x8] sm:$0xff] }
 0xf1b   : > { %2355 = vmatpush.bf16.msrb.mxu0 %v4935_v37 }
 0xf21   : > { %v1983_v11 = vpop.f32.mrf.mxu1 }
 0xf22   : > { %v1988_v54 = vadd.f32 %v1983_v11, %v1867_v53 }
 0xf29   : > { %v1985_v57 = vpop.f32.mrf.mxu1 }
 0xf2a   : > { %v1989_v60 = vadd.f32 %v1985_v57, %v1869_v58  ;;  %v4931_v57 = vld [vmem:[%s6850_s7 + $0x28] sm:$0xff]  ;;  %v4930_v58 = vld [vmem:[%s6850_s7 + $0x20] sm:$0xff] }
 0xf98   : > { %v2102_v40 = vpop.f32.mrf.mxu3 }
 0xf99   : > { %v2107_v56 = vadd.f32 %v2102_v40, %v1988_v54 }
 0xf9b   : > { %v2110_v13 = vadd.f32 %v2109_v55, %v2107_v56  ;;  %v4933_v56 = vld [vmem:[%s6850_s7 + $0x38] sm:$0xff] }
 0xf9c   : > { %2230 = vmatpush.bf16.msrb.mxu2 %v4933_v56 }
 0xf9d   : > { %v2112_v59 = vadd.f32 %v2110_v13, %v6276_v32  ;;  %v4934_v32 = vld [vmem:[#allocation13] sm:$0xff]  ;;  %v4932_v13 = vld [vmem:[%s6850_s7 + $0x30] sm:$0xff] }
 0xf9e   : > { %2356 = vmatpush.bf16.msrb.mxu0 %v4934_v32 }
 0xf9f   : > { %v2114_v61 = vsel %vm900_vm1, %v2112_v59, 0.0 }
 0xfa0   : > { %v2104_v62 = vpop.f32.mrf.mxu3  ;;  %2115 = vadd.xlane.f32.xlu2 %v2114_v61  ;;  %2231 = vmatpush.bf16.msrb.mxu2 %v4932_v13 }
 0xfa1   : > { %v2108_v63 = vadd.f32 %v2104_v62, %v1989_v60  ;;  %4721 = vmatmul.msk.bf16.vlgmr.msrb.gmra.mxu0 %vm900_vm1, %v2332_v3 }
 0xfa3   : > { %v2111_v0 = vadd.f32 %v2109_v55, %v2108_v63  ;;  %v2165_v63 = vperm.slane %v6281_v34, 2 }
 0xfa4   : > { %2232 = vmatpush.bf16.msrb.mxu2 %v4931_v57 }
 0xfa5   : > { %v2113_v30 = vadd.f32 %v2111_v0, %v6274_v31 }
 0xfa7   : > { %v2117_v1 = vsel %vm900_vm1, %v2113_v30, 0.0 }
 0xfa8   : > { %2118 = vadd.xlane.f32.xlu0 %v2117_v1  ;;  %2233 = vmatpush.bf16.msrb.mxu2 %v4930_v58 }
0x1013   : > { %v2116_v31 = vpop.xlane.xlu2 %2115 }
0x1014   : > { %v2120_v4 = vmul.f32 %v2116_v31, %v6238_v12 }
0x1016   : > { %v2122_v5 = vsub.f32 %v2112_v59, %v2120_v4 }
0x1018   : > { %v2124_v6 = vmul.f32 %v2122_v5, %v2122_v5 }
0x101a   : > { %v2126_v7 = vsel %vm900_vm1, %v2124_v6, 0.0  ;;  %v2293_v6 = vlaneseq }
0x101b   : > { %2127 = vadd.xlane.f32.xlu1 %v2126_v7  ;;  %v2119_v9 = vpop.xlane.xlu0 %2118 }
0x101c   : > { %v2121_v10 = vmul.f32 %v2119_v9, %v6238_v12  ;;  %v2294_v9 = vshrl.u32 %v2293_v6, 7 }
0x101e   : > { %v2123_v14 = vsub.f32 %v2113_v30, %v2121_v10  ;;  %v2358_v24 = vpop.f32.mrf.mxu0  ;;  %v2296_v10 = vand.u32 127, %v2293_v6 }
0x101f   : > { %v6388_v28 = vadd.f32 %v2358_v24, %v2333_v26 }
0x1020   : > { %v2125_v15 = vmul.f32 %v2123_v14, %v2123_v14  ;;  %vm6431_vm14 = vcmp.le.s32.totalorder %v2296_v10, %v2294_v9 }
0x1021   : > { %2535 = vrot.lane.b32.xlu0 %v6388_v28, %s5847_s5 }
0x1022   : > { %v2129_v17 = vsel %vm900_vm1, %v2125_v15, 0.0 }
0x1023   : > { %2130 = vadd.xlane.f32.xlu2 %v2129_v17 }
0x1026   : > { %v2360_v36 = vpop.f32.mrf.mxu0 }
0x1034   : > { %2430 = vrot.lane.b32.xlu1 %v6388_v28, %s5845_s22 }
0x103b   : > { %2428 = vrot.lane.b32.xlu2 %v6388_v28, %s5846_s18 }
0x103c   : > { %2533 = vrot.lane.b32.xlu1 %v6388_v28, %s5851_s24 }
0x1044   : > { %2468 = vrot.lane.b32.xlu1 %v6388_v28, %s5852_s23 }
0x108e   : > { %v2128_v19 = vpop.xlane.xlu1 %2127 }
0x108f   : > { %v2132_v20 = vmul.f32 %v2128_v19, %v6238_v12 }
0x1091   : > { %v2134_v21 = vadd.f32 1e-05, %v2132_v20 }
0x1093   : > { %5291 = vrsqrt.f32 %v2134_v21  ;;  %vm2142_vm8 = vweird.f32 %v2134_v21  ;;  %v2536_v31 = vpop.permute.xlu0 %2535 }
0x1096   : > { %v2131_v25 = vpop.xlane.xlu2 %2130 }
0x1097   : > { %v2133_v27 = vmul.f32 %v2131_v25, %v6238_v12 }
0x1099   : > { %v5292_v29 = vpop.eup %5291  ;;  %v2135_v33 = vadd.f32 1e-05, %v2133_v27 }
0x109a   : > { %v2137_v39 = vmul.f32 %v5292_v29, %v2134_v21  ;;  %vm2143_vm7 = vweird.f32 %v5292_v29 }
0x109b   : > { %5293 = vrsqrt.f32 %v2135_v33  ;;  %vm2144_vm9 = vmor %vm2142_vm8, %vm2143_vm7  ;;  %vm2152_vm11 = vweird.f32 %v2135_v33 }
0x109c   : > { %v2138_v35 = vmul.f32 %v5292_v29, %v2137_v39 }
0x109e   : > { %v2139_v16 = vmul.f32 0.5, %v2138_v35  ;;  %v2429_v4 = vpop.permute.xlu2 %2428 }
0x10a0   : > { %v2140_v38 = vsub.f32 1.5, %v2139_v16 }
0x10a1   : > { %v5294_v41 = vpop.eup %5293 }
0x10a2   : > { %v2141_v42 = vmul.f32 %v5292_v29, %v2140_v38  ;;  %v2147_v43 = vmul.f32 %v5294_v41, %v2135_v33  ;;  %vm2153_vm10 = vweird.f32 %v5294_v41 }
0x10a3   : > { %vm2154_vm13 = vmor %vm2152_vm11, %vm2153_vm10 }
0x10a4   : > { %v2148_v44 = vmul.f32 %v5294_v41, %v2147_v43  ;;  %v2145_v45 = vsel %vm2144_vm9, %v5292_v29, %v2141_v42 }
0x10a5   : > { %v2156_v48 = vmul.f32 %v2145_v45, %v2122_v5 }
0x10a6   : > { %v2149_v46 = vmul.f32 0.5, %v2148_v44  ;;  %v2431_v59 = vpop.permute.xlu1 %2430 }
0x10a7   : > { %v2159_v52 = vmul.f32 %v2158_v8, %v2156_v48  ;;  %4725 = vmatpush.xpose.msk.msra.mxu2 %vm924_vm2, %v2431_v59 }
0x10a8   : > { %v2150_v47 = vsub.f32 1.5, %v2149_v46 }
0x10a9   : > { %v6402_v54 = vadd.f32 %v2161_v51, %v2159_v52 }
0x10aa   : > { %v2151_v49 = vmul.f32 %v5294_v41, %v2150_v47 }
0x10ac   : > { %v2155_v50 = vsel %vm2154_vm13, %v5294_v41, %v2151_v49 }
0x10ad   : > { %v2157_v11 = vmul.f32 %v2155_v50, %v2123_v14 }
0x10ae   : > { %v2534_v60 = vpop.permute.xlu1 %2533 }
0x10af   : > { %v2160_v53 = vmul.f32 %v2158_v8, %v2157_v11  ;;  %v2304_v11 = vld [vmem:[#allocation14 + $0x8] sm:$0xf] }
0x10b1   : > { %v6404_v55 = vadd.f32 %v2161_v51, %v2160_v53  ;;  %v2303_v51 = vld [vmem:[#allocation14 + $0x4] sm:$0xf]  ;;  %v2604_v53 = vsel %vm1115_vm4, %v2304_v11, 0 }
0x10b2   : > { %v2499_v52 = vsel %vm1115_vm4, %v2303_v51, 0  ;;  %v4938_v11 = vld [vmem:[#allocation17] sm:$0xff] }
0x10b3   : > { %v2164_v40 = vpack.c.bf16 %v6404_v55, %v6402_v54 }
0x10b5   : > { %4695 = vmatmul.msk.bf16.vlgmr.msrb.gmra.mxu1 %vm900_vm1, %v2164_v40 }
0x10b6   : > { %v2469_v61 = vpop.permute.xlu1 %2468 }
0x10b7   : > { %2489 = vmatpush.msra.mxu0 %v2469_v61 }
0x1132   : > { %v2190_v62 = vpop.f32.mrf.mxu1 }
0x1133   : > { %v2191_v0 = vadd.f32 %v2190_v62, %v2165_v63 }
0x1135   : > { %v2195_v37 = vmax.f32 %v2191_v0, 0.0 }
0x113a   : > { %v2192_v30 = vpop.f32.mrf.mxu1 }
0x113b   : > { %v2193_v1 = vadd.f32 %v2192_v30, %v2165_v63 }
0x113d   : > { %v2196_v32 = vmax.f32 %v2193_v1, 0.0 }
0x113f   : > { %v2197_v3 = vpack.c.bf16 %v2196_v32, %v2195_v37 }
0x1141   : > { %4712 = vmatmul.msk.bf16.vlgmr.msrb.gmra.mxu2 %vm1512_vm12, %v2197_v3 }
0x1142   : > { %4730 = vmatpush.xpose.msk.msrb.mxu2 %vm924_vm2, %v2536_v31 }
0x1151   : > { %4726 = vmatmul.msk.f32.vlgmr.msra.gmra.mxu2 %vm924_vm2, %v2429_v4 }
0x1152   : > { %2613 = vmatpush.bf16.msra.mxu2 %v2604_v53 }
0x1159   : > { %4731 = vmatmul.msk.f32.vlgmr.msrb.gmra.mxu2 %vm924_vm2, %v2534_v60 }
0x11c4   : > { %v6427_v5 = vpop.f32.mrf.mxu2 }
0x11cc   : > { %v6429_v7 = vpop.f32.mrf.mxu2 }
0x11d4   : > { %v2453_v15 = vpop.f32.mrf.mxu2 }
0x11d5   : > { %v2456_v17 = vsel %vm6431_vm14, %v2453_v15, -1e+30 }
0x11d6   : > { %v2457_v18 = vsel %vm924_vm2, %v2456_v17, -inf }
0x11d7   : > { %2458 = vmax.xlane.f32.xlu2 %v2457_v18 }
0x11dc   : > { %v2558_v19 = vpop.f32.mrf.mxu2 }
0x11dd   : > { %v2561_v20 = vsel %vm6431_vm14, %v2558_v19, -1e+30 }
0x11de   : > { %v2562_v21 = vsel %vm924_vm2, %v2561_v20, -inf }
0x11df   : > { %2563 = vmax.xlane.f32.xlu0 %v2562_v21 }
0x11ef   : > { %2363 = vrot.lane.b32.xlu2 %v6388_v28, %s5844_s25 }
0x11f7   : > { %2622 = vrot.lane.b32.xlu2 %v6388_v28, %s5848_s17 }
0x124a   : > { %v2459_v22 = vpop.xlane.xlu2 %2458 }
0x124b   : > { %v2460_v24 = vsub.f32 %v2456_v17, %v2459_v22  ;;  %v2198_v17 = vperm.slane %v6281_v34, 3 }
0x124d   : > { %v2461_v25 = vmul.f32 1.442695, %v2460_v24  ;;  %v2236_v19 = vadd.f32 %v6427_v5, %v2198_v17  ;;  %v2238_v24 = vadd.f32 %v6429_v7, %v2198_v17 }
0x124f   : > { %5295 = vpow2.f32 %v2461_v25  ;;  %v2240_v22 = vadd.f32 %v2236_v19, %v6402_v54 }
0x1251   : > { %v2242_v25 = vsel %vm900_vm1, %v2240_v22, 0.0 }
0x1252   : > { %v2364_v26 = vpop.permute.xlu2 %2363  ;;  %v2564_v27 = vpop.xlane.xlu0 %2563 }
0x1253   : > { %v2565_v29 = vsub.f32 %v2561_v20, %v2564_v27  ;;  %4722 = vmatpush.xpose.msk.msra.mxu3 %vm924_vm2, %v2364_v26  ;;  %v2241_v26 = vadd.f32 %v2238_v24, %v6404_v55  ;;  %v2302_v27 = vld [vmem:[#allocation14] sm:$0xf] }
0x1255   : > { %v5296_v33 = vpop.eup %5295  ;;  %v2566_v39 = vmul.f32 1.442695, %v2565_v29  ;;  %v2245_v34 = vsel %vm900_vm1, %v2241_v26, 0.0  ;;  %v2518_v29 = vsel %vm1115_vm4, %v2302_v27, 0 }
0x1256   : > { %4723 = vmatmul.msk.f32.vlgmr.msra.gmra.mxu3 %vm924_vm2, %v6388_v28  ;;  %v2463_v35 = vsel %vm924_vm2, %v5296_v33, 0.0 }
0x1257   : > { %5297 = vpow2.f32 %v2566_v39  ;;  %2464 = vadd.xlane.f32.xlu1 %v2463_v35  ;;  %2508 = vmatpush.bf16.msrb.mxu3 %v2499_v52 }
0x125a   : > { %v2623_v49 = vpop.permute.xlu2 %2622 }
0x125d   : > { %v5298_v36 = vpop.eup %5297 }
0x125e   : > { %v2568_v16 = vsel %vm924_vm2, %v5298_v36, 0.0 }
0x125f   : > { %2569 = vadd.xlane.f32.xlu0 %v2568_v16 }
0x1270   : > { %2620 = vrot.lane.b32.xlu1 %v6388_v28, %s5849_s21 }
0x1273   : > { %2573 = vrot.lane.b32.xlu0 %v6388_v28, %s5854_s26 }
0x12ca   : > { %v2465_v38 = vpop.xlane.xlu1 %2464 }
0x12cb   : > { %5299 = vrcp.f32 %v2465_v38 }
0x12d1   : > { %v5300_v41 = vpop.eup %5299 }
0x12d2   : > { %v2467_v42 = vmul.f32 %v5300_v41, %v5296_v33  ;;  %v2570_v43 = vpop.xlane.xlu0 %2569 }
0x12d3   : > { %5301 = vrcp.f32 %v2570_v43 }
0x12d4   : > { %4727 = vmatmul.msk.f32.vlgmr.msra.gmra.mxu0 %vm924_vm2, %v2467_v42 }
0x12d9   : > { %v2386_v44 = vpop.f32.mrf.mxu3  ;;  %v5302_v47 = vpop.eup %5301 }
0x12da   : > { %v2389_v45 = vsel %vm6431_vm14, %v2386_v44, -1e+30  ;;  %v2572_v8 = vmul.f32 %v5302_v47, %v5298_v36 }
0x12db   : > { %v2390_v46 = vsel %vm924_vm2, %v2389_v45, -inf }
0x12dc   : > { %2391 = vmax.xlane.f32.xlu0 %v2390_v46  ;;  %v2305_v46 = vld [vmem:[#allocation14 + $0xc] sm:$0xf] }
0x12dd   : > { %v2691_v47 = vsel %vm1115_vm4, %v2305_v46, 0 }
0x12e2   : > { %v2621_v50 = vpop.permute.xlu1 %2620 }
0x12e5   : > { %v2574_v48 = vpop.permute.xlu0 %2573 }
0x12e6   : > { %2594 = vmatpush.msrb.mxu0 %v2574_v48 }
0x12e7   : > { %4732 = vmatmul.msk.f32.vlgmr.msrb.gmra.mxu0 %vm924_vm2, %v2572_v8 }
0x12e8   : > { %4734 = vmatpush.xpose.msk.msra.mxu0 %vm924_vm2, %v2623_v49  ;;  %v4939_v49 = vld [vmem:[#allocation17 + $0x8] sm:$0xff] }
0x12ef   : > { %4735 = vmatmul.msk.f32.vlgmr.msra.gmra.mxu0 %vm924_vm2, %v2621_v50 }
0x12f0   : > { %2401 = vrot.lane.b32.xlu0 %v6388_v28, %s5850_s0 }
0x134f   : > { %v2392_v40 = vpop.xlane.xlu0 %2391 }
0x1350   : > { %v2393_v56 = vsub.f32 %v2389_v45, %v2392_v40 }
0x1351   : > { %v2491_v13 = vpop.f32.mrf.mxu0 }
0x1352   : > { %v2394_v57 = vmul.f32 1.442695, %v2393_v56  ;;  %v2494_v58 = vpack.c.bf16 %v2491_v13, %v2491_v13 }
0x1354   : > { %5303 = vpow2.f32 %v2394_v57  ;;  %4728 = vmatmul.msk.bf16.vlgmr.msrb.gmra.mxu3 %vm924_vm2, %v2494_v58 }
0x135a   : > { %v5304_v59 = vpop.eup %5303 }
0x135b   : > { %v2396_v60 = vsel %vm924_vm2, %v5304_v59, 0.0 }
0x135c   : > { %2397 = vadd.xlane.f32.xlu1 %v2396_v60 }
0x1362   : > { %v2402_v61 = vpop.permute.xlu0 %2401 }
0x1363   : > { %2422 = vmatpush.msra.mxu1 %v2402_v61 }
0x1364   : > { %v2596_v62 = vpop.f32.mrf.mxu0 }
0x1365   : > { %v2599_v63 = vpack.c.bf16 %v2596_v62, %v2596_v62  ;;  %2527 = vmatpush.bf16.msrb.mxu1 %v2518_v29 }
0x1367   : > { %4733 = vmatmul.msk.bf16.vlgmr.msra.gmra.mxu2 %vm924_vm2, %v2599_v63 }
0x136c   : > { %v2645_v0 = vpop.f32.mrf.mxu0 }
0x136d   : > { %v2648_v30 = vsel %vm6431_vm14, %v2645_v0, -1e+30 }
0x136e   : > { %v2649_v1 = vsel %vm924_vm2, %v2648_v30, -inf }
0x136f   : > { %2650 = vmax.xlane.f32.xlu2 %v2649_v1 }
0x1375   : > { %2660 = vrot.lane.b32.xlu1 %v6388_v28, %s6902_s3 }
0x13cf   : > { %v2398_v37 = vpop.xlane.xlu1 %2397 }
0x13d0   : > { %5305 = vrcp.f32 %v2398_v37 }
0x13d6   : > { %v5306_v32 = vpop.eup %5305 }
0x13d7   : > { %v2400_v3 = vmul.f32 %v5306_v32, %v5304_v59  ;;  %v6473_v31 = vpop.f32.mrf.mxu3 }
0x13d9   : > { %4724 = vmatmul.msk.f32.vlgmr.msra.gmra.mxu1 %vm924_vm2, %v2400_v3 }
0x13da   : > { %2700 = vmatpush.bf16.msra.mxu1 %v2691_v47 }
0x13df   : > { %v2512_v4 = vpop.f32.mrf.mxu3 }
0x13e0   : > { %v5375_v4 = vld [vmem:[#allocation11 + $0x8] sm:$0xff] }
0x13e1   : > { %v2289_v17 = vperm.slane %v5375_v4, 7 }
0x13e2   : > { %v2651_v6 = vpop.xlane.xlu2 %2650 }
0x13e3   : > { %v2652_v9 = vsub.f32 %v2648_v30, %v2651_v6  ;;  %v2286_v6 = vperm.slane %v5375_v4, 6 }
0x13e5   : > { %v2653_v10 = vmul.f32 1.442695, %v2652_v9 }
0x13e7   : > { %5307 = vpow2.f32 %v2653_v10  ;;  %v2661_v15 = vpop.permute.xlu1 %2660 }
0x13e8   : > { %2681 = vmatpush.msra.mxu3 %v2661_v15 }
0x13ea   : > { %v6477_v18 = vpop.f32.mrf.mxu2  ;;  %2789 = vmatpush.bf16.msrb.mxu3 %v4939_v49 }
0x13ed   : > { %v5308_v28 = vpop.eup %5307 }
0x13ee   : > { %v2655_v20 = vsel %vm924_vm2, %v5308_v28, 0.0  ;;  %2790 = vmatpush.bf16.msrb.mxu3 %v4938_v11  ;;  %v6531_v11 = vld [vmem:[%s6859_s16 + $0x8] sm:$0x1f] }
0x13ef   : > { %2656 = vadd.xlane.f32.xlu2 %v2655_v20 }
0x13f2   : > { %v2617_v21 = vpop.f32.mrf.mxu2 }
0x13f7   : > { %2243 = vadd.xlane.f32.xlu2 %v2242_v25 }
0x13ff   : > { %2246 = vadd.xlane.f32.xlu2 %v2245_v34  ;;  %v2707_v34 = vperm.slane %v6384_v23, 1 }
0x1456   : > { %v2424_v5 = vpop.f32.mrf.mxu1 }
0x1457   : > { %v2427_v33 = vpack.c.bf16 %v2424_v5, %v2424_v5 }
0x1459   : > { %4729 = vmatmul.msk.bf16.vlgmr.msrb.gmra.mxu1 %vm924_vm2, %v2427_v33 }
0x1462   : > { %v2657_v39 = vpop.xlane.xlu2 %2656 }
0x1463   : > { %5309 = vrcp.f32 %v2657_v39 }
0x1469   : > { %v5310_v54 = vpop.eup %5309 }
0x146a   : > { %v2659_v7 = vmul.f32 %v5310_v54, %v5308_v28  ;;  %v2244_v35 = vpop.xlane.xlu2 %2243 }
0x146b   : > { %v2248_v36 = vmul.f32 %v2244_v35, %v6238_v12 }
0x146c   : > { %4736 = vmatmul.msk.f32.vlgmr.msra.gmra.mxu3 %vm924_vm2, %v2659_v7  ;;  %v2767_v7 = vperm.slane %v6384_v23, 3 }
0x146d   : > { %v2250_v55 = vsub.f32 %v2240_v22, %v2248_v36 }
0x146f   : > { %v2252_v16 = vmul.f32 %v2250_v55, %v2250_v55 }
0x1471   : > { %v2254_v38 = vsel %vm900_vm1, %v2252_v16, 0.0 }
0x1472   : > { %2255 = vadd.xlane.f32.xlu2 %v2254_v38  ;;  %v2247_v41 = vpop.xlane.xlu2 %2246 }
0x1473   : > { %v2249_v42 = vmul.f32 %v2247_v41, %v6238_v12 }
0x1475   : > { %v2251_v43 = vsub.f32 %v2241_v26, %v2249_v42  ;;  %v4937_v42 = vld [vmem:[#allocation16 + $0x8] sm:$0xff] }
0x1476   : > { %2759 = vmatpush.bf16.msrb.mxu0 %v4937_v42 }
0x1477   : > { %v2253_v44 = vmul.f32 %v2251_v43, %v2251_v43 }
0x1479   : > { %v2257_v45 = vsel %vm900_vm1, %v2253_v44, 0.0 }
0x147a   : > { %2258 = vadd.xlane.f32.xlu1 %v2257_v45 }
0x14d6   : > { %v2529_v8 = vpop.f32.mrf.mxu1 }
0x14d7   : > { %v2530_v25 = vadd.f32 %v2529_v8, %v6473_v31 }
0x14d9   : > { %v2619_v26 = vadd.f32 %v6477_v18, %v2530_v25 }
0x14de   : > { %v2531_v48 = vpop.f32.mrf.mxu1 }
0x14e5   : > { %v2256_v50 = vpop.xlane.xlu2 %2255 }
0x14e6   : > { %v2260_v51 = vmul.f32 %v2256_v50, %v6238_v12 }
0x14e8   : > { %v2262_v52 = vadd.f32 1e-05, %v2260_v51 }
0x14ea   : > { %5311 = vrsqrt.f32 %v2262_v52  ;;  %vm2270_vm0 = vweird.f32 %v2262_v52 }
0x14ed   : > { %v2259_v53 = vpop.xlane.xlu1 %2258 }
0x14ee   : > { %v2261_v40 = vmul.f32 %v2259_v53, %v6238_v12 }
0x14ef   : > { %v2683_v56 = vpop.f32.mrf.mxu3 }
0x14f0   : > { %v5312_v13 = vpop.eup %5311  ;;  %v2263_v57 = vadd.f32 1e-05, %v2261_v40  ;;  %v2686_v58 = vpack.c.bf16 %v2683_v56, %v2683_v56  ;;  %v2732_v40 = vperm.slane %v6384_v23, 7 }
0x14f1   : > { %v2265_v59 = vmul.f32 %v5312_v13, %v2262_v52  ;;  %vm2271_vm15 = vweird.f32 %v5312_v13 }
0x14f2   : > { %5313 = vrsqrt.f32 %v2263_v57  ;;  %4737 = vmatmul.msk.bf16.vlgmr.msra.gmra.mxu1 %vm924_vm2, %v2686_v58  ;;  %vm2272_vm5 = vmor %vm2270_vm0, %vm2271_vm15  ;;  %vm2280_vm7 = vweird.f32 %v2263_v57 }
0x14f3   : > { %v2266_v60 = vmul.f32 %v5312_v13, %v2265_v59 }
0x14f5   : > { %v2267_v61 = vmul.f32 0.5, %v2266_v60 }
0x14f7   : > { %v2268_v62 = vsub.f32 1.5, %v2267_v61  ;;  %v2737_v61 = vperm.slane %v6384_v23, 2 }
0x14f8   : > { %v5314_v63 = vpop.eup %5313 }
0x14f9   : > { %v2269_v0 = vmul.f32 %v5312_v13, %v2268_v62  ;;  %v2275_v30 = vmul.f32 %v5314_v63, %v2263_v57  ;;  %vm2281_vm6 = vweird.f32 %v5314_v63 }
0x14fa   : > { %vm2282_vm8 = vmor %vm2280_vm7, %vm2281_vm6 }
0x14fb   : > { %v2276_v1 = vmul.f32 %v5314_v63, %v2275_v30  ;;  %v2273_v37 = vsel %vm2272_vm5, %v5312_v13, %v2269_v0  ;;  %v2734_v13 = vperm.slane %v6531_v11, 0 }
0x14fc   : > { %v2284_v9 = vmul.f32 %v2273_v37, %v2250_v55 }
0x14fd   : > { %v2277_v32 = vmul.f32 0.5, %v2276_v1 }
0x14fe   : > { %v2287_v28 = vmul.f32 %v2286_v6, %v2284_v9 }
0x14ff   : > { %v2278_v3 = vsub.f32 1.5, %v2277_v32 }
0x1500   : > { %v2290_v21 = vadd.f32 %v2289_v17, %v2287_v28 }
0x1501   : > { %v2279_v10 = vmul.f32 %v5314_v63, %v2278_v3 }
0x1503   : > { %v2283_v15 = vsel %vm2282_vm8, %v5314_v63, %v2279_v10 }
0x1504   : > { %v2285_v19 = vmul.f32 %v2283_v15, %v2251_v43  ;;  %v4936_v43 = vld [vmem:[#allocation16] sm:$0xff] }
0x1505   : > { %2760 = vmatpush.bf16.msrb.mxu0 %v4936_v43 }
0x1506   : > { %v2288_v20 = vmul.f32 %v2286_v6, %v2285_v19 }
0x1508   : > { %v2291_v22 = vadd.f32 %v2289_v17, %v2288_v20 }
0x150a   : > { %v6497_v24 = vpack.c.bf16 %v2291_v22, %v2290_v21 }
0x150c   : > { %4755 = vmatmul.msk.bf16.vlgmr.msrb.gmra.mxu3 %vm900_vm1, %v6497_v24 }
0x156f   : > { %v2702_v27 = vpop.f32.mrf.mxu1 }
0x1570   : > { %v2706_v29 = vadd.f32 %v2702_v27, %v2619_v26 }
0x1572   : > { %v2708_v5 = vadd.f32 %v2707_v34, %v2706_v29 }
0x1574   : > { %v2709_v33 = vadd.f32 %v2708_v5, %v6371_v2 }
0x1576   : > { %v2710_v39 = vsel %vm900_vm1, %v2709_v33, 0.0 }
0x1577   : > { %v2704_v54 = vpop.f32.mrf.mxu1  ;;  %2711 = vadd.xlane.f32.xlu0 %v2710_v39 }
0x158f   : > { %v2792_v35 = vpop.f32.mrf.mxu3 }
0x1590   : > { %v6507_v36 = vadd.f32 %v2792_v35, %v2767_v7 }
0x1592   : > { %2869 = vrot.lane.b32.xlu0 %v6507_v36, %s5846_s18 }
0x1597   : > { %v2794_v31 = vpop.f32.mrf.mxu3 }
0x1598   : > { %v6511_v18 = vadd.f32 %v2794_v31, %v2767_v7 }
0x159a   : > { %2982 = vrot.lane.b32.xlu1 %v6511_v18, %s5851_s24  ;;  %4756 = vmatpush.xpose.msk.msrb.mxu2 %vm924_vm2, %v6511_v18  ;;  %v5176_v15 = vpack.i.bf16 %v6507_v36, %v6511_v18 }
0x159e   : > { %4757 = vmatpush.xpose.msk.msrb.mxu2 %vm924_vm2, %v6507_v36 }
0x15ea   : > { %v2712_v2 = vpop.xlane.xlu0 %2711 }
0x15eb   : > { %v2713_v55 = vmul.f32 %v2712_v2, %v6238_v12 }
0x15ed   : > { %v2714_v16 = vsub.f32 %v2709_v33, %v2713_v55 }
0x15ef   : > { %v2715_v38 = vmul.f32 %v2714_v16, %v2714_v16 }
0x15f1   : > { %v2716_v41 = vsel %vm900_vm1, %v2715_v38, 0.0 }
0x15f2   : > { %2717 = vadd.xlane.f32.xlu2 %v2716_v41 }
0x1604   : > { %v2870_v48 = vpop.permute.xlu0 %2869 }
0x160a   : > { %2871 = vrot.lane.b32.xlu2 %v6511_v18, %s5846_s18 }
0x160c   : > { %v2983_v0 = vpop.permute.xlu1 %2982 }
0x1612   : > { %2980 = vrot.lane.b32.xlu2 %v6507_v36, %s5851_s24 }
0x1665   : > { %v2718_v44 = vpop.xlane.xlu2 %2717 }
0x1666   : > { %v2719_v45 = vmul.f32 %v2718_v44, %v6238_v12 }
0x1668   : > { %v2720_v46 = vadd.f32 1e-05, %v2719_v45 }
0x166a   : > { %5315 = vrsqrt.f32 %v2720_v46  ;;  %vm2727_vm10 = vweird.f32 %v2720_v46 }
0x166d   : > { %v2872_v47 = vpop.permute.xlu2 %2871 }
0x166e   : > { %4760 = vmatpush.xpose.msk.msra.mxu2 %vm924_vm2, %v2872_v47 }
0x1670   : > { %v5316_v8 = vpop.eup %5315 }
0x1671   : > { %v2722_v49 = vmul.f32 %v5316_v8, %v2720_v46  ;;  %vm2728_vm9 = vweird.f32 %v5316_v8 }
0x1672   : > { %4761 = vmatpush.xpose.msk.msra.mxu2 %vm924_vm2, %v2870_v48  ;;  %vm2729_vm11 = vmor %vm2727_vm10, %vm2728_vm9 }
0x1673   : > { %v2723_v50 = vmul.f32 %v5316_v8, %v2722_v49 }
0x1675   : > { %v2724_v51 = vmul.f32 0.5, %v2723_v50  ;;  %v2981_v30 = vpop.permute.xlu2 %2980  ;;  %v2315_v50 = vld [vmem:[#allocation19 + $0x4] sm:$0xf] }
0x1677   : > { %v2725_v52 = vsub.f32 1.5, %v2724_v51  ;;  %v2944_v51 = vsel %vm1115_vm4, %v2315_v50, 0 }
0x1678   : > { %2953 = vmatpush.bf16.msra.mxu3 %v2944_v51 }
0x1679   : > { %v2726_v53 = vmul.f32 %v5316_v8, %v2725_v52 }
0x167b   : > { %v2730_v56 = vsel %vm2729_vm11, %v5316_v8, %v2726_v53 }
0x167c   : > { %v2731_v57 = vmul.f32 %v2730_v56, %v2714_v16 }
0x167e   : > { %v2733_v58 = vmul.f32 %v2732_v40, %v2731_v57 }
0x1680   : > { %v6535_v59 = vadd.f32 %v2734_v13, %v2733_v58  ;;  %v2316_v58 = vld [vmem:[#allocation19 + $0x8] sm:$0xf] }
0x1682   : > { %v2736_v60 = vpack.c.bf16 %v6535_v59, %v6535_v59 }
0x1684   : > { %4746 = vmatmul.msk.bf16.vlgmr.msrb.gmra.mxu0 %vm900_vm1, %v2736_v60  ;;  %v3055_v60 = vsel %vm1115_vm4, %v2316_v58, 0  ;;  %v3191_v58 = vperm.slane %v6531_v11, 2 }
0x1701   : > { %v2762_v62 = vpop.f32.mrf.mxu0 }
0x1702   : > { %v2763_v63 = vadd.f32 %v2762_v62, %v2737_v61 }
0x1704   : > { %2867 = vrot.lane.b32.xlu2 %v2763_v63, %s5846_s18  ;;  %4758 = vmatmul.msk.f32.vlgmr.msrb.gmra.mxu2 %vm924_vm2, %v2763_v63 }
0x1705   : > { %4766 = vmatpush.xpose.msk.msrb.mxu2 %vm924_vm2, %v2983_v0 }
0x1709   : > { %4767 = vmatpush.xpose.msk.msrb.mxu2 %vm924_vm2, %v2981_v30  ;;  %v2764_v1 = vpop.f32.mrf.mxu0 }
0x170c   : > { %2978 = vrot.lane.b32.xlu2 %v2763_v63, %s5851_s24 }
0x175e   : > { %v2868_v37 = vpop.permute.xlu2 %2867 }
0x175f   : > { %4762 = vmatmul.msk.f32.vlgmr.msra.gmra.mxu2 %vm924_vm2, %v2868_v37  ;;  %v2314_v37 = vld [vmem:[#allocation19] sm:$0xf] }
0x1760   : > { %3064 = vmatpush.bf16.msra.mxu2 %v3055_v60 }
0x1766   : > { %v2979_v32 = vpop.permute.xlu2 %2978 }
0x1767   : > { %4768 = vmatmul.msk.f32.vlgmr.msrb.gmra.mxu2 %vm924_vm2, %v2979_v32  ;;  %v2963_v32 = vsel %vm1115_vm4, %v2314_v37, 0 }
0x1787   : > { %v2823_v3 = vpop.f32.mrf.mxu2 }
0x1788   : > { %v2826_v17 = vsel %vm956_vm3, %v2823_v3, -inf }
0x17e2   : > { %v2896_v4 = vpop.f32.mrf.mxu2 }
0x17e3   : > { %v2899_v6 = vsel %vm956_vm3, %v2896_v4, -inf }
0x17e4   : > { %2900 = vmax.xlane.f32.xlu0 %v2899_v6 }
0x17ea   : > { %v3007_v9 = vpop.f32.mrf.mxu2 }
0x17eb   : > { %v3010_v10 = vsel %vm956_vm3, %v3007_v9, -inf }
0x17ec   : > { %3011 = vmax.xlane.f32.xlu2 %v3010_v10 }
0x17f8   : > { %5177 = vrot.lane.b32.xlu0 %v5176_v15, %s5845_s22 }
0x1800   : > { %3073 = vrot.lane.b32.xlu0 %v6507_v36, %s5849_s21 }
0x1808   : > { %3071 = vrot.lane.b32.xlu0 %v2763_v63, %s5849_s21 }
0x1832   : > { %2827 = vmax.xlane.f32.xlu0 %v2826_v17 }
0x1846   : > { %5187 = vrot.lane.b32.xlu0 %v5176_v15, %s5844_s25 }
0x1857   : > { %v2901_v28 = vpop.xlane.xlu0 %2900 }
0x1858   : > { %v2902_v19 = vsub.f32 %v2896_v4, %v2901_v28 }
0x185a   : > { %v2903_v20 = vmul.f32 1.442695, %v2902_v19 }
0x185c   : > { %5317 = vpow2.f32 %v2903_v20 }
0x185f   : > { %v3012_v21 = vpop.xlane.xlu2 %3011 }
0x1860   : > { %v3013_v22 = vsub.f32 %v3007_v9, %v3012_v21 }
0x1862   : > { %v5318_v25 = vpop.eup %5317  ;;  %v3014_v26 = vmul.f32 1.442695, %v3013_v22 }
0x1863   : > { %v2905_v34 = vsel %vm956_vm3, %v5318_v25, 0.0 }
0x1864   : > { %5319 = vpow2.f32 %v3014_v26  ;;  %2906 = vadd.xlane.f32.xlu1 %v2905_v34 }
0x186a   : > { %v5320_v27 = vpop.eup %5319  ;;  %v5178_v29 = vpop.permute.xlu0 %5177 }
0x186b   : > { %v5179_v5 = vunpack.i.l.bf16 %v5178_v29  ;;  %v3016_v33 = vsel %vm956_vm3, %v5320_v27, 0.0  ;;  %v5180_v39 = vunpack.i.h.bf16 %v5178_v29 }
0x186c   : > { %3017 = vadd.xlane.f32.xlu2 %v3016_v33  ;;  %v2317_v33 = vld [vmem:[#allocation19 + $0xc] sm:$0xf] }
0x186d   : > { %2933 = vmatpush.msra.mxu0 %v5179_v5 }
0x186f   : > { %2934 = vmatpush.msra.mxu0 %v5180_v39  ;;  %v3148_v39 = vsel %vm1115_vm4, %v2317_v33, 0 }
0x1872   : > { %v3074_v54 = vpop.permute.xlu0 %3073 }
0x187a   : > { %v3072_v7 = vpop.permute.xlu0 %3071 }
0x187d   : > { %3075 = vrot.lane.b32.xlu1 %v6511_v18, %s5849_s21 }
0x1884   : > { %5182 = vrot.lane.b32.xlu2 %v5176_v15, %s5847_s5 }
0x18a5   : > { %v2828_v35 = vpop.xlane.xlu0 %2827 }
0x18a6   : > { %v2829_v36 = vsub.f32 %v2823_v3, %v2828_v35  ;;  %v3164_v35 = vperm.slane %v6384_v23, 4 }
0x18a8   : > { %v2830_v31 = vmul.f32 1.442695, %v2829_v36 }
0x18aa   : > { %5321 = vpow2.f32 %v2830_v31 }
0x18b0   : > { %v5322_v2 = vpop.eup %5321 }
0x18b1   : > { %v2832_v55 = vsel %vm956_vm3, %v5322_v2, 0.0 }
0x18b2   : > { %2833 = vadd.xlane.f32.xlu1 %v2832_v55 }
0x18b8   : > { %v5188_v16 = vpop.permute.xlu0 %5187 }
0x18b9   : > { %v5189_v38 = vunpack.i.l.bf16 %v5188_v16  ;;  %v5190_v41 = vunpack.i.h.bf16 %v5188_v16 }
0x18bb   : > { %2860 = vmatpush.msrb.mxu1 %v5189_v38 }
0x18bd   : > { %2861 = vmatpush.msrb.mxu1 %v5190_v41 }
0x18bf   : > { %2972 = vmatpush.bf16.msra.mxu1 %v2963_v32 }
0x18cb   : > { %5192 = vrot.lane.b32.xlu1 %v5176_v15, %s5848_s17 }
0x18d7   : > { %v2907_v18 = vpop.xlane.xlu1 %2906 }
0x18d8   : > { %5323 = vrcp.f32 %v2907_v18 }
0x18de   : > { %v5324_v42 = vpop.eup %5323 }
0x18df   : > { %v2909_v43 = vmul.f32 %v5324_v42, %v5318_v25  ;;  %v3018_v44 = vpop.xlane.xlu2 %3017 }
0x18e0   : > { %5325 = vrcp.f32 %v3018_v44 }
0x18e1   : > { %4763 = vmatmul.msk.f32.vlgmr.msra.gmra.mxu0 %vm956_vm3, %v2909_v43 }
0x18e6   : > { %v5326_v46 = vpop.eup %5325 }
0x18e7   : > { %v5183_v45 = vpop.permute.xlu2 %5182  ;;  %v3020_v48 = vmul.f32 %v5326_v46, %v5320_v27  ;;  %v4940_v46 = vld [vmem:[#allocation20] sm:$0xff] }
0x18e8   : > { %v5184_v47 = vunpack.i.l.bf16 %v5183_v45  ;;  %v5185_v8 = vunpack.i.h.bf16 %v5183_v45  ;;  %v4941_v45 = vld [vmem:[#allocation20 + $0x8] sm:$0xff] }
0x18ea   : > { %3044 = vmatpush.msrb.mxu0 %v5184_v47 }
0x18ec   : > { %3045 = vmatpush.msrb.mxu0 %v5185_v8 }
0x18ed   : > { %4769 = vmatmul.msk.f32.vlgmr.msrb.gmra.mxu0 %vm956_vm3, %v3020_v48  ;;  %v4944_v48 = vld [vmem:[%s6858_s15 + $0x10] sm:$0xff] }
0x18ef   : > { %v3076_v49 = vpop.permute.xlu1 %3075 }
0x18f0   : > { %4771 = vmatpush.xpose.msk.msra.mxu0 %vm924_vm2, %v3076_v49 }
0x18f4   : > { %4772 = vmatpush.xpose.msk.msra.mxu0 %vm924_vm2, %v3074_v54 }
0x18f7   : > { %4773 = vmatmul.msk.f32.vlgmr.msra.gmra.mxu0 %vm924_vm2, %v3072_v7 }
0x18f8   : > { %3216 = vmatpush.bf16.msrb.mxu0 %v4941_v45 }
0x18fc   : > { %3217 = vmatpush.bf16.msrb.mxu0 %v4940_v46 }
0x1925   : > { %v2834_v52 = vpop.xlane.xlu1 %2833 }
0x1926   : > { %5327 = vrcp.f32 %v2834_v52 }
0x192c   : > { %v5328_v53 = vpop.eup %5327 }
0x192d   : > { %v2836_v40 = vmul.f32 %v5328_v53, %v5322_v2 }
0x192f   : > { %4759 = vmatmul.msk.f32.vlgmr.msrb.gmra.mxu1 %vm956_vm3, %v2836_v40 }
0x1930   : > { %3157 = vmatpush.bf16.msrb.mxu1 %v3148_v39 }
0x193d   : > { %v5193_v56 = vpop.permute.xlu1 %5192 }
0x193e   : > { %v5194_v13 = vunpack.i.l.bf16 %v5193_v56  ;;  %v5195_v57 = vunpack.i.h.bf16 %v5193_v56 }
0x1940   : > { %3137 = vmatpush.msrb.mxu3 %v5194_v13  ;;  %v3189_v13 = vperm.slane %v6531_v11, 1 }
0x1942   : > { %3138 = vmatpush.msrb.mxu3 %v5195_v57 }
0x195e   : > { %v2936_v61 = vpop.f32.mrf.mxu0 }
0x195f   : > { %v2939_v62 = vpack.c.bf16 %v2936_v61, %v2936_v61 }
0x1961   : > { %4764 = vmatmul.msk.bf16.vlgmr.msra.gmra.mxu3 %vm924_vm2, %v2939_v62 }
0x196a   : > { %v3047_v63 = vpop.f32.mrf.mxu0 }
0x196b   : > { %v3050_v0 = vpack.c.bf16 %v3047_v63, %v3047_v63 }
0x196d   : > { %4770 = vmatmul.msk.bf16.vlgmr.msra.gmra.mxu2 %vm924_vm2, %v3050_v0  ;;  %v4943_v0 = vld [vmem:[%s6858_s15 + $0x8] sm:$0xff] }
0x1974   : > { %v3100_v30 = vpop.f32.mrf.mxu0 }
0x1975   : > { %v3103_v1 = vsel %vm956_vm3, %v3100_v30, -inf }
0x1976   : > { %3104 = vmax.xlane.f32.xlu2 %v3103_v1  ;;  %v3194_v1 = vperm.slane %v6384_v23, 5 }
0x19ac   : > { %v2863_v3 = vpop.f32.mrf.mxu1 }
0x19ad   : > { %v2866_v4 = vpack.c.bf16 %v2863_v3, %v2863_v3 }
0x19af   : > { %4765 = vmatmul.msk.bf16.vlgmr.msra.gmra.mxu1 %vm924_vm2, %v2866_v4 }
0x19e4   : > { %v2955_v6 = vpop.f32.mrf.mxu3 }
0x19e9   : > { %v3105_v9 = vpop.xlane.xlu2 %3104 }
0x19ea   : > { %v3106_v10 = vsub.f32 %v3100_v30, %v3105_v9  ;;  %v4942_v30 = vld [vmem:[%s6858_s15] sm:$0xff]  ;;  %v3225_v9 = vperm.slane %v6384_v23, 6 }
0x19ec   : > { %v3107_v15 = vmul.f32 1.442695, %v3106_v10  ;;  %v2957_v17 = vpop.f32.mrf.mxu3 }
0x19ee   : > { %5329 = vpow2.f32 %v3107_v15 }
0x19f0   : > { %v3066_v28 = vpop.f32.mrf.mxu2 }
0x19f4   : > { %v5330_v19 = vpop.eup %5329 }
0x19f5   : > { %v3109_v20 = vsel %vm956_vm3, %v5330_v19, 0.0 }
0x19f6   : > { %3110 = vadd.xlane.f32.xlu2 %v3109_v20 }
0x19f8   : > { %v3068_v21 = vpop.f32.mrf.mxu2 }
0x1a2c   : > { %v2974_v22 = vpop.f32.mrf.mxu1 }
0x1a2d   : > { %v2975_v25 = vadd.f32 %v2974_v22, %v2955_v6 }
0x1a2f   : > { %v3070_v26 = vadd.f32 %v3066_v28, %v2975_v25 }
0x1a34   : > { %v2976_v34 = vpop.f32.mrf.mxu1 }
0x1a35   : > { %v4947_v34 = vld [vmem:[#allocation13 + $0x18] sm:$0xff] }
0x1a36   : > { %3358 = vmatpush.bf16.msra.mxu3 %v4947_v34 }
0x1a69   : > { %v3111_v27 = vpop.xlane.xlu2 %3110 }
0x1a6a   : > { %5331 = vrcp.f32 %v3111_v27  ;;  %v4946_v27 = vld [vmem:[#allocation13 + $0x10] sm:$0xff] }
0x1a6b   : > { %3359 = vmatpush.bf16.msra.mxu3 %v4946_v27  ;;  %v3300_v27 = vld [vmem:[#allocation14 + $0x14] sm:$0xf] }
0x1a70   : > { %v5332_v29 = vpop.eup %5331 }
0x1a71   : > { %v3113_v5 = vmul.f32 %v5332_v29, %v5330_v19 }
0x1a73   : > { %4774 = vmatmul.msk.f32.vlgmr.msrb.gmra.mxu3 %vm956_vm3, %v3113_v5 }
0x1af6   : > { %v3140_v54 = vpop.f32.mrf.mxu3 }
0x1af7   : > { %v3143_v7 = vpack.c.bf16 %v3140_v54, %v3140_v54 }
0x1af9   : > { %4775 = vmatmul.msk.bf16.vlgmr.msrb.gmra.mxu1 %vm924_vm2, %v3143_v7 }
0x1b76   : > { %v3159_v36 = vpop.f32.mrf.mxu1 }
0x1b77   : > { %v3163_v31 = vadd.f32 %v3159_v36, %v3070_v26 }
0x1b79   : > { %v3165_v2 = vadd.f32 %v3164_v35, %v3163_v31  ;;  %v3289_v31 = vperm.slane %v6531_v11, 3 }
0x1b7b   : > { %v3166_v55 = vadd.f32 %v3165_v2, %v6535_v59  ;;  %v4945_v59 = vld [vmem:[%s6858_s15 + $0x18] sm:$0xff] }
0x1b7c   : > { %3257 = vmatpush.bf16.msrb.mxu2 %v4945_v59 }
0x1b7d   : > { %v3167_v16 = vsel %vm900_vm1, %v3166_v55, 0.0 }
0x1b7e   : > { %3168 = vadd.xlane.f32.xlu2 %v3167_v16  ;;  %v3161_v38 = vpop.f32.mrf.mxu1 }
0x1b80   : > { %3258 = vmatpush.bf16.msrb.mxu2 %v4944_v48 }
0x1b84   : > { %3259 = vmatpush.bf16.msrb.mxu2 %v4943_v0 }
0x1b88   : > { %3260 = vmatpush.bf16.msrb.mxu2 %v4942_v30 }
0x1bf1   : > { %v3169_v41 = vpop.xlane.xlu2 %3168 }
0x1bf2   : > { %v3170_v18 = vmul.f32 %v3169_v41, %v6238_v12 }
0x1bf4   : > { %v3171_v42 = vsub.f32 %v3166_v55, %v3170_v18  ;;  %v3291_v55 = vperm.slane %v6531_v11, 4 }
0x1bf6   : > { %v3172_v43 = vmul.f32 %v3171_v42, %v3171_v42 }
0x1bf8   : > { %v3173_v44 = vsel %vm900_vm1, %v3172_v43, 0.0 }
0x1bf9   : > { %3174 = vadd.xlane.f32.xlu2 %v3173_v44 }
0x1c6c   : > { %v3175_v47 = vpop.xlane.xlu2 %3174 }
0x1c6d   : > { %v3176_v8 = vmul.f32 %v3175_v47, %v6238_v12 }
0x1c6f   : > { %v3177_v49 = vadd.f32 1e-05, %v3176_v8 }
0x1c71   : > { %5333 = vrsqrt.f32 %v3177_v49  ;;  %vm3184_vm15 = vweird.f32 %v3177_v49 }
0x1c77   : > { %v5334_v50 = vpop.eup %5333 }
0x1c78   : > { %v3179_v51 = vmul.f32 %v5334_v50, %v3177_v49  ;;  %vm3185_vm13 = vweird.f32 %v5334_v50 }
0x1c79   : > { %vm3186_vm0 = vmor %vm3184_vm15, %vm3185_vm13 }
0x1c7a   : > { %v3180_v52 = vmul.f32 %v5334_v50, %v3179_v51 }
0x1c7c   : > { %v3181_v53 = vmul.f32 0.5, %v3180_v52 }
0x1c7e   : > { %v3182_v40 = vsub.f32 1.5, %v3181_v53 }
0x1c80   : > { %v3183_v56 = vmul.f32 %v5334_v50, %v3182_v40 }
0x1c82   : > { %v3187_v57 = vsel %vm3186_vm0, %v5334_v50, %v3183_v56 }
0x1c83   : > { %v3188_v60 = vmul.f32 %v3187_v57, %v3171_v42  ;;  %v6620_v42 = vld [vmem:[%s6859_s16 + $0x10] sm:$0xff] }
0x1c84   : > { %v3336_v43 = vperm.slane %v6620_v42, 0 }
0x1c85   : > { %v3190_v61 = vmul.f32 %v3189_v13, %v3188_v60 }
0x1c87   : > { %v3192_v62 = vadd.f32 %v3191_v58, %v3190_v61 }
0x1c89   : > { %v3193_v63 = vpack.c.bf16 %v3192_v62, %v3192_v62 }
0x1c8b   : > { %4784 = vmatmul.msk.bf16.vlgmr.msrb.gmra.mxu0 %vm900_vm1, %v3193_v63 }
0x1d08   : > { %v3219_v37 = vpop.f32.mrf.mxu0 }
0x1d09   : > { %v3220_v32 = vadd.f32 %v3219_v37, %v3194_v1 }
0x1d0b   : > { %v3223_v3 = vmax.f32 %v3220_v32, 0.0 }
0x1d0d   : > { %v3224_v4 = vpack.c.bf16 %v3223_v3, %v3223_v3 }
0x1d0f   : > { %4801 = vmatmul.msk.bf16.vlgmr.msrb.gmra.mxu2 %vm1512_vm12, %v3224_v4 }
0x1d10   : > { %v3221_v6 = vpop.f32.mrf.mxu0 }
0x1d92   : > { %v3262_v10 = vpop.f32.mrf.mxu2 }
0x1d93   : > { %v3263_v15 = vadd.f32 %v3262_v10, %v3225_v9 }
0x1d95   : > { %v3266_v17 = vadd.f32 %v3263_v15, %v3192_v62 }
0x1d97   : > { %v3267_v28 = vsel %vm900_vm1, %v3266_v17, 0.0 }
0x1d98   : > { %3268 = vadd.xlane.f32.xlu0 %v3267_v28 }
0x1d9a   : > { %v3264_v19 = vpop.f32.mrf.mxu2 }
0x1e0b   : > { %v3269_v20 = vpop.xlane.xlu0 %3268 }
0x1e0c   : > { %v3270_v21 = vmul.f32 %v3269_v20, %v6238_v12 }
0x1e0e   : > { %v3271_v22 = vsub.f32 %v3266_v17, %v3270_v21 }
0x1e10   : > { %v3272_v25 = vmul.f32 %v3271_v22, %v3271_v22 }
0x1e12   : > { %v3273_v26 = vsel %vm900_vm1, %v3272_v25, 0.0 }
0x1e13   : > { %3274 = vadd.xlane.f32.xlu2 %v3273_v26 }
0x1e86   : > { %v3275_v23 = vpop.xlane.xlu2 %3274 }
0x1e87   : > { %v3276_v29 = vmul.f32 %v3275_v23, %v6238_v12  ;;  %v3502_v23 = vsel %vm1115_vm4, %v3300_v27, 0  ;;  %v4948_v27 = vld [vmem:[#allocation16 + $0x10] sm:$0xff] }
0x1e88   : > { %3511 = vmatpush.bf16.msra.mxu2 %v3502_v23 }
0x1e89   : > { %v3277_v5 = vadd.f32 1e-05, %v3276_v29 }
0x1e8b   : > { %5335 = vrsqrt.f32 %v3277_v5  ;;  %vm3284_vm6 = vweird.f32 %v3277_v5 }
0x1e91   : > { %v5336_v33 = vpop.eup %5335 }
0x1e92   : > { %v3279_v39 = vmul.f32 %v5336_v33, %v3277_v5  ;;  %vm3285_vm5 = vweird.f32 %v5336_v33  ;;  %v3301_v5 = vld [vmem:[#allocation14 + $0x18] sm:$0xf] }
0x1e93   : > { %vm3286_vm7 = vmor %vm3284_vm6, %vm3285_vm5 }
0x1e94   : > { %v3280_v54 = vmul.f32 %v5336_v33, %v3279_v39 }
0x1e96   : > { %v3281_v7 = vmul.f32 0.5, %v3280_v54 }
0x1e98   : > { %v3282_v35 = vsub.f32 1.5, %v3281_v7 }
0x1e9a   : > { %v3283_v36 = vmul.f32 %v5336_v33, %v3282_v35 }
0x1e9c   : > { %v3287_v2 = vsel %vm3286_vm7, %v5336_v33, %v3283_v36  ;;  %v3607_v33 = vsel %vm1115_vm4, %v3301_v5, 0 }
0x1e9d   : > { %v3288_v16 = vmul.f32 %v3287_v2, %v3271_v22 }
0x1e9f   : > { %v3290_v38 = vmul.f32 %v3289_v31, %v3288_v16 }
0x1ea1   : > { %v6612_v41 = vadd.f32 %v3291_v55, %v3290_v38 }
0x1ea3   : > { %v3335_v18 = vpack.c.bf16 %v6612_v41, %v6612_v41 }
0x1ea5   : > { %4820 = vmatmul.msk.bf16.vlgmr.msra.gmra.mxu3 %vm900_vm1, %v3335_v18 }
0x1f28   : > { %v3361_v44 = vpop.f32.mrf.mxu3 }
0x1f29   : > { %v6623_v45 = vadd.f32 %v3361_v44, %v3336_v43 }
0x1f2b   : > { %3366 = vrot.lane.b32.xlu0 %v6623_v45, %s5844_s25  ;;  %3431 = vrot.lane.b32.xlu2 %v6623_v45, %s5846_s18 }
0x1f2c   : > { %3433 = vrot.lane.b32.xlu1 %v6623_v45, %s5845_s22 }
0x1f30   : > { %v3363_v11 = vpop.f32.mrf.mxu3 }
0x1f34   : > { %3538 = vrot.lane.b32.xlu1 %v6623_v45, %s5847_s5 }
0x1f3c   : > { %3536 = vrot.lane.b32.xlu1 %v6623_v45, %s5851_s24 }
0x1f85   : > { %v3432_v47 = vpop.permute.xlu2 %3431 }
0x1f9d   : > { %v3367_v46 = vpop.permute.xlu0 %3366 }
0x1f9e   : > { %v3434_v59 = vpop.permute.xlu1 %3433  ;;  %4821 = vmatpush.xpose.msk.msra.mxu1 %vm924_vm2, %v3367_v46 }
0x1f9f   : > { %4824 = vmatpush.xpose.msk.msrb.mxu3 %vm924_vm2, %v3434_v59 }
0x1fa1   : > { %4822 = vmatmul.msk.f32.vlgmr.msra.gmra.mxu1 %vm924_vm2, %v6623_v45 }
0x1fa2   : > { %4825 = vmatmul.msk.f32.vlgmr.msrb.gmra.mxu3 %vm924_vm2, %v3432_v47 }
0x1fa6   : > { %v3539_v8 = vpop.permute.xlu1 %3538 }
0x1fa7   : > { %4829 = vmatpush.xpose.msk.msra.mxu3 %vm924_vm2, %v3539_v8 }
0x1fab   : > { %3616 = vmatpush.bf16.msrb.mxu3 %v3607_v33 }
0x1fae   : > { %v3537_v48 = vpop.permute.xlu1 %3536 }
0x1faf   : > { %4830 = vmatmul.msk.f32.vlgmr.msra.gmra.mxu3 %vm924_vm2, %v3537_v48  ;;  %v3299_v48 = vld [vmem:[#allocation14 + $0x10] sm:$0xf] }
0x201e   : > { %v3389_v37 = vpop.f32.mrf.mxu1 }
0x201f   : > { %v3392_v32 = vsel %vm6431_vm14, %v3389_v37, -1e+30 }
0x2020   : > { %v3393_v3 = vsel %vm924_vm2, %v3392_v32, -inf }
0x2025   : > { %v3456_v49 = vpop.f32.mrf.mxu3 }
0x2026   : > { %v3459_v50 = vsel %vm6431_vm14, %v3456_v49, -1e+30  ;;  %v3521_v49 = vsel %vm1115_vm4, %v3299_v48, 0 }
0x2027   : > { %v3460_v51 = vsel %vm924_vm2, %v3459_v50, -inf }
0x2028   : > { %3461 = vmax.xlane.f32.xlu1 %v3460_v51 }
0x2032   : > { %v3561_v52 = vpop.f32.mrf.mxu3 }
0x2033   : > { %v3564_v53 = vsel %vm6431_vm14, %v3561_v52, -1e+30 }
0x2034   : > { %v3565_v40 = vsel %vm924_vm2, %v3564_v53, -inf }
0x2035   : > { %3566 = vmax.xlane.f32.xlu2 %v3565_v40  ;;  %v4951_v40 = vld [vmem:[#allocation17 + $0x18] sm:$0xff] }
0x204d   : > { %3471 = vrot.lane.b32.xlu2 %v6623_v45, %s5852_s23 }
0x2055   : > { %3625 = vrot.lane.b32.xlu2 %v6623_v45, %s5848_s17 }
0x209b   : > { %v3462_v56 = vpop.xlane.xlu1 %3461 }
0x209c   : > { %v3463_v13 = vsub.f32 %v3459_v50, %v3462_v56 }
0x209e   : > { %v3464_v57 = vmul.f32 1.442695, %v3463_v13 }
0x20a0   : > { %5337 = vpow2.f32 %v3464_v57  ;;  %v4950_v57 = vld [vmem:[#allocation17 + $0x10] sm:$0xff] }
0x20a6   : > { %v5338_v58 = vpop.eup %5337 }
0x20a7   : > { %v3466_v60 = vsel %vm924_vm2, %v5338_v58, 0.0 }
0x20a8   : > { %v3567_v61 = vpop.xlane.xlu2 %3566  ;;  %3467 = vadd.xlane.f32.xlu0 %v3466_v60  ;;  %v3302_v60 = vld [vmem:[#allocation14 + $0x1c] sm:$0xf] }
0x20a9   : > { %v3568_v62 = vsub.f32 %v3564_v53, %v3567_v61  ;;  %v3694_v61 = vsel %vm1115_vm4, %v3302_v60, 0 }
0x20ab   : > { %v3569_v63 = vmul.f32 1.442695, %v3568_v62 }
0x20ad   : > { %5339 = vpow2.f32 %v3569_v63 }
0x20b0   : > { %v3472_v0 = vpop.permute.xlu2 %3471 }
0x20b1   : > { %3492 = vmatpush.msrb.mxu1 %v3472_v0 }
0x20b3   : > { %v5340_v30 = vpop.eup %5339 }
0x20b4   : > { %v3571_v1 = vsel %vm924_vm2, %v5340_v30, 0.0 }
0x20b5   : > { %3572 = vadd.xlane.f32.xlu1 %v3571_v1 }
0x20b8   : > { %v3626_v19 = vpop.permute.xlu2 %3625 }
0x20bc   : > { %3623 = vrot.lane.b32.xlu0 %v6623_v45, %s5849_s21 }
0x20ce   : > { %3576 = vrot.lane.b32.xlu1 %v6623_v45, %s5854_s26 }
0x20f8   : > { %3394 = vmax.xlane.f32.xlu1 %v3393_v3 }
0x2111   : > { %3404 = vrot.lane.b32.xlu1 %v6623_v45, %s5850_s0 }
0x211b   : > { %v3468_v4 = vpop.xlane.xlu0 %3467 }
0x211c   : > { %5341 = vrcp.f32 %v3468_v4  ;;  %v3710_v4 = vperm.slane %v6620_v42, 1 }
0x2122   : > { %v5342_v6 = vpop.eup %5341 }
0x2123   : > { %v3470_v9 = vmul.f32 %v5342_v6, %v5338_v58 }
0x2125   : > { %4826 = vmatmul.msk.f32.vlgmr.msrb.gmra.mxu1 %vm924_vm2, %v3470_v9 }
0x2128   : > { %v3573_v10 = vpop.xlane.xlu1 %3572 }
0x2129   : > { %5343 = vrcp.f32 %v3573_v10 }
0x212e   : > { %v3624_v20 = vpop.permute.xlu0 %3623 }
0x212f   : > { %v5344_v15 = vpop.eup %5343 }
0x2130   : > { %v3575_v17 = vmul.f32 %v5344_v15, %v5340_v30  ;;  %v3769_v30 = vperm.slane %v6620_v42, 3 }
0x2140   : > { %v3577_v28 = vpop.permute.xlu1 %3576 }
0x2141   : > { %3597 = vmatpush.msra.mxu1 %v3577_v28 }
0x2142   : > { %4831 = vmatmul.msk.f32.vlgmr.msra.gmra.mxu1 %vm924_vm2, %v3575_v17 }
0x2143   : > { %4833 = vmatpush.xpose.msk.msrb.mxu1 %vm924_vm2, %v3626_v19 }
0x214a   : > { %4834 = vmatmul.msk.f32.vlgmr.msrb.gmra.mxu1 %vm924_vm2, %v3624_v20 }
0x216b   : > { %v3395_v21 = vpop.xlane.xlu1 %3394 }
0x216c   : > { %v3396_v22 = vsub.f32 %v3392_v32, %v3395_v21 }
0x216e   : > { %v3397_v25 = vmul.f32 1.442695, %v3396_v22 }
0x2170   : > { %5345 = vpow2.f32 %v3397_v25 }
0x2176   : > { %v5346_v26 = vpop.eup %5345 }
0x2177   : > { %v3399_v34 = vsel %vm924_vm2, %v5346_v26, 0.0 }
0x2178   : > { %3400 = vadd.xlane.f32.xlu0 %v3399_v34  ;;  %v4949_v34 = vld [vmem:[#allocation16 + $0x18] sm:$0xff] }
0x2179   : > { %3762 = vmatpush.bf16.msra.mxu1 %v4949_v34 }
0x217d   : > { %3763 = vmatpush.bf16.msra.mxu1 %v4948_v27 }
0x2183   : > { %v3405_v29 = vpop.permute.xlu1 %3404 }
0x2184   : > { %3425 = vmatpush.msra.mxu0 %v3405_v29 }
0x2186   : > { %3530 = vmatpush.bf16.msrb.mxu0 %v3521_v49 }
0x21a2   : > { %v3494_v39 = vpop.f32.mrf.mxu1 }
0x21a3   : > { %v3497_v54 = vpack.c.bf16 %v3494_v39, %v3494_v39 }
0x21a5   : > { %4827 = vmatmul.msk.bf16.vlgmr.msra.gmra.mxu2 %vm924_vm2, %v3497_v54 }
0x21bf   : > { %v3599_v7 = vpop.f32.mrf.mxu1 }
0x21c0   : > { %v3602_v35 = vpack.c.bf16 %v3599_v7, %v3599_v7 }
0x21c2   : > { %4832 = vmatmul.msk.bf16.vlgmr.msrb.gmra.mxu3 %vm924_vm2, %v3602_v35 }
0x21c7   : > { %v3648_v36 = vpop.f32.mrf.mxu1 }
0x21c8   : > { %v3651_v31 = vsel %vm6431_vm14, %v3648_v36, -1e+30 }
0x21c9   : > { %v3652_v2 = vsel %vm924_vm2, %v3651_v31, -inf }
0x21ca   : > { %3653 = vmax.xlane.f32.xlu2 %v3652_v2 }
0x21eb   : > { %v3401_v55 = vpop.xlane.xlu0 %3400 }
0x21ec   : > { %5347 = vrcp.f32 %v3401_v55  ;;  %v3735_v55 = vperm.slane %v6620_v42, 7 }
0x21f2   : > { %v5348_v16 = vpop.eup %5347 }
0x21f3   : > { %v3403_v38 = vmul.f32 %v5348_v16, %v5346_v26 }
0x21f5   : > { %4823 = vmatmul.msk.f32.vlgmr.msra.gmra.mxu0 %vm924_vm2, %v3403_v38 }
0x21f6   : > { %3703 = vmatpush.bf16.msra.mxu0 %v3694_v61 }
0x2228   : > { %v3513_v18 = vpop.f32.mrf.mxu2 }
0x2230   : > { %v3515_v43 = vpop.f32.mrf.mxu2 }
0x223d   : > { %v3654_v44 = vpop.xlane.xlu2 %3653 }
0x223e   : > { %v3655_v11 = vsub.f32 %v3651_v31, %v3654_v44  ;;  %v6717_v31 = vld [vmem:[%s6859_s16 + $0x18] sm:$0x1f] }
0x223f   : > { %v3737_v38 = vperm.slane %v6717_v31, 0 }
0x2240   : > { %v3656_v46 = vmul.f32 1.442695, %v3655_v11 }
0x2242   : > { %5349 = vpow2.f32 %v3656_v46  ;;  %v3740_v46 = vperm.slane %v6620_v42, 2 }
0x2245   : > { %v3618_v59 = vpop.f32.mrf.mxu3 }
0x2248   : > { %v5350_v47 = vpop.eup %5349 }
0x2249   : > { %v3658_v14 = vsel %vm924_vm2, %v5350_v47, 0.0 }
0x224a   : > { %3659 = vadd.xlane.f32.xlu2 %v3658_v14 }
0x224d   : > { %v3620_v8 = vpop.f32.mrf.mxu3 }
0x2262   : > { %3663 = vrot.lane.b32.xlu2 %v6623_v45, %s6902_s3 }
0x2272   : > { %v3427_v50 = vpop.f32.mrf.mxu0 }
0x2273   : > { %v3430_v51 = vpack.c.bf16 %v3427_v50, %v3427_v50 }
0x2275   : > { %4828 = vmatmul.msk.bf16.vlgmr.msrb.gmra.mxu0 %vm924_vm2, %v3430_v51 }
0x22bd   : > { %v3660_v52 = vpop.xlane.xlu2 %3659 }
0x22be   : > { %5351 = vrcp.f32 %v3660_v52 }
0x22c4   : > { %v5352_v53 = vpop.eup %5351 }
0x22c5   : > { %v3662_v56 = vmul.f32 %v5352_v53, %v5350_v47  ;;  %v3664_v13 = vpop.permute.xlu2 %3663 }
0x22c6   : > { %3684 = vmatpush.msrb.mxu2 %v3664_v13 }
0x22c7   : > { %4835 = vmatmul.msk.f32.vlgmr.msrb.gmra.mxu2 %vm924_vm2, %v3662_v56 }
0x22c8   : > { %3788 = vmatpush.bf16.msra.mxu2 %v4951_v40 }
0x22cc   : > { %3789 = vmatpush.bf16.msra.mxu2 %v4950_v57 }
0x22cf   : > { %4854 = vmatmul.msk.bf16.vlgmr.msra.gmra.mxu2 %vm900_vm1, %v6497_v24 }
0x22f2   : > { %v3532_v45 = vpop.f32.mrf.mxu0 }
0x22f3   : > { %v3533_v32 = vadd.f32 %v3532_v45, %v3513_v18 }
0x22f5   : > { %v3622_v3 = vadd.f32 %v3618_v59, %v3533_v32 }
0x22fa   : > { %v3534_v58 = vpop.f32.mrf.mxu0 }
0x234a   : > { %v3686_v62 = vpop.f32.mrf.mxu2 }
0x234b   : > { %v3689_v63 = vpack.c.bf16 %v3686_v62, %v3686_v62 }
0x234d   : > { %4836 = vmatmul.msk.bf16.vlgmr.msra.gmra.mxu0 %vm924_vm2, %v3689_v63 }
0x2352   : > { %v3791_v0 = vpop.f32.mrf.mxu2 }
0x2353   : > { %v6693_v24 = vadd.f32 %v3791_v0, %v3769_v30 }
0x235a   : > { %v3793_v1 = vpop.f32.mrf.mxu2 }
0x235b   : > { %v6687_v37 = vadd.f32 %v3793_v1, %v3769_v30 }
0x235d   : > { %4855 = vmatpush.xpose.msk.msra.mxu3 %vm924_vm2, %v6687_v37  ;;  %3870 = vrot.lane.b32.xlu1 %v6687_v37, %s5846_s18 }
0x2361   : > { %4856 = vmatpush.xpose.msk.msra.mxu3 %vm924_vm2, %v6693_v24 }
0x2365   : > { %3981 = vrot.lane.b32.xlu1 %v6687_v37, %s5851_s24 }
0x23ca   : > { %v3705_v6 = vpop.f32.mrf.mxu0 }
0x23cb   : > { %v3709_v9 = vadd.f32 %v3705_v6, %v3622_v3 }
0x23cd   : > { %v3711_v10 = vadd.f32 %v3710_v4, %v3709_v9 }
0x23cf   : > { %v3871_v15 = vpop.permute.xlu1 %3870  ;;  %v3712_v17 = vadd.f32 %v3711_v10, %v6612_v41  ;;  %v6709_v41 = vpack.i.bf16 %v6693_v24, %v6687_v37 }
0x23d0   : > { %4859 = vmatpush.xpose.msk.msrb.mxu3 %vm924_vm2, %v3871_v15 }
0x23d1   : > { %v3713_v28 = vsel %vm900_vm1, %v3712_v17, 0.0 }
0x23d2   : > { %v3707_v19 = vpop.f32.mrf.mxu0  ;;  %3714 = vadd.xlane.f32.xlu0 %v3713_v28 }
0x23d7   : > { %v3982_v14 = vpop.permute.xlu1 %3981 }
0x2445   : > { %v3715_v20 = vpop.xlane.xlu0 %3714 }
0x2446   : > { %v3716_v21 = vmul.f32 %v3715_v20, %v6238_v12 }
0x2448   : > { %v3717_v22 = vsub.f32 %v3712_v17, %v3716_v21 }
0x244a   : > { %v3718_v25 = vmul.f32 %v3717_v22, %v3717_v22 }
0x244c   : > { %v3719_v26 = vsel %vm900_vm1, %v3718_v25, 0.0 }
0x244d   : > { %3720 = vadd.xlane.f32.xlu0 %v3719_v26 }
0x2461   : > { %3868 = vrot.lane.b32.xlu0 %v6693_v24, %s5846_s18 }
0x2469   : > { %5202 = vrot.lane.b32.xlu0 %v6709_v41, %s5847_s5 }
0x24c0   : > { %v3721_v23 = vpop.xlane.xlu0 %3720 }
0x24c1   : > { %v3722_v29 = vmul.f32 %v3721_v23, %v6238_v12 }
0x24c3   : > { %v3723_v5 = vadd.f32 1e-05, %v3722_v29  ;;  %v3315_v29 = vld [vmem:[#allocation19 + $0x14] sm:$0xf] }
0x24c5   : > { %5353 = vrsqrt.f32 %v3723_v5  ;;  %vm3730_vm8 = vweird.f32 %v3723_v5 }
0x24cb   : > { %v5354_v33 = vpop.eup %5353 }
0x24cc   : > { %v3725_v39 = vmul.f32 %v5354_v33, %v3723_v5  ;;  %vm3731_vm14 = vweird.f32 %v5354_v33  ;;  %v3943_v5 = vsel %vm1115_vm4, %v3315_v29, 0 }
0x24cd   : > { %vm3732_vm9 = vmor %vm3730_vm8, %vm3731_vm14  ;;  %3952 = vmatpush.bf16.msrb.mxu2 %v3943_v5 }
0x24ce   : > { %v3726_v54 = vmul.f32 %v5354_v33, %v3725_v39 }
0x24d0   : > { %v3727_v7 = vmul.f32 0.5, %v3726_v54 }
0x24d2   : > { %v3728_v35 = vsub.f32 1.5, %v3727_v7 }
0x24d3   : > { %v3869_v36 = vpop.permute.xlu0 %3868 }
0x24d4   : > { %v3729_v2 = vmul.f32 %v5354_v33, %v3728_v35  ;;  %4860 = vmatpush.xpose.msk.msrb.mxu3 %vm924_vm2, %v3869_v36 }
0x24d6   : > { %v3733_v16 = vsel %vm3732_vm9, %v5354_v33, %v3729_v2  ;;  %v3316_v33 = vld [vmem:[#allocation19 + $0x18] sm:$0xf] }
0x24d7   : > { %v3734_v18 = vmul.f32 %v3733_v16, %v3717_v22  ;;  %v4054_v39 = vsel %vm1115_vm4, %v3316_v33, 0 }
0x24d9   : > { %v3736_v43 = vmul.f32 %v3735_v55, %v3734_v18 }
0x24db   : > { %v6722_v44 = vadd.f32 %v3737_v38, %v3736_v43  ;;  %v5203_v60 = vpop.permute.xlu0 %5202 }
0x24dc   : > { %v5204_v0 = vunpack.i.l.bf16 %v5203_v60  ;;  %v5205_v1 = vunpack.i.h.bf16 %v5203_v60 }
0x24dd   : > { %v3739_v11 = vpack.c.bf16 %v6722_v44, %v6722_v44 }
0x24df   : > { %4845 = vmatmul.msk.bf16.vlgmr.msra.gmra.mxu1 %vm900_vm1, %v3739_v11 }
0x255c   : > { %v3765_v59 = vpop.f32.mrf.mxu1 }
0x255d   : > { %v3766_v47 = vadd.f32 %v3765_v59, %v3740_v46 }
0x255f   : > { %3977 = vrot.lane.b32.xlu1 %v3766_v47, %s5851_s24  ;;  %3866 = vrot.lane.b32.xlu2 %v3766_v47, %s5846_s18 }
0x2560   : > { %4857 = vmatmul.msk.f32.vlgmr.msra.gmra.mxu3 %vm924_vm2, %v3766_v47 }
0x2561   : > { %4865 = vmatpush.xpose.msk.msra.mxu3 %vm924_vm2, %v3982_v14 }
0x2564   : > { %v3767_v8 = vpop.f32.mrf.mxu1 }
0x2567   : > { %3979 = vrot.lane.b32.xlu2 %v6693_v24, %s5851_s24  ;;  %s807_s24 = scalar_lea.vmem [#allocation22], %s4562_s20 }
0x2568   : > { %s4343_s26 = sshll.u32 %s807_s24, 4  ;;  %s4344_s26 = int_to_ptr.vmem [resolvable:$true] %s4343_s26 }
0x25b9   : > { %v3867_v48 = vpop.permute.xlu2 %3866 }
0x25ba   : > { %4861 = vmatmul.msk.f32.vlgmr.msrb.gmra.mxu3 %vm924_vm2, %v3867_v48 }
0x25c1   : > { %v3980_v49 = vpop.permute.xlu2 %3979 }
0x25c2   : > { %4866 = vmatpush.xpose.msk.msra.mxu3 %vm924_vm2, %v3980_v49 }
0x25c6   : > { %4063 = vmatpush.bf16.msrb.mxu3 %v4054_v39 }
0x25d1   : > { %v3978_v50 = vpop.permute.xlu1 %3977 }
0x25d2   : > { %4867 = vmatmul.msk.f32.vlgmr.msra.gmra.mxu3 %vm924_vm2, %v3978_v50 }
0x25e3   : > { %v3822_v51 = vpop.f32.mrf.mxu3 }
0x25e4   : > { %v3825_v10 = vsel %vm956_vm3, %v3822_v51, -inf }
0x263d   : > { %v3895_v52 = vpop.f32.mrf.mxu3 }
0x263e   : > { %v3898_v53 = vsel %vm956_vm3, %v3895_v52, -inf }
0x263f   : > { %3899 = vmax.xlane.f32.xlu2 %v3898_v53 }
0x2655   : > { %v4006_v40 = vpop.f32.mrf.mxu3 }
0x2656   : > { %v4009_v56 = vsel %vm956_vm3, %v4006_v40, -inf }
0x2657   : > { %5197 = vrot.lane.b32.xlu2 %v6709_v41, %s5845_s22  ;;  %4010 = vmax.xlane.f32.xlu1 %v4009_v56  ;;  %v3314_v56 = vld [vmem:[#allocation19 + $0x10] sm:$0xf] }
0x265f   : > { %4070 = vrot.lane.b32.xlu2 %v3766_v47, %s5849_s21 }
0x26b2   : > { %v3900_v13 = vpop.xlane.xlu2 %3899 }
0x26b3   : > { %v3901_v57 = vsub.f32 %v3895_v52, %v3900_v13  ;;  %v3962_v13 = vsel %vm1115_vm4, %v3314_v56, 0 }
0x26b5   : > { %v3902_v45 = vmul.f32 1.442695, %v3901_v57 }
0x26b7   : > { %5355 = vpow2.f32 %v3902_v45 }
0x26ba   : > { %v5198_v58 = vpop.permute.xlu2 %5197 }
0x26bb   : > { %v5199_v61 = vunpack.i.l.bf16 %v5198_v58  ;;  %v5200_v63 = vunpack.i.h.bf16 %v5198_v58 }
0x26bd   : > { %v5356_v62 = vpop.eup %5355  ;;  %3932 = vmatpush.msrb.mxu1 %v5199_v61 }
0x26be   : > { %v3904_v30 = vsel %vm956_vm3, %v5356_v62, 0.0 }
0x26bf   : > { %3905 = vadd.xlane.f32.xlu0 %v3904_v30  ;;  %3933 = vmatpush.msrb.mxu1 %v5200_v63 }
0x26c1   : > { %4043 = vmatpush.msra.mxu1 %v5204_v0 }
0x26c3   : > { %4044 = vmatpush.msra.mxu1 %v5205_v1 }
0x26ca   : > { %v4011_v32 = vpop.xlane.xlu1 %4010 }
0x26cb   : > { %v4012_v3 = vsub.f32 %v4006_v40, %v4011_v32 }
0x26cd   : > { %v4013_v4 = vmul.f32 1.442695, %v4012_v3 }
0x26cf   : > { %5357 = vpow2.f32 %v4013_v4 }
0x26d3   : > { %4072 = vrot.lane.b32.xlu0 %v6693_v24, %s5849_s21 }
0x26d5   : > { %v5358_v6 = vpop.eup %5357 }
0x26d6   : > { %v4015_v9 = vsel %vm956_vm3, %v5358_v6, 0.0 }
0x26d7   : > { %4016 = vadd.xlane.f32.xlu1 %v4015_v9 }
0x26f0   : > { %4074 = vrot.lane.b32.xlu1 %v6687_v37, %s5849_s21  ;;  %v4071_v37 = vpop.permute.xlu2 %4070  ;;  %s6910_s21 = sld [smem:[#allocation46_spill]] }
0x26fd   : > { %3826 = vmax.xlane.f32.xlu0 %v3825_v10 }
0x2732   : > { %v3906_v15 = vpop.xlane.xlu0 %3905 }
0x2733   : > { %5359 = vrcp.f32 %v3906_v15 }
0x2739   : > { %v5360_v17 = vpop.eup %5359 }
0x273a   : > { %v3908_v28 = vmul.f32 %v5360_v17, %v5356_v62  ;;  %v3317_v62 = vld [vmem:[#allocation19 + $0x1c] sm:$0xf] }
0x273b   : > { %v4147_v63 = vsel %vm1115_vm4, %v3317_v62, 0 }
0x273c   : > { %4862 = vmatmul.msk.f32.vlgmr.msrb.gmra.mxu1 %vm956_vm3, %v3908_v28 }
0x2745   : > { %v4073_v22 = vpop.permute.xlu0 %4072 }
0x274a   : > { %v4017_v19 = vpop.xlane.xlu1 %4016 }
0x274b   : > { %5361 = vrcp.f32 %v4017_v19 }
0x2751   : > { %v5362_v20 = vpop.eup %5361 }
0x2752   : > { %v4019_v24 = vmul.f32 %v5362_v20, %v5358_v6  ;;  %v4163_v6 = vperm.slane %v6620_v42, 4 }
0x2754   : > { %4868 = vmatmul.msk.f32.vlgmr.msra.gmra.mxu1 %vm956_vm3, %v4019_v24 }
0x2762   : > { %v4075_v21 = vpop.permute.xlu1 %4074 }
0x2763   : > { %4870 = vmatpush.xpose.msk.msrb.mxu1 %vm924_vm2, %v4075_v21 }
0x2767   : > { %4871 = vmatpush.xpose.msk.msrb.mxu1 %vm924_vm2, %v4073_v22 }
0x276a   : > { %4872 = vmatmul.msk.f32.vlgmr.msrb.gmra.mxu1 %vm924_vm2, %v4071_v37 }
0x2770   : > { %v3827_v25 = vpop.xlane.xlu0 %3826 }
0x2771   : > { %v3828_v26 = vsub.f32 %v3822_v51, %v3827_v25  ;;  %v4953_v25 = vld [vmem:[#allocation20 + $0x18] sm:$0xff] }
0x2772   : > { %4215 = vmatpush.bf16.msra.mxu1 %v4953_v25 }
0x2773   : > { %v3829_v34 = vmul.f32 1.442695, %v3828_v26  ;;  %v4952_v26 = vld [vmem:[#allocation20 + $0x10] sm:$0xff] }
0x2775   : > { %5363 = vpow2.f32 %v3829_v34 }
0x2776   : > { %4216 = vmatpush.bf16.msra.mxu1 %v4952_v26 }
0x277b   : > { %v5364_v27 = vpop.eup %5363 }
0x277c   : > { %v3831_v23 = vsel %vm956_vm3, %v5364_v27, 0.0 }
0x277d   : > { %3832 = vadd.xlane.f32.xlu1 %v3831_v23  ;;  %v4956_v23 = vld [vmem:[%s6858_s15 + $0x30] sm:$0xff] }
0x2796   : > { %5212 = vrot.lane.b32.xlu1 %v6709_v41, %s5848_s17 }
0x27b9   : > { %v3935_v54 = vpop.f32.mrf.mxu1 }
0x27ba   : > { %v3938_v7 = vpack.c.bf16 %v3935_v54, %v3935_v54 }
0x27bc   : > { %4863 = vmatmul.msk.bf16.vlgmr.msrb.gmra.mxu2 %vm924_vm2, %v3938_v7 }
0x27d1   : > { %v4046_v35 = vpop.f32.mrf.mxu1 }
0x27d2   : > { %v4049_v36 = vpack.c.bf16 %v4046_v35, %v4046_v35 }
0x27d4   : > { %4869 = vmatmul.msk.bf16.vlgmr.msrb.gmra.mxu3 %vm924_vm2, %v4049_v36  ;;  %v4188_v36 = vperm.slane %v6717_v31, 1 }
0x27e7   : > { %v4099_v2 = vpop.f32.mrf.mxu1 }
0x27e8   : > { %v4102_v55 = vsel %vm956_vm3, %v4099_v2, -inf }
0x27e9   : > { %4103 = vmax.xlane.f32.xlu2 %v4102_v55  ;;  %v4190_v55 = vperm.slane %v6717_v31, 2 }
0x27f0   : > { %v3833_v16 = vpop.xlane.xlu1 %3832 }
0x27f1   : > { %5365 = vrcp.f32 %v3833_v16 }
0x27f7   : > { %v5366_v50 = vpop.eup %5365 }
0x2801   : > { %5207 = vrot.lane.b32.xlu2 %v6709_v41, %s5844_s25  ;;  %v3835_v41 = vmul.f32 %v5366_v50, %v5364_v27  ;;  %v4224_v50 = vperm.slane %v6620_v42, 6  ;;  %s6908_s25 = sld [smem:[#allocation47_spill]] }
0x2807   : > { %s4341_s18 = scalar_lea.hbm %s6908_s25, %s4911_s30  ;;  %s5756_s30 = scalar_lea.hbm %s6908_s25, 16 }
0x2808   : > { %v5213_v38 = vpop.permute.xlu1 %5212  ;;  %s4345_s3 = sshll.u32 %s4341_s18, 4  ;;  %s4346_s3 = int_to_ptr.hbm [resolvable:$true] %s4345_s3 }
0x2809   : > { %v5214_v18 = vunpack.i.l.bf16 %v5213_v38  ;;  %v5215_v43 = vunpack.i.h.bf16 %v5213_v38  ;;  %s5750_s1 = sshra.s32 %s4346_s3, 4  ;;  %s5751_s1 = int_to_ptr.hbm [resolvable:$true] %s5750_s1 }
0x280a   : > { %s5752_s19 = scalar_lea.hbm %s5751_s1, 8  ;;  %p5757_p3 = scmp.lt.s32.totalorder %s5751_s1, %s6908_s25 }
0x280b   : > { %4136 = vmatpush.msra.mxu2 %v5214_v18  ;;  %p5753_p0 = scmp.ne.s32.totalorder %s5751_s1, %s5752_s19  ;;  %p5758_p4 = scmp.lt.s32.totalorder %s5756_s30, %s5752_s19 }
0x280d   : > { %4137 = vmatpush.msra.mxu2 %v5215_v43  ;;  %p5754_p1 = pnand %p5753_p0, %p5994_p5  ;;  %p5759_p7 = por %p5758_p4, %p5757_p3 }
0x280f   : > { %p5755_p2 = pneg %p5754_p1 }
0x2811   : > { %p5760_p8 = pnand %p5759_p7, %p5755_p2 }
0x283f   : > { %v3954_v11 = vpop.f32.mrf.mxu2 }
0x2847   : > { %v3956_v46 = vpop.f32.mrf.mxu2 }
0x2848   : > { %v4954_v46 = vld [vmem:[%s6858_s15 + $0x20] sm:$0xff] }
0x2857   : > { %v4065_v59 = vpop.f32.mrf.mxu3 }
0x285c   : > { %v4104_v47 = vpop.xlane.xlu2 %4103 }
0x285d   : > { %v4105_v14 = vsub.f32 %v4099_v2, %v4104_v47 }
0x285f   : > { %v4106_v8 = vmul.f32 1.442695, %v4105_v14  ;;  %v4067_v48 = vpop.f32.mrf.mxu3 }
0x2861   : > { %5367 = vpow2.f32 %v4106_v8 }
0x2864   : > { %v5208_v49 = vpop.permute.xlu2 %5207 }
0x2865   : > { %v5209_v51 = vunpack.i.l.bf16 %v5208_v49  ;;  %v5210_v53 = vunpack.i.h.bf16 %v5208_v49 }
0x2867   : > { %v5368_v52 = vpop.eup %5367  ;;  %3859 = vmatpush.msrb.mxu0 %v5209_v51 }
0x2868   : > { %v4108_v40 = vsel %vm956_vm3, %v5368_v52, 0.0 }
0x2869   : > { %4109 = vadd.xlane.f32.xlu0 %v4108_v40  ;;  %3860 = vmatpush.msrb.mxu0 %v5210_v53 }
0x286a   : > { %4858 = vmatmul.msk.f32.vlgmr.msrb.gmra.mxu0 %vm956_vm3, %v3835_v41 }
0x286b   : > { %3971 = vmatpush.bf16.msra.mxu0 %v3962_v13 }
0x286f   : > { %4156 = vmatpush.bf16.msrb.mxu0 %v4147_v63 }
0x28dc   : > { %v4110_v57 = vpop.xlane.xlu0 %4109 }
0x28dd   : > { %5369 = vrcp.f32 %v4110_v57 }
0x28e3   : > { %v5370_v45 = vpop.eup %5369 }
0x28e4   : > { %v4112_v58 = vmul.f32 %v5370_v45, %v5368_v52 }
0x28e6   : > { %4873 = vmatmul.msk.f32.vlgmr.msra.gmra.mxu2 %vm956_vm3, %v4112_v58 }
0x28e7   : > { %v3862_v60 = vpop.f32.mrf.mxu0 }
0x28e8   : > { %v3865_v61 = vpack.c.bf16 %v3862_v60, %v3862_v60  ;;  %v4959_v60 = vld [vmem:[%s6906_s2 + $0x8] sm:$0xff] }
0x28e9   : > { %4322 = vmatpush.bf16.msrb.mxu2 %v4959_v60 }
0x28ea   : > { %4864 = vmatmul.msk.bf16.vlgmr.msra.gmra.mxu0 %vm924_vm2, %v3865_v61 }
0x2967   : > { %v3973_v0 = vpop.f32.mrf.mxu0 }
0x2968   : > { %v3974_v3 = vadd.f32 %v3973_v0, %v3954_v11  ;;  %v4955_v11 = vld [vmem:[%s6858_s15 + $0x28] sm:$0xff] }
0x2969   : > { %v4139_v30 = vpop.f32.mrf.mxu2 }
0x296a   : > { %v4142_v1 = vpack.c.bf16 %v4139_v30, %v4139_v30  ;;  %v4069_v4 = vadd.f32 %v4065_v59, %v3974_v3  ;;  %v4193_v59 = vperm.slane %v6620_v42, 5  ;;  %v4958_v42 = vld [vmem:[%s6906_s2] sm:$0xff] }
0x296b   : > { %4323 = vmatpush.bf16.msrb.mxu2 %v4958_v42 }
0x296c   : > { %4874 = vmatmul.msk.bf16.vlgmr.msrb.gmra.mxu0 %vm924_vm2, %v4142_v1 }
0x296f   : > { %v3975_v32 = vpop.f32.mrf.mxu0 }
0x29e9   : > { %v4158_v9 = vpop.f32.mrf.mxu0 }
0x29ea   : > { %v4162_v10 = vadd.f32 %v4158_v9, %v4069_v4 }
0x29ec   : > { %v4164_v15 = vadd.f32 %v4163_v6, %v4162_v10  ;;  %v4288_v6 = vperm.slane %v6717_v31, 3  ;;  %v4290_v10 = vperm.slane %v6717_v31, 4 }
0x29ee   : > { %v4165_v17 = vadd.f32 %v4164_v15, %v6722_v44  ;;  %v4957_v44 = vld [vmem:[%s6858_s15 + $0x38] sm:$0xff] }
0x29ef   : > { %4256 = vmatpush.bf16.msra.mxu3 %v4957_v44 }
0x29f0   : > { %v4166_v28 = vsel %vm900_vm1, %v4165_v17, 0.0 }
0x29f1   : > { %4167 = vadd.xlane.f32.xlu0 %v4166_v28  ;;  %v4160_v19 = vpop.f32.mrf.mxu0 }
0x29f2   : > { %v5216_v19 = vld [vmem:[%s6910_s21] ss:$0 sm:$0xff] }
0x29f3   : > { %4257 = vmatpush.bf16.msra.mxu3 %v4956_v23 }
0x29f7   : > { %4258 = vmatpush.bf16.msra.mxu3 %v4955_v11 }
0x29fb   : > { %4259 = vmatpush.bf16.msra.mxu3 %v4954_v46 }
0x2a64   : > { %v4168_v20 = vpop.xlane.xlu0 %4167 }
0x2a65   : > { %v4169_v24 = vmul.f32 %v4168_v20, %v6238_v12 }
0x2a67   : > { %v4170_v21 = vsub.f32 %v4165_v17, %v4169_v24 }
0x2a69   : > { %v4171_v22 = vmul.f32 %v4170_v21, %v4170_v21 }
0x2a6b   : > { %v4172_v37 = vsel %vm900_vm1, %v4171_v22, 0.0 }
0x2a6c   : > { %4173 = vadd.xlane.f32.xlu0 %v4172_v37 }
0x2adf   : > { %v4174_v34 = vpop.xlane.xlu0 %4173 }
0x2ae0   : > { %v4175_v27 = vmul.f32 %v4174_v34, %v6238_v12 }
0x2ae2   : > { %v4176_v29 = vadd.f32 1e-05, %v4175_v27 }
0x2ae4   : > { %5371 = vrsqrt.f32 %v4176_v29  ;;  %vm4183_vm3 = vweird.f32 %v4176_v29 }
0x2aea   : > { %v5372_v5 = vpop.eup %5371 }
0x2aeb   : > { %v4178_v33 = vmul.f32 %v5372_v5, %v4176_v29  ;;  %vm4184_vm2 = vweird.f32 %v5372_v5 }
0x2aec   : > { %vm4185_vm4 = vmor %vm4183_vm3, %vm4184_vm2 }
0x2aed   : > { %v4179_v39 = vmul.f32 %v5372_v5, %v4178_v33 }
0x2aef   : > { %v4180_v54 = vmul.f32 0.5, %v4179_v39 }
0x2af1   : > { %v4181_v7 = vsub.f32 1.5, %v4180_v54 }
0x2af3   : > { %v4182_v35 = vmul.f32 %v5372_v5, %v4181_v7 }
0x2af5   : > { %v4186_v2 = vsel %vm4185_vm4, %v5372_v5, %v4182_v35 }
0x2af6   : > { %v4187_v16 = vmul.f32 %v4186_v2, %v4170_v21 }
0x2af8   : > { %v4189_v38 = vmul.f32 %v4188_v36, %v4187_v16 }
0x2afa   : > { %v4191_v18 = vadd.f32 %v4190_v55, %v4189_v38 }
0x2afc   : > { %v4192_v43 = vpack.c.bf16 %v4191_v18, %v4191_v18 }
0x2afe   : > { %4883 = vmatmul.msk.bf16.vlgmr.msra.gmra.mxu1 %vm900_vm1, %v4192_v43 }
0x2b7b   : > { %v4218_v47 = vpop.f32.mrf.mxu1 }
0x2b7c   : > { %v4219_v14 = vadd.f32 %v4218_v47, %v4193_v59 }
0x2b7e   : > { %v4222_v8 = vmax.f32 %v4219_v14, 0.0 }
0x2b80   : > { %v4223_v48 = vpack.c.bf16 %v4222_v8, %v4222_v8 }
0x2b82   : > { %4900 = vmatmul.msk.bf16.vlgmr.msra.gmra.mxu3 %vm1512_vm12, %v4223_v48 }
0x2b83   : > { %v4220_v49 = vpop.f32.mrf.mxu1 }
0x2c05   : > { %v4261_v51 = vpop.f32.mrf.mxu3 }
0x2c06   : > { %v4262_v52 = vadd.f32 %v4261_v51, %v4224_v50 }
0x2c08   : > { %v4265_v53 = vadd.f32 %v4262_v52, %v4191_v18 }
0x2c0a   : > { %v4266_v41 = vsel %vm900_vm1, %v4265_v53, 0.0 }
0x2c0b   : > { %4267 = vadd.xlane.f32.xlu2 %v4266_v41 }
0x2c0d   : > { %v4263_v40 = vpop.f32.mrf.mxu3 }
0x2c7e   : > { %v4268_v56 = vpop.xlane.xlu2 %4267 }
0x2c7f   : > { %v4269_v13 = vmul.f32 %v4268_v56, %v6238_v12 }
0x2c81   : > { %v4270_v57 = vsub.f32 %v4265_v53, %v4269_v13 }
0x2c83   : > { %v4271_v45 = vmul.f32 %v4270_v57, %v4270_v57 }
0x2c85   : > { %v4272_v58 = vsel %vm900_vm1, %v4271_v45, 0.0 }
0x2c86   : > { %4273 = vadd.xlane.f32.xlu0 %v4272_v58 }
0x2cf9   : > { %v4274_v61 = vpop.xlane.xlu0 %4273 }
0x2cfa   : > { %v4275_v62 = vmul.f32 %v4274_v61, %v6238_v12 }
0x2cfc   : > { %v4276_v63 = vadd.f32 1e-05, %v4275_v62 }
0x2cfe   : > { %5373 = vrsqrt.f32 %v4276_v63  ;;  %vm4283_vm10 = vweird.f32 %v4276_v63 }
0x2d04   : > { %v5374_v0 = vpop.eup %5373 }
0x2d05   : > { %v4278_v30 = vmul.f32 %v5374_v0, %v4276_v63  ;;  %vm4284_vm12 = vweird.f32 %v5374_v0 }
0x2d06   : > { %vm4285_vm11 = vmor %vm4283_vm10, %vm4284_vm12 }
0x2d07   : > { %v4279_v1 = vmul.f32 %v5374_v0, %v4278_v30 }
0x2d09   : > { %v4280_v32 = vmul.f32 0.5, %v4279_v1 }
0x2d0b   : > { %v4281_v3 = vsub.f32 1.5, %v4280_v32 }
0x2d0d   : > { %v4282_v4 = vmul.f32 %v5374_v0, %v4281_v3 }
0x2d0f   : > { %v4286_v9 = vsel %vm4285_vm11, %v5374_v0, %v4282_v4 }
0x2d10   : > { %v4287_v15 = vmul.f32 %v4286_v9, %v4270_v57 }
0x2d12   : > { %v4289_v12 = vmul.f32 %v4288_v6, %v4287_v15 }
0x2d14   : > { %v4291_v17 = vadd.f32 %v4290_v10, %v4289_v12 }
0x2d16   : > { %v4296_v28 = vpack.c.bf16 %v4291_v17, %v4291_v17 }
0x2d18   : > { %4909 = vmatmul.msk.bf16.vlgmr.msrb.gmra.mxu2 %vm900_vm1, %v4296_v28 }
0x2d9b   : > { %v4325_v31 = vpop.f32.mrf.mxu2 }
0x2d9c   : > { %v4326_v20 = vadd.f32 %v5216_v19, %v4325_v31 }
0x2d9e   : > { %4329 = vst [vmem:[%s807_s24] sm:$0xff] %v4326_v20 }
0x2d9f   : > { %5763 = shalt.err (!%p5760_p8)
}
0x2da0   : > { %5008 = dma.vmem_to_hbm [thread:$0]  (%p5994_p5), %s4344_s26, 128, %s4346_s3, %s4331_s27  }
0x2da3   : > { %v4327_v24 = vpop.f32.mrf.mxu2 }
0x2da4 PF: > { %s6911_s8 = sld [smem:[#allocation34_spill]] }
0x2da5   : > { %s6912_s23 = sld [smem:[#allocation31_spill]] }
0x2daa   : > { %p5075_p9 = scmp.ge.s32.totalorder %s6911_s8, 2 }
0x2dab   : > { %s4357_s5 = sand.u32 1, %s6912_s23  }
0x2dac   : > { %p5048_p10 = pnand %p5075_p9, %p5998_p6  ;;  %s4358_s17 = scalar_lea.sflag [#allocation4], %s4357_s5 }
0x2dae   : > { %p5049_p11 = pneg %p5048_p10 }
0x2db0   : > { %5809 = dma.done.wait (%p5049_p11), %s4358_s17, 128  }
0x2db1   : > { %5811 = vsyncadd (%p5049_p11), %s4358_s17, 4294967168  ;;  %s6914_s21 = sld [smem:[#allocation35_spill]] }
0x2db2   : > { %s6915_s0 = sld [smem:[#allocation32_spill]] }
0x2db3   : > { %s6916_s30 = sld [smem:[#allocation33_spill]] }
0x2db4   : > { %s6917_s20 = sld [smem:[#allocation36_spill]] }
0x2db7   : > { %p36_p12 = scmp.ge.s32.totalorder %s6914_s21, 4  }
0x2db9   :  { %38 = sbr.rel (!%p36_p12) target bundleno = 20 (0x14), region = 196 }
0x2dbe   :  { %4364 = vsyncpa [#allocation3], 1 }
0x2dbf   :  { %4366 = vsyncpa [#allocation3 + $0x1], 1 }
0x2dc0   :  { %4367 = vsyncpa [#allocation6], 1 }
0x2dc1   :  { %4368 = vsyncpa [#allocation9], 1 }
0x2dc2   :  { %4369 = vsyncpa [#allocation12], 1 }
0x2dc3   :  { %4370 = vsyncpa [#allocation15], 1 }
0x2dc4   :  { %4371 = vsyncpa [#allocation18], 1 }
0x2dc5   :  { %4372 = vsyncpa [#allocation21], 1 }
0x2dc6   :  { %4373 = vsyncpa [#allocation4], 1 }
0x2dc7   :  { %4375 = vsyncpa [#allocation4 + $0x1], 1 }

</bundles_post_ra>
